<compile_context>
chip_gen: v6e
topology: v6e:2x2x1
jax: 0.10.0
libtpu: 0.0.40
codegen_flags: <defaults>
</compile_context>

<pallas_src>
import jax
import jax.numpy as jnp
from jax.experimental import pallas as pl
from jax.experimental.pallas import tpu as pltpu

DEPTH = 2
N_B = 16            # number of b-values == network width (net_pars.width == 0)
WIDTH = N_B
HID = 4 * WIDTH     # fused hidden width (4 encoders side by side)
BATCH = 512
TB = 256            # batch tile (>=256, multiple of 8); grid = BATCH/TB = 2 steps

# net_pars constraints: [V1-3, V4-6, Fp, U1-3, U4-6, S0]
CONS_MIN = (0.0, 0.0, 0.0, 0.0, 0.0, 0.8)
CONS_MAX = (0.05, 0.05, 0.7, 0.3, 0.3, 1.2)

# ---- packed-column layout ---------------------------------------------------
# params columns: 0..5 = V_xx,V_xy,V_xz,V_yy,V_zz,V_yz ; 6..11 = U (same order)
#                 12 = Fp ; 13 = S0
N_PAR = 14
FP_COL = 12
S0_COL = 13
# quadratic form (exactly the torch expression, term by term):
#   bx^2*xx^2 + by^2*(xy^2+yy^2) + bz^2*(xz^2+yz^2+zz^2)
#   + 2*bx*by*(xx*yy) + 2*by*bz*(xy*yz+yy*zz) + 2*bx*bz*(xx*zz)
# tensor-local column indices: xx=0, xy=1, xz=2, yy=3, zz=4, yz=5
_LEFT = (0, 1, 3, 2, 5, 4, 0, 1, 3, 0)
_RIGHT = (0, 1, 3, 2, 5, 4, 3, 5, 4, 4)
N_PROD = 2 * len(_LEFT)          # 20 (10 products for Dt/V, 10 for Dp/U)
A_OFF = N_PAR                    # 14
B_OFF = N_PAR + N_PROD           # 34
KE = N_PAR + 2 * N_PROD          # 54 expanded final-layer width


def _elu(z):
    # torch.nn.ELU(alpha=1): x if x > 0 else exp(x) - 1
    return jnp.where(z > 0, z, jnp.exp(z) - 1.0)


def ivim_dti_kernel(x_ref, w0_ref, b0_ref, w1_ref, b1_ref, wfe_ref, bfe_ref,
                    cmin_ref, cscale_ref, cq_ref, nbval_ref,
                    xout_ref, pout_ref):
    X = x_ref[...]                                                   # (TB, N_B)

    # --- fused 4-encoder MLP: 3 MXU matmuls total ---
    h = _elu(jnp.dot(X, w0_ref[...],
                     preferred_element_type=jnp.float32) + b0_ref[...])   # (TB, HID)
    h = _elu(jnp.dot(h, w1_ref[...],
                     preferred_element_type=jnp.float32) + b1_ref[...])   # (TB, HID)
    raw = jnp.dot(h, wfe_ref[...],
                  preferred_element_type=jnp.float32) + bfe_ref[...]      # (TB, KE)

    # --- vectorized constraint epilogue: one sigmoid pass over all columns ---
    sg = pl.reciprocal(1.0 + jnp.exp(-raw), approx=True)
    con = cmin_ref[...] + sg * cscale_ref[...]
    lane = jax.lax.broadcasted_iota(jnp.int32, raw.shape, 1)
    con = jnp.where(lane == FP_COL, jnp.abs(raw), con)   # Fp = |params2| (torch)

    # single lane-dense parameter store (was 14 masked 1-lane stores)
    pout_ref[...] = con[:, :N_PAR]

    # --- quadratic forms as one MXU matmul ---
    A = con[:, A_OFF:A_OFF + N_PROD]                      # (TB, 20) left operands
    Bm = con[:, B_OFF:B_OFF + N_PROD]                     # (TB, 20) right operands
    dtdp = jnp.dot(A * Bm, cq_ref[...],
                   preferred_element_type=jnp.float32)    # (TB, 2*N_B) = [Dt | Dp]

    e = jnp.exp(nbval_ref[...] * dtdp)                    # exp(-bval * D), one pass
    e_dt = e[:, :N_B]
    e_dp = e[:, N_B:]

    Fp = con[:, FP_COL:FP_COL + 1]
    S0 = con[:, S0_COL:S0_COL + 1]
    sig = S0 * (Fp * e_dp + (1.0 - Fp) * e_dt)            # (TB, N_B)
    xout_ref[...] = jnp.minimum(sig, 1.0)                 # X[X > 1] = 1


def ivim_dti_net(X, w0, b0, w1, b1, wfe, bfe, cmin_e, cscale_e, cq, nbval2):
    """X: (B, N_B) float32. Returns the 15-tuple the torch module returns."""
    B = X.shape[0]
    Bp = pl.cdiv(B, TB) * TB
    if Bp != B:
        X = jnp.pad(X, ((0, Bp - B), (0, 0)))
    grid = (Bp // TB,)

    def rep(shape):
        return pl.BlockSpec(shape, lambda i, _n=len(shape): (0,) * _n)

    x_out, p_out = pl.pallas_call(
        ivim_dti_kernel,
        out_shape=(jax.ShapeDtypeStruct((Bp, N_B), jnp.float32),
                   jax.ShapeDtypeStruct((Bp, N_PAR), jnp.float32)),
        grid=grid,
        in_specs=[
            pl.BlockSpec((TB, N_B), lambda i: (i, 0)),   # X tile
            rep(w0.shape), rep(b0.shape),                # fused depth-0
            rep(w1.shape), rep(b1.shape),                # fused depth-1 (block-diag)
            rep(wfe.shape), rep(bfe.shape),              # expanded final layer
            rep(cmin_e.shape), rep(cscale_e.shape),      # constraint rows
            rep(cq.shape), rep(nbval2.shape),            # quad-form coefs, -bval
        ],
        out_specs=(pl.BlockSpec((TB, N_B), lambda i: (i, 0)),
                   pl.BlockSpec((TB, N_PAR), lambda i: (i, 0))),
        compiler_params=pltpu.CompilerParams(
            dimension_semantics=("parallel",)),
    )(X, w0, b0, w1, b1, wfe, bfe, cmin_e, cscale_e, cq, nbval2)

    x_out = x_out[:B]
    p_out = p_out[:B]
    Fp = p_out[:, FP_COL:FP_COL + 1]
    S0 = p_out[:, S0_COL:S0_COL + 1]
    V = [p_out[:, i:i + 1] for i in range(6)]
    U = [p_out[:, i:i + 1] for i in range(6, 12)]
    return (x_out, Fp, *V, *U, S0)


def pack_params(wh, bh, wf01, bf01, wf23, bf23, bval, bvec):
    """Pack per-encoder torch-style weights into the fused kernel operands."""
    # depth-0: side-by-side concat
    w0 = jnp.concatenate([wh[e, 0] for e in range(4)], axis=1)        # (N_B, HID)
    b0 = jnp.concatenate([bh[e, 0] for e in range(4)], axis=1)        # (1, HID)
    # depth-1: block-diagonal
    w1 = jnp.zeros((HID, HID), jnp.float32)
    for e in range(4):
        w1 = w1.at[e * WIDTH:(e + 1) * WIDTH, e * WIDTH:(e + 1) * WIDTH].set(wh[e, 1])
    b1 = jnp.concatenate([bh[e, 1] for e in range(4)], axis=1)        # (1, HID)
    # final layers: block structure into 14 columns [V(6)|U(6)|Fp|S0]
    wf = jnp.zeros((HID, N_PAR), jnp.float32)
    wf = wf.at[0 * WIDTH:1 * WIDTH, 0:6].set(wf01[0])
    wf = wf.at[1 * WIDTH:2 * WIDTH, 6:12].set(wf01[1])
    wf = wf.at[2 * WIDTH:3 * WIDTH, 12:13].set(wf23[0])
    wf = wf.at[3 * WIDTH:4 * WIDTH, 13:14].set(wf23[1])
    bf = jnp.concatenate([bf01[0], bf01[1], bf23[0], bf23[1]], axis=1)  # (1, 14)

    # expand columns: [params(14) | A-operands(20) | B-operands(20)]
    a_idx = [i for i in _LEFT] + [6 + i for i in _LEFT]
    b_idx = [i for i in _RIGHT] + [6 + i for i in _RIGHT]
    col_idx = jnp.asarray(list(range(N_PAR)) + a_idx + b_idx, jnp.int32)
    wfe = wf[:, col_idx]                                               # (HID, KE)
    bfe = bf[:, col_idx]                                               # (1, KE)

    # per-column constraint min / scale, expanded with the same column map
    V123min, V456min, _fmin, U123min, U456min, S0min = CONS_MIN
    V123max, V456max, _fmax, U123max, U456max, S0max = CONS_MAX
    base_min = jnp.asarray([[V123min] * 3 + [V456min] * 3
                            + [U123min] * 3 + [U456min] * 3
                            + [0.0, S0min]], jnp.float32)
    base_max = jnp.asarray([[V123max] * 3 + [V456max] * 3
                            + [U123max] * 3 + [U456max] * 3
                            + [1.0, S0max]], jnp.float32)
    cmin_e = base_min[:, col_idx]
    cscale_e = (base_max - base_min)[:, col_idx]

    # quadratic-form coefficient matrix (20, 2*N_B): [V-products -> Dt | U -> Dp]
    bx, by, bz = bvec[0], bvec[1], bvec[2]
    coef = jnp.stack([bx * bx, by * by, by * by, bz * bz, bz * bz, bz * bz,
                      2 * bx * by, 2 * by * bz, 2 * by * bz, 2 * bx * bz], axis=0)
    z = jnp.zeros_like(coef)
    cq = jnp.concatenate([jnp.concatenate([coef, z], axis=1),
                          jnp.concatenate([z, coef], axis=1)], axis=0)  # (20, 2*N_B)

    nbval2 = jnp.concatenate([-bval, -bval], axis=1)                    # (1, 2*N_B)
    return w0, b0, w1, b1, wfe, bfe, cmin_e, cscale_e, cq, nbval2


def init_params(key):
    """Deterministic torch-Linear-like init: U(-1/sqrt(fan_in), 1/sqrt(fan_in))."""
    ks = jax.random.split(key, 8)
    s = 1.0 / jnp.sqrt(jnp.float32(WIDTH))
    wh = jax.random.uniform(ks[0], (4, DEPTH, WIDTH, WIDTH), jnp.float32, -s, s)
    bh = jax.random.uniform(ks[1], (4, DEPTH, 1, WIDTH), jnp.float32, -s, s)
    wf01 = jax.random.uniform(ks[2], (2, WIDTH, 6), jnp.float32, -s, s)
    bf01 = jax.random.uniform(ks[3], (2, 1, 6), jnp.float32, -s, s)
    wf23 = jax.random.uniform(ks[4], (2, WIDTH, 1), jnp.float32, -s, s)
    bf23 = jax.random.uniform(ks[5], (2, 1, 1), jnp.float32, -s, s)
    return wh, bh, wf01, bf01, wf23, bf23


def reference_net(X, wh, bh, wf01, bf01, wf23, bf23, bval, bvec):
    """Pure-JAX mirror of the torch forward (un-fused), for validation."""
    def enc(e, wf, bf):
        h = X
        for d in range(DEPTH):
            z = h @ wh[e, d] + bh[e, d]
            h = jnp.where(z > 0, z, jnp.exp(z) - 1.0)
        return h @ wf + bf
    sg = lambda z: 1.0 / (1.0 + jnp.exp(-z))
    p0 = enc(0, wf01[0], bf01[0]); p1 = enc(1, wf01[1], bf01[1])
    p2 = enc(2, wf23[0], bf23[0]); p3 = enc(3, wf23[1], bf23[1])
    V123min, V456min, _f0, U123min, U456min, S0min = CONS_MIN
    V123max, V456max, _f1, U123max, U456max, S0max = CONS_MAX
    Vxx = V123min + sg(p0[:, 0:1]) * (V123max - V123min)
    Vxy = V123min + sg(p0[:, 1:2]) * (V123max - V123min)
    Vxz = V123min + sg(p0[:, 2:3]) * (V123max - V123min)
    Vyy = V456min + sg(p0[:, 3:4]) * (V456max - V456min)
    Vzz = V456min + sg(p0[:, 4:5]) * (V456max - V456min)
    Vyz = V456min + sg(p0[:, 5:6]) * (V456max - V456min)
    Uxx = U123min + sg(p1[:, 0:1]) * (U123max - U123min)
    Uxy = U123min + sg(p1[:, 1:2]) * (U123max - U123min)
    Uxz = U123min + sg(p1[:, 2:3]) * (U123max - U123min)
    Uyy = U456min + sg(p1[:, 3:4]) * (U456max - U456min)
    Uzz = U456min + sg(p1[:, 4:5]) * (U456max - U456min)
    Uyz = U456min + sg(p1[:, 5:6]) * (U456max - U456min)
    Fp = jnp.abs(p2[:, 0:1])
    S0 = S0min + sg(p3[:, 0:1]) * (S0max - S0min)
    bx, by, bz = bvec[0:1, :], bvec[1:2, :], bvec[2:3, :]
    Dt = (bx * bx * Vxx * Vxx + by * by * (Vxy * Vxy + Vyy * Vyy)
          + bz * bz * (Vxz * Vxz + Vyz * Vyz + Vzz * Vzz)
          + 2 * by * bx * (Vxx * Vyy) + 2 * by * bz * (Vxy * Vyz + Vyy * Vzz)
          + 2 * bx * bz * (Vxx * Vzz))
    Dp = (bx * bx * Uxx * Uxx + by * by * (Uxy * Uxy + Uyy * Uyy)
          + bz * bz * (Uxz * Uxz + Uyz * Uyz + Uzz * Uzz)
          + 2 * by * bx * (Uxx * Uyy) + 2 * by * bz * (Uxy * Uyz + Uyy * Uzz)
          + 2 * bx * bz * (Uxx * Uzz))
    sig = S0 * (Fp * jnp.exp(-bval * Dp) + (1.0 - Fp) * jnp.exp(-bval * Dt))
    Xo = jnp.minimum(sig, 1.0)
    return (Xo, Fp, Vxx, Vxy, Vxz, Vyy, Vzz, Vyz, Uxx, Uxy, Uxz, Uyy, Uzz, Uyz, S0)


if __name__ == "__main__":
    key = jax.random.PRNGKey(0)
    k_x, k_p, k_v = jax.random.split(key, 3)

    # normalized diffusion signal in [0, 1]
    X = jax.random.uniform(k_x, (BATCH, N_B), jnp.float32, 0.0, 1.0)

    # b-values (scaled) and unit gradient directions, shaped (1, N_B) / (3, N_B)
    bval = jnp.linspace(0.0, 1.0, N_B, dtype=jnp.float32).reshape(1, N_B)
    bvec = jax.random.normal(k_v, (3, N_B), jnp.float32)
    bvec = bvec / jnp.sqrt(jnp.sum(bvec * bvec, axis=0, keepdims=True))

    raw_params = init_params(k_p)
    packed = pack_params(*raw_params, bval, bvec)

    outs = jax.jit(ivim_dti_net)(X, *packed)
    outs = jax.block_until_ready(outs)
    assert outs[0].shape == (BATCH, N_B) and outs[-1].shape == (BATCH, 1)

    # validate against the un-fused pure-JAX reference (approx sigmoid recip -> loose tol)
    refs = reference_net(X, *raw_params, bval, bvec)
    for got, want in zip(outs, refs):
        assert jnp.allclose(got, want, atol=1e-2, rtol=1e-2), "mismatch vs reference"

    print("KERNEL_OK")
</pallas_src>

<mosaic_0001>
module attributes {stable_mosaic.version = 11 : i64} {
  func.func @ivim_dti_kernel(%arg0: i32, %arg1: memref<256x16xf32, #tpu.memory_space<vmem>>, %arg2: memref<16x64xf32, #tpu.memory_space<vmem>>, %arg3: memref<1x64xf32, #tpu.memory_space<vmem>>, %arg4: memref<64x64xf32, #tpu.memory_space<vmem>>, %arg5: memref<1x64xf32, #tpu.memory_space<vmem>>, %arg6: memref<64x54xf32, #tpu.memory_space<vmem>>, %arg7: memref<1x54xf32, #tpu.memory_space<vmem>>, %arg8: memref<1x54xf32, #tpu.memory_space<vmem>>, %arg9: memref<1x54xf32, #tpu.memory_space<vmem>>, %arg10: memref<20x32xf32, #tpu.memory_space<vmem>>, %arg11: memref<1x32xf32, #tpu.memory_space<vmem>>, %arg12: memref<256x16xf32, #tpu.memory_space<vmem>>, %arg13: memref<256x14xf32, #tpu.memory_space<vmem>>) attributes {dimension_semantics = [#tpu.dimension_semantics<parallel>], iteration_bounds = array<i64: 2>, scalar_prefetch = 0 : i64, scratch_operands = 0 : i64, tpu.core_type = #tpu.core_type<tc>, window_params = [{transform_indices = @transform_0, window_bounds = array<i64: 256, 16>}, {pipeline_mode = #tpu.pipeline_mode<synchronous>, transform_indices = @transform_1, window_bounds = array<i64: 16, 64>}, {pipeline_mode = #tpu.pipeline_mode<synchronous>, transform_indices = @transform_2, window_bounds = array<i64: 1, 64>}, {pipeline_mode = #tpu.pipeline_mode<synchronous>, transform_indices = @transform_3, window_bounds = array<i64: 64, 64>}, {pipeline_mode = #tpu.pipeline_mode<synchronous>, transform_indices = @transform_4, window_bounds = array<i64: 1, 64>}, {pipeline_mode = #tpu.pipeline_mode<synchronous>, transform_indices = @transform_5, window_bounds = array<i64: 64, 54>}, {pipeline_mode = #tpu.pipeline_mode<synchronous>, transform_indices = @transform_6, window_bounds = array<i64: 1, 54>}, {pipeline_mode = #tpu.pipeline_mode<synchronous>, transform_indices = @transform_7, window_bounds = array<i64: 1, 54>}, {pipeline_mode = #tpu.pipeline_mode<synchronous>, transform_indices = @transform_8, window_bounds = array<i64: 1, 54>}, {pipeline_mode = #tpu.pipeline_mode<synchronous>, transform_indices = @transform_9, window_bounds = array<i64: 20, 32>}, {pipeline_mode = #tpu.pipeline_mode<synchronous>, transform_indices = @transform_10, window_bounds = array<i64: 1, 32>}, {transform_indices = @transform_11, window_bounds = array<i64: 256, 16>}, {transform_indices = @transform_12, window_bounds = array<i64: 256, 14>}]} {
    %c0 = arith.constant 0 : index
    %c0_0 = arith.constant 0 : index
    %0 = vector.load %arg1[%c0, %c0_0] : memref<256x16xf32, #tpu.memory_space<vmem>>, vector<256x16xf32>
    %c0_1 = arith.constant 0 : index
    %c0_2 = arith.constant 0 : index
    %1 = vector.load %arg2[%c0_1, %c0_2] : memref<16x64xf32, #tpu.memory_space<vmem>>, vector<16x64xf32>
    %cst = arith.constant dense<0.000000e+00> : vector<256x64xf32>
    %2 = tpu.matmul %0, %1, %cst {dimension_numbers = #tpu.dot_dimension_numbers<[1], [0], [0], [1], [0, 0, 1, 1], [], []>} : vector<256x16xf32>, vector<16x64xf32>, vector<256x64xf32> -> vector<256x64xf32>
    %c0_3 = arith.constant 0 : index
    %c0_4 = arith.constant 0 : index
    %3 = vector.load %arg3[%c0_3, %c0_4] : memref<1x64xf32, #tpu.memory_space<vmem>>, vector<1x64xf32>
    %4 = vector.broadcast %3 : vector<1x64xf32> to vector<256x64xf32>
    %5 = arith.addf %2, %4 : vector<256x64xf32>
    %cst_5 = arith.constant 0.000000e+00 : f32
    %6 = vector.broadcast %cst_5 : f32 to vector<256x64xf32>
    %7 = arith.cmpf ogt, %5, %6 : vector<256x64xf32>
    %8 = math.exp %5 : vector<256x64xf32>
    %cst_6 = arith.constant 1.000000e+00 : f32
    %9 = vector.broadcast %cst_6 : f32 to vector<256x64xf32>
    %10 = arith.subf %8, %9 : vector<256x64xf32>
    %11 = arith.select %7, %5, %10 : vector<256x64xi1>, vector<256x64xf32>
    %c0_7 = arith.constant 0 : index
    %c0_8 = arith.constant 0 : index
    %12 = vector.load %arg4[%c0_7, %c0_8] : memref<64x64xf32, #tpu.memory_space<vmem>>, vector<64x64xf32>
    %cst_9 = arith.constant dense<0.000000e+00> : vector<256x64xf32>
    %13 = tpu.matmul %11, %12, %cst_9 {dimension_numbers = #tpu.dot_dimension_numbers<[1], [0], [0], [1], [0, 0, 1, 1], [], []>} : vector<256x64xf32>, vector<64x64xf32>, vector<256x64xf32> -> vector<256x64xf32>
    %c0_10 = arith.constant 0 : index
    %c0_11 = arith.constant 0 : index
    %14 = vector.load %arg5[%c0_10, %c0_11] : memref<1x64xf32, #tpu.memory_space<vmem>>, vector<1x64xf32>
    %15 = vector.broadcast %14 : vector<1x64xf32> to vector<256x64xf32>
    %16 = arith.addf %13, %15 : vector<256x64xf32>
    %cst_12 = arith.constant 0.000000e+00 : f32
    %17 = vector.broadcast %cst_12 : f32 to vector<256x64xf32>
    %18 = arith.cmpf ogt, %16, %17 : vector<256x64xf32>
    %19 = math.exp %16 : vector<256x64xf32>
    %cst_13 = arith.constant 1.000000e+00 : f32
    %20 = vector.broadcast %cst_13 : f32 to vector<256x64xf32>
    %21 = arith.subf %19, %20 : vector<256x64xf32>
    %22 = arith.select %18, %16, %21 : vector<256x64xi1>, vector<256x64xf32>
    %c0_14 = arith.constant 0 : index
    %c0_15 = arith.constant 0 : index
    %23 = vector.load %arg6[%c0_14, %c0_15] : memref<64x54xf32, #tpu.memory_space<vmem>>, vector<64x54xf32>
    %cst_16 = arith.constant dense<0.000000e+00> : vector<256x54xf32>
    %24 = tpu.matmul %22, %23, %cst_16 {dimension_numbers = #tpu.dot_dimension_numbers<[1], [0], [0], [1], [0, 0, 1, 1], [], []>} : vector<256x64xf32>, vector<64x54xf32>, vector<256x54xf32> -> vector<256x54xf32>
    %c0_17 = arith.constant 0 : index
    %c0_18 = arith.constant 0 : index
    %25 = vector.load %arg7[%c0_17, %c0_18] : memref<1x54xf32, #tpu.memory_space<vmem>>, vector<1x54xf32>
    %26 = vector.broadcast %25 : vector<1x54xf32> to vector<256x54xf32>
    %27 = arith.addf %24, %26 : vector<256x54xf32>
    %cst_19 = arith.constant 0.000000e+00 : f32
    %28 = vector.broadcast %cst_19 : f32 to vector<256x54xf32>
    %29 = arith.subf %28, %27 : vector<256x54xf32>
    %30 = math.exp %29 : vector<256x54xf32>
    %cst_20 = arith.constant 1.000000e+00 : f32
    %31 = vector.broadcast %cst_20 : f32 to vector<256x54xf32>
    %32 = arith.addf %31, %30 : vector<256x54xf32>
    %33 = tpu.reciprocal %32 {approx = true} : vector<256x54xf32> -> vector<256x54xf32>
    %c0_21 = arith.constant 0 : index
    %c0_22 = arith.constant 0 : index
    %34 = vector.load %arg8[%c0_21, %c0_22] : memref<1x54xf32, #tpu.memory_space<vmem>>, vector<1x54xf32>
    %c0_23 = arith.constant 0 : index
    %c0_24 = arith.constant 0 : index
    %35 = vector.load %arg9[%c0_23, %c0_24] : memref<1x54xf32, #tpu.memory_space<vmem>>, vector<1x54xf32>
    %36 = vector.broadcast %35 : vector<1x54xf32> to vector<256x54xf32>
    %37 = arith.mulf %33, %36 : vector<256x54xf32>
    %38 = vector.broadcast %34 : vector<1x54xf32> to vector<256x54xf32>
    %39 = arith.addf %38, %37 : vector<256x54xf32>
    %40 = tpu.iota {dimensions = array<i32: 1>} : vector<256x54xi32>
    %c12_i32 = arith.constant 12 : i32
    %41 = vector.broadcast %c12_i32 : i32 to vector<256x54xi32>
    %42 = arith.cmpi eq, %40, %41 : vector<256x54xi32>
    %43 = math.absf %27 : vector<256x54xf32>
    %44 = arith.select %42, %43, %39 : vector<256x54xi1>, vector<256x54xf32>
    %45 = vector.extract_strided_slice %44 {offsets = [0, 0], sizes = [256, 14], strides = [1, 1]} : vector<256x54xf32> to vector<256x14xf32>
    %c0_25 = arith.constant 0 : index
    %c0_26 = arith.constant 0 : index
    %46 = vector.load %arg13[%c0_25, %c0_26] : memref<256x14xf32, #tpu.memory_space<vmem>>, vector<256x14xf32>
    tpu.vector_store %arg13[%c0_25, %c0_26], %45 {strides = array<i32>} : memref<256x14xf32, #tpu.memory_space<vmem>>, vector<256x14xf32>,
    %47 = vector.extract_strided_slice %44 {offsets = [0, 14], sizes = [256, 20], strides = [1, 1]} : vector<256x54xf32> to vector<256x20xf32>
    %48 = vector.extract_strided_slice %44 {offsets = [0, 34], sizes = [256, 20], strides = [1, 1]} : vector<256x54xf32> to vector<256x20xf32>
    %49 = arith.mulf %47, %48 : vector<256x20xf32>
    %c0_27 = arith.constant 0 : index
    %c0_28 = arith.constant 0 : index
    %50 = vector.load %arg10[%c0_27, %c0_28] : memref<20x32xf32, #tpu.memory_space<vmem>>, vector<20x32xf32>
    %cst_29 = arith.constant dense<0.000000e+00> : vector<256x32xf32>
    %51 = tpu.matmul %49, %50, %cst_29 {dimension_numbers = #tpu.dot_dimension_numbers<[1], [0], [0], [1], [0, 0, 1, 1], [], []>} : vector<256x20xf32>, vector<20x32xf32>, vector<256x32xf32> -> vector<256x32xf32>
    %c0_30 = arith.constant 0 : index
    %c0_31 = arith.constant 0 : index
    %52 = vector.load %arg11[%c0_30, %c0_31] : memref<1x32xf32, #tpu.memory_space<vmem>>, vector<1x32xf32>
    %53 = vector.broadcast %52 : vector<1x32xf32> to vector<256x32xf32>
    %54 = arith.mulf %53, %51 : vector<256x32xf32>
    %55 = math.exp %54 : vector<256x32xf32>
    %56 = vector.extract_strided_slice %55 {offsets = [0, 0], sizes = [256, 16], strides = [1, 1]} : vector<256x32xf32> to vector<256x16xf32>
    %57 = vector.extract_strided_slice %55 {offsets = [0, 16], sizes = [256, 16], strides = [1, 1]} : vector<256x32xf32> to vector<256x16xf32>
    %58 = vector.extract_strided_slice %44 {offsets = [0, 12], sizes = [256, 1], strides = [1, 1]} : vector<256x54xf32> to vector<256x1xf32>
    %59 = vector.extract_strided_slice %44 {offsets = [0, 13], sizes = [256, 1], strides = [1, 1]} : vector<256x54xf32> to vector<256x1xf32>
    %60 = vector.broadcast %58 : vector<256x1xf32> to vector<256x16xf32>
    %61 = arith.mulf %60, %57 : vector<256x16xf32>
    %cst_32 = arith.constant 1.000000e+00 : f32
    %62 = vector.broadcast %cst_32 : f32 to vector<256x1xf32>
    %63 = arith.subf %62, %58 : vector<256x1xf32>
    %64 = vector.broadcast %63 : vector<256x1xf32> to vector<256x16xf32>
    %65 = arith.mulf %64, %56 : vector<256x16xf32>
    %66 = arith.addf %61, %65 : vector<256x16xf32>
    %67 = vector.broadcast %59 : vector<256x1xf32> to vector<256x16xf32>
    %68 = arith.mulf %67, %66 : vector<256x16xf32>
    %cst_33 = arith.constant 1.000000e+00 : f32
    %69 = vector.broadcast %cst_33 : f32 to vector<256x16xf32>
    %70 = arith.minimumf %68, %69 : vector<256x16xf32>
    %c0_34 = arith.constant 0 : index
    %c0_35 = arith.constant 0 : index
    %71 = vector.load %arg12[%c0_34, %c0_35] : memref<256x16xf32, #tpu.memory_space<vmem>>, vector<256x16xf32>
    tpu.vector_store %arg12[%c0_34, %c0_35], %70 {strides = array<i32>} : memref<256x16xf32, #tpu.memory_space<vmem>>, vector<256x16xf32>,
    return
  }
  func.func @transform_0(%arg0: i32) -> (i32, i32) {
    %c0_i32 = arith.constant 0 : i32
    %c0_i32_0 = arith.constant 0 : i32
    return %arg0, %c0_i32 : i32, i32
  }
  func.func @transform_1(%arg0: i32) -> (i32, i32) {
    %c0_i32 = arith.constant 0 : i32
    %c0_i32_0 = arith.constant 0 : i32
    %c0_i32_1 = arith.constant 0 : i32
    return %c0_i32, %c0_i32_0 : i32, i32
  }
  func.func @transform_2(%arg0: i32) -> (i32, i32) {
    %c0_i32 = arith.constant 0 : i32
    %c0_i32_0 = arith.constant 0 : i32
    %c0_i32_1 = arith.constant 0 : i32
    return %c0_i32, %c0_i32_0 : i32, i32
  }
  func.func @transform_3(%arg0: i32) -> (i32, i32) {
    %c0_i32 = arith.constant 0 : i32
    %c0_i32_0 = arith.constant 0 : i32
    %c0_i32_1 = arith.constant 0 : i32
    return %c0_i32, %c0_i32_0 : i32, i32
  }
  func.func @transform_4(%arg0: i32) -> (i32, i32) {
    %c0_i32 = arith.constant 0 : i32
    %c0_i32_0 = arith.constant 0 : i32
    %c0_i32_1 = arith.constant 0 : i32
    return %c0_i32, %c0_i32_0 : i32, i32
  }
  func.func @transform_5(%arg0: i32) -> (i32, i32) {
    %c0_i32 = arith.constant 0 : i32
    %c0_i32_0 = arith.constant 0 : i32
    %c0_i32_1 = arith.constant 0 : i32
    return %c0_i32, %c0_i32_0 : i32, i32
  }
  func.func @transform_6(%arg0: i32) -> (i32, i32) {
    %c0_i32 = arith.constant 0 : i32
    %c0_i32_0 = arith.constant 0 : i32
    %c0_i32_1 = arith.constant 0 : i32
    return %c0_i32, %c0_i32_0 : i32, i32
  }
  func.func @transform_7(%arg0: i32) -> (i32, i32) {
    %c0_i32 = arith.constant 0 : i32
    %c0_i32_0 = arith.constant 0 : i32
    %c0_i32_1 = arith.constant 0 : i32
    return %c0_i32, %c0_i32_0 : i32, i32
  }
  func.func @transform_8(%arg0: i32) -> (i32, i32) {
    %c0_i32 = arith.constant 0 : i32
    %c0_i32_0 = arith.constant 0 : i32
    %c0_i32_1 = arith.constant 0 : i32
    return %c0_i32, %c0_i32_0 : i32, i32
  }
  func.func @transform_9(%arg0: i32) -> (i32, i32) {
    %c0_i32 = arith.constant 0 : i32
    %c0_i32_0 = arith.constant 0 : i32
    %c0_i32_1 = arith.constant 0 : i32
    return %c0_i32, %c0_i32_0 : i32, i32
  }
  func.func @transform_10(%arg0: i32) -> (i32, i32) {
    %c0_i32 = arith.constant 0 : i32
    %c0_i32_0 = arith.constant 0 : i32
    %c0_i32_1 = arith.constant 0 : i32
    return %c0_i32, %c0_i32_0 : i32, i32
  }
  func.func @transform_11(%arg0: i32) -> (i32, i32) {
    %c0_i32 = arith.constant 0 : i32
    %c0_i32_0 = arith.constant 0 : i32
    return %arg0, %c0_i32 : i32, i32
  }
  func.func @transform_12(%arg0: i32) -> (i32, i32) {
    %c0_i32 = arith.constant 0 : i32
    %c0_i32_0 = arith.constant 0 : i32
    return %arg0, %c0_i32 : i32, i32
  }
}

</mosaic_0001>

<bundles_post_ra>
// kernel: ivim_dti_net.1
= control target key start
LH: loop header
LB: loop body
LE: loop exit
PB: predicated region body
PF: predicated region fallthrough
CT: control target
= control target key end

     0   :  { %s4785_s21 = smov 0   ;;  %s6682_s0 = inlined_call_operand.vmem [shape: f32[512,16], index: 0, kind: input, shape index: {}]   ;;  %s6683_s1 = inlined_call_operand.vmem [shape: f32[16,64], index: 1, kind: input, shape index: {}]   ;;  %s6684_s2 = inlined_call_operand.vmem [shape: f32[1,64], index: 2, kind: input, shape index: {}]   ;;  %s6685_s3 = inlined_call_operand.vmem [shape: f32[64,64], index: 3, kind: input, shape index: {}]   ;;  %s6686_s4 = inlined_call_operand.vmem [shape: f32[1,64], index: 4, kind: input, shape index: {}]   ;;  %s6687_s5 = inlined_call_operand.vmem [shape: f32[64,54], index: 5, kind: input, shape index: {}]   ;;  %s6688_s6 = inlined_call_operand.vmem [shape: f32[1,54], index: 6, kind: input, shape index: {}]   ;;  %s6689_s7 = inlined_call_operand.vmem [shape: f32[1,54], index: 7, kind: input, shape index: {}]   ;;  %s6690_s8 = inlined_call_operand.vmem [shape: f32[1,54], index: 8, kind: input, shape index: {}]   ;;  %s6691_s9 = inlined_call_operand.vmem [shape: f32[20,32], index: 9, kind: input, shape index: {}]   ;;  %s6692_s10 = inlined_call_operand.vmem [shape: f32[1,32], index: 10, kind: input, shape index: {}]   ;;  %s6693_s11 = inlined_call_operand.vmem [shape: f32[512,16], index: 11, kind: output, shape index: {0}]   ;;  %s6694_s12 = inlined_call_operand.vmem [shape: f32[512,14], index: 12, kind: output, shape index: {1}]  }
   0x1 LB: > { %s3767_s22 = sadd.s32 4294967295, %s4712_s21   ;;  %p3771_p0 = scmp.ge.s32.totalorder %s4712_s21, 1  ;;  %s4712_s21 = sphi %s4785_s21, %s23_s21  }
   0x2   : > { %p366_p1 = scmp.lt.s32.totalorder %s4712_s21, 3 }
   0x4   : > { %p367_p2 = pnand %p3771_p0, %p366_p1 }
   0x6   : > { %370 = sbr.rel (%p367_p2) target bundleno = 1447 (0x5a7), region = 64 }
   0xb   : > { %v464_v0 = vld [vmem:[%s6683_s1 + $0x8] sm:$0xff]  ;;  %v463_v1 = vld [vmem:[%s6683_s1] sm:$0xff]  ;;  %s3772_s27 = sshll.u32 %s3767_s22, 5  ;;  %vm472_vm0 = vcmask 130048   ;;  %v961_v34 = vld [vmem:[%s6685_s3 + $0x38] sm:$0xff]  ;;  %vm969_vm2 = vcmask 523264  }
   0xc   : > { %4128 = vmatprep.subr.mxu0 %v464_v0  ;;  %p414_p3 = scmp.lt.s32.totalorder %s3772_s27, 63  ;;  %4180 = vmatprep.subr.mxu1 %v961_v34  ;;  %v960_v35 = vld [vmem:[%s6685_s3 + $0x30] sm:$0xff]  ;;  %v959_v36 = vld [vmem:[%s6685_s3 + $0x28] sm:$0xff]  ;;  %v958_v37 = vld [vmem:[%s6685_s3 + $0x20] sm:$0xff]  ;;  %s4714_s29 = smov 108  }
   0xd   : > { %4129 = vmatpush3.msra.mxu0 %v464_v0  ;;  %4181 = vmatpush3.msra.mxu1 %v961_v34  ;;  %v957_v38 = vld [vmem:[%s6685_s3 + $0x18] sm:$0xff]  ;;  %v956_v39 = vld [vmem:[%s6685_s3 + $0x10] sm:$0xff]  ;;  %v955_v40 = vld [vmem:[%s6685_s3 + $0x8] sm:$0xff]  ;;  %s4716_s18 = smov 114   ;;  %s4718_s22 = smov 16  }
   0xe   : > { %4130 = vmatprep.subr.mxu0 %v463_v1  ;;  %s6800_s27 = smov (!%p414_p3, %s3772_s27), 63  ;;  %4182 = vmatprep.subr.mxu1 %v960_v35  ;;  %v954_v41 = vld [vmem:[%s6685_s3] sm:$0xff]  ;;  %v1458_v42 = vld [vmem:[%s6687_s5 + $0x38] sm:$0xff]  ;;  %v1457_v43 = vld [vmem:[%s6687_s5 + $0x30] sm:$0xff]  ;;  %s4719_s23 = smov 112  }
   0xf   : > { %4131 = vmatpush3.msra.mxu0 %v463_v1  ;;  %s4799_s28 = sshll.u32 %s6800_s27, 3  ;;  %4183 = vmatpush3.msra.mxu1 %v960_v35  ;;  %v1456_v44 = vld [vmem:[%s6687_s5 + $0x28] sm:$0xff]  ;;  %v1455_v45 = vld [vmem:[%s6687_s5 + $0x20] sm:$0xff]  ;;  %v1454_v46 = vld [vmem:[%s6687_s5 + $0x18] sm:$0xff] }
  0x10   : > { %s4805_s13 = scalar_lea.vmem %s6682_s0, %s4799_s28  ;;  %4184 = vmatprep.subr.mxu1 %v959_v36  ;;  %4244 = vmatprep.subr.mxu0 %v1458_v42  ;;  %v4913_v47 = vld [vmem:[%s6684_s2] ss:$0 sm:$0xff]  ;;  %s5438_s27 = scalar_lea.vmem %s6694_s12, %s4799_s28 }
  0x11   : > { %v431_v2 = vld [vmem:[%s4805_s13] sm:$0xff]  ;;  %v432_v3 = vld [vmem:[%s4805_s13 + $0x8] sm:$0xff]  ;;  %v433_v4 = vld [vmem:[%s4805_s13 + $0x10] sm:$0xff]  ;;  %4185 = vmatpush3.msra.mxu1 %v959_v36  ;;  %s6613_s26 = scalar_lea.vmem %s6693_s11, %s4799_s28 }
  0x12   : > { %4132 = vmatprep.mubr.msk.f32.mxu0 %vm472_vm0, %v431_v2  ;;  %v434_v5 = vld [vmem:[%s4805_s13 + $0x18] sm:$0xff]  ;;  %v435_v6 = vld [vmem:[%s4805_s13 + $0x20] sm:$0xff]  ;;  %v436_v7 = vld [vmem:[%s4805_s13 + $0x28] sm:$0xff]  ;;  %4186 = vmatprep.subr.mxu1 %v958_v37 }
  0x13   : > { %4133 = vmatmul.mubr.msk.f32.vlgmr.msra.gmra.mxu0 %vm472_vm0, %v432_v3  ;;  %v437_v8 = vld [vmem:[%s4805_s13 + $0x30] sm:$0xff]  ;;  %v438_v9 = vld [vmem:[%s4805_s13 + $0x38] sm:$0xff]  ;;  %v439_v10 = vld [vmem:[%s4805_s13 + $0x40] sm:$0xff]  ;;  %4187 = vmatpush3.msra.mxu1 %v958_v37 }
  0x14   : > { %4135 = vmatprep.mubr.msk.f32.mxu0 %vm472_vm0, %v433_v4  ;;  %v440_v11 = vld [vmem:[%s4805_s13 + $0x48] sm:$0xff]  ;;  %v441_v12 = vld [vmem:[%s4805_s13 + $0x50] sm:$0xff]  ;;  %v442_v13 = vld [vmem:[%s4805_s13 + $0x58] sm:$0xff]  ;;  %4188 = vmatprep.subr.mxu1 %v957_v38 }
  0x15   : > { %v443_v14 = vld [vmem:[%s4805_s13 + $0x60] sm:$0xff]  ;;  %v444_v15 = vld [vmem:[%s4805_s13 + $0x68] sm:$0xff]  ;;  %v445_v16 = vld [vmem:[%s4805_s13 + $0x70] sm:$0xff]  ;;  %4189 = vmatpush3.msra.mxu1 %v957_v38  ;;  %4245 = vmatpush3.msra.mxu0 %v1458_v42 }
  0x16   : > { %v446_v17 = vld [vmem:[%s4805_s13 + $0x78] sm:$0xff]  ;;  %v447_v18 = vld [vmem:[%s4805_s13 + $0x80] sm:$0xff]  ;;  %v448_v19 = vld [vmem:[%s4805_s13 + $0x88] sm:$0xff]  ;;  %4190 = vmatprep.subr.mxu1 %v956_v39  ;;  %4246 = vmatprep.subr.mxu0 %v1457_v43 }
  0x17   : > { %4136 = vmatmul.mubr.msk.f32.gmra.mxu0 %vm472_vm0, %v434_v5  ;;  %v449_v20 = vld [vmem:[%s4805_s13 + $0x90] sm:$0xff]  ;;  %v450_v21 = vld [vmem:[%s4805_s13 + $0x98] sm:$0xff]  ;;  %v451_v22 = vld [vmem:[%s4805_s13 + $0xa0] sm:$0xff]  ;;  %4191 = vmatpush3.msra.mxu1 %v956_v39 }
  0x18   : > { %4138 = vmatprep.mubr.msk.f32.mxu0 %vm472_vm0, %v435_v6  ;;  %v452_v23 = vld [vmem:[%s4805_s13 + $0xa8] sm:$0xff]  ;;  %v453_v24 = vld [vmem:[%s4805_s13 + $0xb0] sm:$0xff]  ;;  %v454_v25 = vld [vmem:[%s4805_s13 + $0xb8] sm:$0xff]  ;;  %4192 = vmatprep.subr.mxu1 %v955_v40 }
  0x19   : > { %v455_v26 = vld [vmem:[%s4805_s13 + $0xc0] sm:$0xff]  ;;  %v456_v27 = vld [vmem:[%s4805_s13 + $0xc8] sm:$0xff]  ;;  %v457_v28 = vld [vmem:[%s4805_s13 + $0xd0] sm:$0xff]  ;;  %4193 = vmatpush3.msra.mxu1 %v955_v40  ;;  %4247 = vmatpush3.msra.mxu0 %v1457_v43 }
  0x1a   : > { %v458_v29 = vld [vmem:[%s4805_s13 + $0xd8] sm:$0xff]  ;;  %v459_v30 = vld [vmem:[%s4805_s13 + $0xe0] sm:$0xff]  ;;  %v460_v31 = vld [vmem:[%s4805_s13 + $0xe8] sm:$0xff]  ;;  %4194 = vmatprep.subr.mxu1 %v954_v41  ;;  %4248 = vmatprep.subr.mxu0 %v1456_v44 }
  0x1b   : > { %4139 = vmatmul.mubr.msk.f32.gmra.mxu0 %vm472_vm0, %v436_v7  ;;  %v461_v32 = vld [vmem:[%s4805_s13 + $0xf0] sm:$0xff]  ;;  %v462_v33 = vld [vmem:[%s4805_s13 + $0xf8] sm:$0xff]  ;;  %4195 = vmatpush3.msra.mxu1 %v954_v41 }
  0x1c   : > { %4141 = vmatprep.mubr.msk.f32.mxu0 %vm472_vm0, %v437_v8  ;;  %4249 = vmatpush3.msra.mxu0 %v1456_v44 }
  0x1d   : > { %4250 = vmatprep.subr.mxu0 %v1455_v45 }
  0x1e   : > { %4251 = vmatpush3.msra.mxu0 %v1455_v45 }
  0x1f   : > { %4142 = vmatmul.mubr.msk.f32.gmra.mxu0 %vm472_vm0, %v438_v9  ;;  %4252 = vmatprep.subr.mxu0 %v1454_v46 }
  0x20   : > { %4144 = vmatprep.mubr.msk.f32.mxu0 %vm472_vm0, %v439_v10  ;;  %4253 = vmatpush3.msra.mxu0 %v1454_v46 }
  0x23   : > { %4145 = vmatmul.mubr.msk.f32.gmra.mxu0 %vm472_vm0, %v440_v11 }
  0x24   : > { %4147 = vmatprep.mubr.msk.f32.mxu0 %vm472_vm0, %v441_v12 }
  0x27   : > { %4148 = vmatmul.mubr.msk.f32.gmra.mxu0 %vm472_vm0, %v442_v13 }
  0x28   : > { %4150 = vmatprep.mubr.msk.f32.mxu0 %vm472_vm0, %v443_v14 }
  0x2b   : > { %4151 = vmatmul.mubr.msk.f32.gmra.mxu0 %vm472_vm0, %v444_v15 }
  0x2c   : > { %4153 = vmatprep.mubr.msk.f32.mxu0 %vm472_vm0, %v445_v16 }
  0x2f   : > { %4154 = vmatmul.mubr.msk.f32.gmra.mxu0 %vm472_vm0, %v446_v17 }
  0x30   : > { %4156 = vmatprep.mubr.msk.f32.mxu0 %vm472_vm0, %v447_v18 }
  0x33   : > { %4157 = vmatmul.mubr.msk.f32.gmra.mxu0 %vm472_vm0, %v448_v19 }
  0x34   : > { %4159 = vmatprep.mubr.msk.f32.mxu0 %vm472_vm0, %v449_v20 }
  0x37   : > { %4160 = vmatmul.mubr.msk.f32.gmra.mxu0 %vm472_vm0, %v450_v21 }
  0x38   : > { %4162 = vmatprep.mubr.msk.f32.mxu0 %vm472_vm0, %v451_v22 }
  0x3b   : > { %4163 = vmatmul.mubr.msk.f32.gmra.mxu0 %vm472_vm0, %v452_v23 }
  0x3c   : > { %4165 = vmatprep.mubr.msk.f32.mxu0 %vm472_vm0, %v453_v24 }
  0x3f   : > { %4166 = vmatmul.mubr.msk.f32.gmra.mxu0 %vm472_vm0, %v454_v25 }
  0x40   : > { %4168 = vmatprep.mubr.msk.f32.mxu0 %vm472_vm0, %v455_v26 }
  0x43   : > { %4169 = vmatmul.mubr.msk.f32.gmra.mxu0 %vm472_vm0, %v456_v27 }
  0x44   : > { %4171 = vmatprep.mubr.msk.f32.mxu0 %vm472_vm0, %v457_v28 }
  0x47   : > { %4172 = vmatmul.mubr.msk.f32.gmra.mxu0 %vm472_vm0, %v458_v29 }
  0x48   : > { %4174 = vmatprep.mubr.msk.f32.mxu0 %vm472_vm0, %v459_v30 }
  0x4b   : > { %4175 = vmatmul.mubr.msk.f32.gmra.mxu0 %vm472_vm0, %v460_v31 }
  0x4c   : > { %4177 = vmatprep.mubr.msk.f32.mxu0 %vm472_vm0, %v461_v32 }
  0x4f   : > { %4178 = vmatmul.mubr.msk.f32.gmra.mxu0 %vm472_vm0, %v462_v33 }
  0xd3   : > { %v4134_v48 = vpop.f32.mrf.mxu0 }
  0xd4   : > { %v641_v49 = vadd.f32 %v4134_v48, %v4913_v47 }
  0xd5   : > { %v635_v50 = vpop.f32.mrf.mxu0 }
  0xd6   : > { %v828_v51 = vmul.f32 1.442695, %v641_v49  ;;  %v636_v52 = vadd.f32 %v4913_v47, %v635_v50  ;;  %vm795_vm1 = vcmp.gt.f32.partialorder %v641_v49, 0.0 }
  0xd7   : > { %v4137_v53 = vpop.f32.mrf.mxu0 }
  0xd8   : > { %4386 = vpow2.f32 %v828_v51  ;;  %v826_v54 = vmul.f32 1.442695, %v636_v52  ;;  %v4918_v55 = vadd.f32 %v4137_v53, %v4913_v47  ;;  %vm794_vm3 = vcmp.gt.f32.partialorder %v636_v52, 0.0 }
  0xd9   : > { %v645_v56 = vpop.f32.mrf.mxu0 }
  0xda   : > { %4388 = vpow2.f32 %v826_v54  ;;  %v832_v57 = vmul.f32 1.442695, %v4918_v55  ;;  %v646_v58 = vadd.f32 %v4913_v47, %v645_v56  ;;  %vm797_vm5 = vcmp.gt.f32.partialorder %v4918_v55, 0.0 }
  0xdb   : > { %v4140_v59 = vpop.f32.mrf.mxu0 }
  0xdc   : > { %4390 = vpow2.f32 %v832_v57  ;;  %v830_v60 = vmul.f32 1.442695, %v646_v58  ;;  %v4923_v61 = vadd.f32 %v4140_v59, %v4913_v47  ;;  %vm796_vm4 = vcmp.gt.f32.partialorder %v646_v58, 0.0 }
  0xdd   : > { %v655_v62 = vpop.f32.mrf.mxu0 }
  0xde   : > { %4392 = vpow2.f32 %v830_v60  ;;  %v836_v63 = vmul.f32 1.442695, %v4923_v61  ;;  %v4927_v0 = vadd.f32 %v4913_v47, %v655_v62  ;;  %vm799_vm6 = vcmp.gt.f32.partialorder %v4923_v61, 0.0 }
  0xdf   : > { %v4143_v1 = vpop.f32.mrf.mxu0 }
  0xe0   : > { %4394 = vpow2.f32 %v836_v63  ;;  %v834_v2 = vmul.f32 1.442695, %v4927_v0  ;;  %v4931_v3 = vadd.f32 %v4143_v1, %v4913_v47  ;;  %vm798_vm7 = vcmp.gt.f32.partialorder %v4927_v0, 0.0 }
  0xe1   : > { %v665_v4 = vpop.f32.mrf.mxu0 }
  0xe2   : > { %4396 = vpow2.f32 %v834_v2  ;;  %v840_v5 = vmul.f32 1.442695, %v4931_v3  ;;  %v4935_v6 = vadd.f32 %v4913_v47, %v665_v4  ;;  %vm801_vm9 = vcmp.gt.f32.partialorder %v4931_v3, 0.0 }
  0xe3   : > { %v4146_v7 = vpop.f32.mrf.mxu0 }
  0xe4   : > { %4398 = vpow2.f32 %v840_v5  ;;  %v838_v8 = vmul.f32 1.442695, %v4935_v6  ;;  %v4939_v9 = vadd.f32 %v4146_v7, %v4913_v47  ;;  %vm800_vm8 = vcmp.gt.f32.partialorder %v4935_v6, 0.0 }
  0xe5   : > { %v4387_v10 = vpop.eup %4386  ;;  %v675_v11 = vpop.f32.mrf.mxu0 }
  0xe6   : > { %4400 = vpow2.f32 %v838_v8  ;;  %v844_v12 = vmul.f32 1.442695, %v4939_v9  ;;  %v4943_v13 = vadd.f32 %v4913_v47, %v675_v11  ;;  %v3812_v16 = vadd.f32 -1.0, %v4387_v10 }
  0xe7   : > { %v4389_v14 = vpop.eup %4388  ;;  %v4149_v15 = vpop.f32.mrf.mxu0  ;;  %vm803_vm10 = vcmp.gt.f32.partialorder %v4939_v9, 0.0 }
  0xe8   : > { %4402 = vpow2.f32 %v844_v12  ;;  %v842_v17 = vmul.f32 1.442695, %v4943_v13  ;;  %v4947_v18 = vadd.f32 %v4149_v15, %v4913_v47  ;;  %v3811_v21 = vadd.f32 -1.0, %v4389_v14 }
  0xe9   : > { %v4391_v19 = vpop.eup %4390  ;;  %v685_v20 = vpop.f32.mrf.mxu0  ;;  %v923_v27 = vsel %vm795_vm1, %v641_v49, %v3812_v16  ;;  %vm802_vm11 = vcmp.gt.f32.partialorder %v4943_v13, 0.0 }
  0xea   : > { %4404 = vpow2.f32 %v842_v17  ;;  %v848_v22 = vmul.f32 1.442695, %v4947_v18  ;;  %v4951_v23 = vadd.f32 %v4913_v47, %v685_v20  ;;  %v922_v26 = vsel %vm794_vm3, %v636_v52, %v3811_v21 }
  0xeb   : > { %v4393_v24 = vpop.eup %4392  ;;  %v4152_v25 = vpop.f32.mrf.mxu0  ;;  %4196 = vmatprep.mubr.msk.f32.mxu1 %vm969_vm2, %v922_v26  ;;  %v3814_v30 = vadd.f32 -1.0, %v4391_v19  ;;  %vm805_vm13 = vcmp.gt.f32.partialorder %v4947_v18, 0.0 }
  0xec   : > { %4406 = vpow2.f32 %v848_v22  ;;  %v846_v28 = vmul.f32 1.442695, %v4951_v23  ;;  %v4955_v29 = vadd.f32 %v4152_v25, %v4913_v47  ;;  %4197 = vmatmul.mubr.msk.f32.vlgmr.msra.gmra.mxu1 %vm969_vm2, %v923_v27  ;;  %v3813_v33 = vadd.f32 -1.0, %v4393_v24 }
  0xed   : > { %v4395_v31 = vpop.eup %4394  ;;  %v695_v32 = vpop.f32.mrf.mxu0  ;;  %v925_v42 = vsel %vm797_vm5, %v4918_v55, %v3814_v30  ;;  %vm804_vm12 = vcmp.gt.f32.partialorder %v4951_v23, 0.0 }
  0xee   : > { %4408 = vpow2.f32 %v846_v28  ;;  %v852_v34 = vmul.f32 1.442695, %v4955_v29  ;;  %v4961_v35 = vadd.f32 %v4913_v47, %v695_v32  ;;  %v924_v38 = vsel %vm796_vm4, %v646_v58, %v3813_v33 }
  0xef   : > { %v4397_v36 = vpop.eup %4396  ;;  %v4155_v37 = vpop.f32.mrf.mxu0  ;;  %v3816_v39 = vadd.f32 -1.0, %v4395_v31  ;;  %4199 = vmatprep.mubr.msk.f32.mxu1 %vm969_vm2, %v924_v38  ;;  %vm807_vm14 = vcmp.gt.f32.partialorder %v4955_v29, 0.0 }
  0xf0   : > { %4410 = vpow2.f32 %v852_v34  ;;  %v850_v40 = vmul.f32 1.442695, %v4961_v35  ;;  %v4966_v41 = vadd.f32 %v4155_v37, %v4913_v47  ;;  %4200 = vmatmul.mubr.msk.f32.gmra.mxu1 %vm969_vm2, %v925_v42  ;;  %v3815_v45 = vadd.f32 -1.0, %v4397_v36 }
  0xf1   : > { %v4399_v43 = vpop.eup %4398  ;;  %v705_v44 = vpop.f32.mrf.mxu0  ;;  %v927_v52 = vsel %vm799_vm6, %v4923_v61, %v3816_v39  ;;  %vm806_vm15 = vcmp.gt.f32.partialorder %v4961_v35, 0.0 }
  0xf2   : > { %4412 = vpow2.f32 %v850_v40  ;;  %v856_v46 = vmul.f32 1.442695, %v4966_v41  ;;  %v4975_v48 = vadd.f32 %v4913_v47, %v705_v44  ;;  %v926_v51 = vsel %vm798_vm7, %v4927_v0, %v3815_v45 }
  0xf3   : > { %v4401_v49 = vpop.eup %4400  ;;  %v4158_v50 = vpop.f32.mrf.mxu0  ;;  %4202 = vmatprep.mubr.msk.f32.mxu1 %vm969_vm2, %v926_v51  ;;  %v3818_v55 = vadd.f32 -1.0, %v4399_v43  ;;  %vm809_vm3 = vcmp.gt.f32.partialorder %v4966_v41, 0.0 }
  0xf4   : > { %4414 = vpow2.f32 %v856_v46  ;;  %v854_v53 = vmul.f32 1.442695, %v4975_v48  ;;  %v4981_v54 = vadd.f32 %v4158_v50, %v4913_v47  ;;  %4203 = vmatmul.mubr.msk.f32.gmra.mxu1 %vm969_vm2, %v927_v52  ;;  %v3817_v58 = vadd.f32 -1.0, %v4401_v49 }
  0xf5   : > { %v4403_v56 = vpop.eup %4402  ;;  %v715_v57 = vpop.f32.mrf.mxu0  ;;  %v929_v4 = vsel %vm801_vm9, %v4931_v3, %v3818_v55  ;;  %vm808_vm1 = vcmp.gt.f32.partialorder %v4975_v48, 0.0 }
  0xf6   : > { %4416 = vpow2.f32 %v854_v53  ;;  %v860_v59 = vmul.f32 1.442695, %v4981_v54  ;;  %v4988_v60 = vadd.f32 %v4913_v47, %v715_v57  ;;  %v928_v63 = vsel %vm800_vm8, %v4935_v6, %v3817_v58 }
  0xf7   : > { %v4405_v61 = vpop.eup %4404  ;;  %v4161_v62 = vpop.f32.mrf.mxu0  ;;  %v3820_v0 = vadd.f32 -1.0, %v4403_v56  ;;  %4205 = vmatprep.mubr.msk.f32.mxu1 %vm969_vm2, %v928_v63  ;;  %vm811_vm4 = vcmp.gt.f32.partialorder %v4981_v54, 0.0 }
  0xf8   : > { %4418 = vpow2.f32 %v860_v59  ;;  %v858_v1 = vmul.f32 1.442695, %v4988_v60  ;;  %v4994_v2 = vadd.f32 %v4161_v62, %v4913_v47  ;;  %4206 = vmatmul.mubr.msk.f32.gmra.mxu1 %vm969_vm2, %v929_v4  ;;  %v3819_v8 = vadd.f32 -1.0, %v4405_v61 }
  0xf9   : > { %v4407_v5 = vpop.eup %4406  ;;  %v725_v7 = vpop.f32.mrf.mxu0  ;;  %v931_v3 = vsel %vm803_vm10, %v4939_v9, %v3820_v0  ;;  %vm810_vm5 = vcmp.gt.f32.partialorder %v4988_v60, 0.0 }
  0xfa   : > { %4420 = vpow2.f32 %v858_v1  ;;  %v864_v6 = vmul.f32 1.442695, %v4994_v2  ;;  %v5003_v10 = vadd.f32 %v4913_v47, %v725_v7  ;;  %v930_v14 = vsel %vm802_vm11, %v4943_v13, %v3819_v8 }
  0xfb   : > { %v4409_v11 = vpop.eup %4408  ;;  %v4164_v12 = vpop.f32.mrf.mxu0  ;;  %4208 = vmatprep.mubr.msk.f32.mxu1 %vm969_vm2, %v930_v14  ;;  %v3822_v17 = vadd.f32 -1.0, %v4407_v5  ;;  %vm813_vm7 = vcmp.gt.f32.partialorder %v4994_v2, 0.0 }
  0xfc   : > { %4422 = vpow2.f32 %v864_v6  ;;  %v862_v15 = vmul.f32 1.442695, %v5003_v10  ;;  %v5009_v16 = vadd.f32 %v4164_v12, %v4913_v47  ;;  %4209 = vmatmul.mubr.msk.f32.gmra.mxu1 %vm969_vm2, %v931_v3  ;;  %v3821_v21 = vadd.f32 -1.0, %v4409_v11 }
  0xfd   : > { %v4411_v19 = vpop.eup %4410  ;;  %v735_v20 = vpop.f32.mrf.mxu0  ;;  %v933_v30 = vsel %vm805_vm13, %v4947_v18, %v3822_v17  ;;  %vm812_vm6 = vcmp.gt.f32.partialorder %v5003_v10, 0.0 }
  0xfe   : > { %4424 = vpow2.f32 %v862_v15  ;;  %v868_v13 = vmul.f32 1.442695, %v5009_v16  ;;  %v5016_v9 = vadd.f32 %v4913_v47, %v735_v20  ;;  %v932_v25 = vsel %vm804_vm12, %v4951_v23, %v3821_v21 }
  0xff   : > { %v4413_v22 = vpop.eup %4412  ;;  %v4167_v24 = vpop.f32.mrf.mxu0  ;;  %v3824_v26 = vadd.f32 -1.0, %v4411_v19  ;;  %4211 = vmatprep.mubr.msk.f32.mxu1 %vm969_vm2, %v932_v25  ;;  %vm815_vm8 = vcmp.gt.f32.partialorder %v5009_v16, 0.0 }
 0x100   : > { %4426 = vpow2.f32 %v868_v13  ;;  %v866_v27 = vmul.f32 1.442695, %v5016_v9  ;;  %v5022_v28 = vadd.f32 %v4167_v24, %v4913_v47  ;;  %4212 = vmatmul.mubr.msk.f32.gmra.mxu1 %vm969_vm2, %v933_v30  ;;  %v3823_v33 = vadd.f32 -1.0, %v4413_v22 }
 0x101   : > { %v4415_v31 = vpop.eup %4414  ;;  %v745_v32 = vpop.f32.mrf.mxu0  ;;  %v935_v18 = vsel %vm807_vm14, %v4955_v29, %v3824_v26  ;;  %vm814_vm9 = vcmp.gt.f32.partialorder %v5016_v9, 0.0 }
 0x102   : > { %4428 = vpow2.f32 %v866_v27  ;;  %v872_v23 = vmul.f32 1.442695, %v5022_v28  ;;  %v5031_v34 = vadd.f32 %v4913_v47, %v745_v32  ;;  %v934_v38 = vsel %vm806_vm15, %v4961_v35, %v3823_v33 }
 0x103   : > { %v4417_v36 = vpop.eup %4416  ;;  %v4170_v37 = vpop.f32.mrf.mxu0  ;;  %4214 = vmatprep.mubr.msk.f32.mxu1 %vm969_vm2, %v934_v38  ;;  %v3826_v42 = vadd.f32 -1.0, %v4415_v31  ;;  %vm817_vm11 = vcmp.gt.f32.partialorder %v5022_v28, 0.0 }
 0x104   : > { %4430 = vpow2.f32 %v872_v23  ;;  %v870_v39 = vmul.f32 1.442695, %v5031_v34  ;;  %v5037_v40 = vadd.f32 %v4170_v37, %v4913_v47  ;;  %4215 = vmatmul.mubr.msk.f32.gmra.mxu1 %vm969_vm2, %v935_v18  ;;  %v3825_v45 = vadd.f32 -1.0, %v4417_v36 }
 0x105   : > { %v4419_v43 = vpop.eup %4418  ;;  %v755_v44 = vpop.f32.mrf.mxu0  ;;  %v937_v55 = vsel %vm809_vm3, %v4966_v41, %v3826_v42  ;;  %vm816_vm10 = vcmp.gt.f32.partialorder %v5031_v34, 0.0 }
 0x106   : > { %4432 = vpow2.f32 %v870_v39  ;;  %v876_v35 = vmul.f32 1.442695, %v5037_v40  ;;  %v5044_v29 = vadd.f32 %v4913_v47, %v755_v44  ;;  %v936_v50 = vsel %vm808_vm1, %v4975_v48, %v3825_v45 }
 0x107   : > { %v4421_v46 = vpop.eup %4420  ;;  %v4173_v49 = vpop.f32.mrf.mxu0  ;;  %v3828_v51 = vadd.f32 -1.0, %v4419_v43  ;;  %4217 = vmatprep.mubr.msk.f32.mxu1 %vm969_vm2, %v936_v50  ;;  %vm819_vm13 = vcmp.gt.f32.partialorder %v5037_v40, 0.0 }
 0x108   : > { %4434 = vpow2.f32 %v876_v35  ;;  %v874_v52 = vmul.f32 1.442695, %v5044_v29  ;;  %v5050_v53 = vadd.f32 %v4173_v49, %v4913_v47  ;;  %4218 = vmatmul.mubr.msk.f32.gmra.mxu1 %vm969_vm2, %v937_v55  ;;  %v3827_v58 = vadd.f32 -1.0, %v4421_v46  ;;  %v1451_v55 = vld [vmem:[%s6687_s5] sm:$0xff] }
 0x109   : > { %v4423_v56 = vpop.eup %4422  ;;  %v765_v57 = vpop.f32.mrf.mxu0  ;;  %v939_v41 = vsel %vm811_vm4, %v4981_v54, %v3828_v51  ;;  %vm818_vm12 = vcmp.gt.f32.partialorder %v5044_v29, 0.0 }
 0x10a   : > { %4436 = vpow2.f32 %v874_v52  ;;  %v880_v48 = vmul.f32 1.442695, %v5050_v53  ;;  %v5059_v59 = vadd.f32 %v4913_v47, %v765_v57  ;;  %v938_v63 = vsel %vm810_vm5, %v4988_v60, %v3827_v58  ;;  %v1453_v52 = vld [vmem:[%s6687_s5 + $0x10] sm:$0xff] }
 0x10b   : > { %v4425_v61 = vpop.eup %4424  ;;  %v4176_v62 = vpop.f32.mrf.mxu0  ;;  %4220 = vmatprep.mubr.msk.f32.mxu1 %vm969_vm2, %v938_v63  ;;  %v3830_v4 = vadd.f32 -1.0, %v4423_v56  ;;  %vm821_vm15 = vcmp.gt.f32.partialorder %v5050_v53, 0.0  ;;  %4254 = vmatprep.subr.mxu0 %v1453_v52  ;;  %v5131_v56 = vld [vmem:[%s6686_s4] ss:$0 sm:$0xff] }
 0x10c   : > { %4438 = vpow2.f32 %v880_v48  ;;  %v878_v0 = vmul.f32 1.442695, %v5059_v59  ;;  %v5065_v1 = vadd.f32 %v4176_v62, %v4913_v47  ;;  %4221 = vmatmul.mubr.msk.f32.gmra.mxu1 %vm969_vm2, %v939_v41  ;;  %v3829_v8 = vadd.f32 -1.0, %v4425_v61  ;;  %4255 = vmatpush3.msra.mxu0 %v1453_v52 }
 0x10d   : > { %v4427_v5 = vpop.eup %4426  ;;  %v775_v7 = vpop.f32.mrf.mxu0  ;;  %v941_v17 = vsel %vm813_vm7, %v4994_v2, %v3830_v4  ;;  %vm820_vm14 = vcmp.gt.f32.partialorder %v5059_v59, 0.0 }
 0x10e   : > { %4440 = vpow2.f32 %v878_v0  ;;  %v884_v60 = vmul.f32 1.442695, %v5065_v1  ;;  %v5072_v54 = vadd.f32 %v4913_v47, %v775_v7  ;;  %v940_v12 = vsel %vm812_vm6, %v5003_v10, %v3829_v8 }
 0x10f   : > { %v4429_v6 = vpop.eup %4428  ;;  %v4179_v11 = vpop.f32.mrf.mxu0  ;;  %v3832_v14 = vadd.f32 -1.0, %v4427_v5  ;;  %4223 = vmatprep.mubr.msk.f32.mxu1 %vm969_vm2, %v940_v12  ;;  %vm823_vm3 = vcmp.gt.f32.partialorder %v5065_v1, 0.0 }
 0x110   : > { %4442 = vpow2.f32 %v884_v60  ;;  %v882_v3 = vmul.f32 1.442695, %v5072_v54  ;;  %v5078_v15 = vadd.f32 %v4179_v11, %v4913_v47  ;;  %4224 = vmatmul.mubr.msk.f32.gmra.mxu1 %vm969_vm2, %v941_v17  ;;  %v3831_v21 = vadd.f32 -1.0, %v4429_v6 }
 0x111   : > { %v4431_v19 = vpop.eup %4430  ;;  %v785_v20 = vpop.f32.mrf.mxu0  ;;  %v943_v25 = vsel %vm815_vm8, %v5009_v16, %v3832_v14  ;;  %vm822_vm1 = vcmp.gt.f32.partialorder %v5072_v54, 0.0 }
 0x112   : > { %4444 = vpow2.f32 %v882_v3  ;;  %v888_v10 = vmul.f32 1.442695, %v5078_v15  ;;  %v786_v13 = vadd.f32 %v4913_v47, %v785_v20  ;;  %v942_v24 = vsel %vm814_vm9, %v5016_v9, %v3831_v21 }
 0x113   : > { %v4433_v22 = vpop.eup %4432  ;;  %4226 = vmatprep.mubr.msk.f32.mxu1 %vm969_vm2, %v942_v24  ;;  %v3834_v27 = vadd.f32 -1.0, %v4431_v19  ;;  %vm825_vm5 = vcmp.gt.f32.partialorder %v5078_v15, 0.0 }
 0x114   : > { %4446 = vpow2.f32 %v888_v10  ;;  %v886_v2 = vmul.f32 1.442695, %v786_v13  ;;  %v3833_v26 = vadd.f32 -1.0, %v4433_v22  ;;  %4227 = vmatmul.mubr.msk.f32.gmra.mxu1 %vm969_vm2, %v943_v25  ;;  %vm824_vm4 = vcmp.gt.f32.partialorder %v786_v13, 0.0 }
 0x115   : > { %v4435_v30 = vpop.eup %4434  ;;  %v945_v16 = vsel %vm817_vm11, %v5022_v28, %v3834_v27 }
 0x116   : > { %4448 = vpow2.f32 %v886_v2  ;;  %v944_v31 = vsel %vm816_vm10, %v5031_v34, %v3833_v26  ;;  %v3836_v32 = vadd.f32 -1.0, %v4435_v30 }
 0x117   : > { %v4437_v47 = vpop.eup %4436  ;;  %4229 = vmatprep.mubr.msk.f32.mxu1 %vm969_vm2, %v944_v31 }
 0x118   : > { %v3835_v9 = vadd.f32 -1.0, %v4437_v47  ;;  %4230 = vmatmul.mubr.msk.f32.gmra.mxu1 %vm969_vm2, %v945_v16  ;;  %v947_v34 = vsel %vm819_vm13, %v5037_v40, %v3836_v32 }
 0x119   : > { %v4439_v33 = vpop.eup %4438 }
 0x11a   : > { %v946_v23 = vsel %vm818_vm12, %v5044_v29, %v3835_v9  ;;  %v3838_v38 = vadd.f32 -1.0, %v4439_v33 }
 0x11b   : > { %v4441_v36 = vpop.eup %4440  ;;  %4232 = vmatprep.mubr.msk.f32.mxu1 %vm969_vm2, %v946_v23 }
 0x11c   : > { %v3837_v37 = vadd.f32 -1.0, %v4441_v36  ;;  %4233 = vmatmul.mubr.msk.f32.gmra.mxu1 %vm969_vm2, %v947_v34  ;;  %v949_v42 = vsel %vm821_vm15, %v5050_v53, %v3838_v38  ;;  %v1452_v53 = vld [vmem:[%s6687_s5 + $0x8] sm:$0xff] }
 0x11d   : > { %v4443_v18 = vpop.eup %4442  ;;  %4256 = vmatprep.subr.mxu0 %v1452_v53 }
 0x11e   : > { %v948_v28 = vsel %vm820_vm14, %v5059_v59, %v3837_v37  ;;  %v3840_v44 = vadd.f32 -1.0, %v4443_v18  ;;  %4257 = vmatpush3.msra.mxu0 %v1452_v53 }
 0x11f   : > { %v4445_v39 = vpop.eup %4444  ;;  %4235 = vmatprep.mubr.msk.f32.mxu1 %vm969_vm2, %v948_v28  ;;  %4258 = vmatprep.subr.mxu0 %v1451_v55 }
 0x120   : > { %v3839_v43 = vadd.f32 -1.0, %v4445_v39  ;;  %4236 = vmatmul.mubr.msk.f32.gmra.mxu1 %vm969_vm2, %v949_v42  ;;  %v951_v29 = vsel %vm823_vm3, %v5065_v1, %v3840_v44  ;;  %4259 = vmatpush3.msra.mxu0 %v1451_v55 }
 0x121   : > { %v4447_v45 = vpop.eup %4446 }
 0x122   : > { %v950_v40 = vsel %vm822_vm1, %v5072_v54, %v3839_v43  ;;  %v3842_v49 = vadd.f32 -1.0, %v4447_v45 }
 0x123   : > { %v4449_v35 = vpop.eup %4448  ;;  %4238 = vmatprep.mubr.msk.f32.mxu1 %vm969_vm2, %v950_v40 }
 0x124   : > { %v3841_v46 = vadd.f32 -1.0, %v4449_v35  ;;  %4239 = vmatmul.mubr.msk.f32.gmra.mxu1 %vm969_vm2, %v951_v29  ;;  %v953_v51 = vsel %vm825_vm5, %v5078_v15, %v3842_v49 }
 0x126   : > { %v952_v50 = vsel %vm824_vm4, %v786_v13, %v3841_v46 }
 0x127   : > { %4241 = vmatprep.mubr.msk.f32.mxu1 %vm969_vm2, %v952_v50 }
 0x128   : > { %4242 = vmatmul.mubr.msk.f32.gmra.mxu1 %vm969_vm2, %v953_v51 }
 0x1ac   : > { %v4198_v57 = vpop.f32.mrf.mxu1 }
 0x1ad   : > { %v1138_v58 = vadd.f32 %v4198_v57, %v5131_v56 }
 0x1ae   : > { %v1132_v48 = vpop.f32.mrf.mxu1 }
 0x1af   : > { %v1325_v59 = vmul.f32 1.442695, %v1138_v58  ;;  %v1133_v61 = vadd.f32 %v5131_v56, %v1132_v48  ;;  %vm1292_vm7 = vcmp.gt.f32.partialorder %v1138_v58, 0.0 }
 0x1b0   : > { %v4201_v62 = vpop.f32.mrf.mxu1 }
 0x1b1   : > { %4450 = vpow2.f32 %v1325_v59  ;;  %v1323_v63 = vmul.f32 1.442695, %v1133_v61  ;;  %v5136_v41 = vadd.f32 %v4201_v62, %v5131_v56  ;;  %vm1291_vm6 = vcmp.gt.f32.partialorder %v1133_v61, 0.0 }
 0x1b2   : > { %v1142_v0 = vpop.f32.mrf.mxu1 }
 0x1b3   : > { %4452 = vpow2.f32 %v1323_v63  ;;  %v1329_v1 = vmul.f32 1.442695, %v5136_v41  ;;  %v1143_v4 = vadd.f32 %v5131_v56, %v1142_v0  ;;  %vm1294_vm9 = vcmp.gt.f32.partialorder %v5136_v41, 0.0 }
 0x1b4   : > { %v4204_v5 = vpop.f32.mrf.mxu1 }
 0x1b5   : > { %4454 = vpow2.f32 %v1329_v1  ;;  %v1327_v7 = vmul.f32 1.442695, %v1143_v4  ;;  %v5141_v8 = vadd.f32 %v4204_v5, %v5131_v56  ;;  %vm1293_vm8 = vcmp.gt.f32.partialorder %v1143_v4, 0.0 }
 0x1b6   : > { %v1152_v60 = vpop.f32.mrf.mxu1 }
 0x1b7   : > { %4456 = vpow2.f32 %v1327_v7  ;;  %v1333_v54 = vmul.f32 1.442695, %v5141_v8  ;;  %v5145_v6 = vadd.f32 %v5131_v56, %v1152_v60  ;;  %vm1296_vm10 = vcmp.gt.f32.partialorder %v5141_v8, 0.0 }
 0x1b8   : > { %v4207_v11 = vpop.f32.mrf.mxu1 }
 0x1b9   : > { %4458 = vpow2.f32 %v1333_v54  ;;  %v1331_v12 = vmul.f32 1.442695, %v5145_v6  ;;  %v5149_v14 = vadd.f32 %v4207_v11, %v5131_v56  ;;  %vm1295_vm11 = vcmp.gt.f32.partialorder %v5145_v6, 0.0 }
 0x1ba   : > { %v1162_v3 = vpop.f32.mrf.mxu1 }
 0x1bb   : > { %4460 = vpow2.f32 %v1331_v12  ;;  %v1337_v15 = vmul.f32 1.442695, %v5149_v14  ;;  %v5153_v17 = vadd.f32 %v5131_v56, %v1162_v3  ;;  %vm1298_vm13 = vcmp.gt.f32.partialorder %v5149_v14, 0.0 }
 0x1bc   : > { %v4210_v19 = vpop.f32.mrf.mxu1 }
 0x1bd   : > { %4462 = vpow2.f32 %v1337_v15  ;;  %v1335_v20 = vmul.f32 1.442695, %v5153_v17  ;;  %v5157_v21 = vadd.f32 %v4210_v19, %v5131_v56  ;;  %vm1297_vm12 = vcmp.gt.f32.partialorder %v5153_v17, 0.0 }
 0x1be   : > { %v4451_v10 = vpop.eup %4450  ;;  %v1172_v13 = vpop.f32.mrf.mxu1 }
 0x1bf   : > { %4464 = vpow2.f32 %v1335_v20  ;;  %v1341_v22 = vmul.f32 1.442695, %v5157_v21  ;;  %v3877_v25 = vadd.f32 -1.0, %v4451_v10  ;;  %v5161_v2 = vadd.f32 %v5131_v56, %v1172_v13 }
 0x1c0   : > { %v4453_v24 = vpop.eup %4452  ;;  %v4213_v26 = vpop.f32.mrf.mxu1  ;;  %vm1300_vm14 = vcmp.gt.f32.partialorder %v5157_v21, 0.0 }
 0x1c1   : > { %4466 = vpow2.f32 %v1341_v22  ;;  %v5164_v27 = vadd.f32 %v4213_v26, %v5131_v56  ;;  %v3876_v30 = vadd.f32 -1.0, %v4453_v24  ;;  %v1339_v47 = vmul.f32 1.442695, %v5161_v2 }
 0x1c2   : > { %v4455_v31 = vpop.eup %4454  ;;  %v1182_v16 = vpop.f32.mrf.mxu1  ;;  %v1420_v36 = vsel %vm1292_vm7, %v1138_v58, %v3877_v25  ;;  %vm1299_vm15 = vcmp.gt.f32.partialorder %v5161_v2, 0.0 }
 0x1c3   : > { %v1345_v9 = vmul.f32 1.442695, %v5164_v27  ;;  %v5169_v32 = vadd.f32 %v5131_v56, %v1182_v16  ;;  %v1419_v33 = vsel %vm1291_vm6, %v1133_v61, %v3876_v30  ;;  %4468 = vpow2.f32 %v1339_v47 }
 0x1c4   : > { %v4457_v23 = vpop.eup %4456  ;;  %v4216_v34 = vpop.f32.mrf.mxu1  ;;  %4260 = vmatprep.mubr.msk.f32.mxu0 %vm969_vm2, %v1419_v33  ;;  %v3879_v18 = vadd.f32 -1.0, %v4455_v31  ;;  %vm1302_vm3 = vcmp.gt.f32.partialorder %v5164_v27, 0.0 }
 0x1c5   : > { %4470 = vpow2.f32 %v1345_v9  ;;  %v1343_v37 = vmul.f32 1.442695, %v5169_v32  ;;  %v5174_v38 = vadd.f32 %v4216_v34, %v5131_v56  ;;  %4261 = vmatmul.mubr.msk.f32.vlgmr.msra.gmra.mxu0 %vm969_vm2, %v1420_v36  ;;  %v3878_v42 = vadd.f32 -1.0, %v4457_v23 }
 0x1c6   : > { %v4459_v28 = vpop.eup %4458  ;;  %v1192_v39 = vpop.f32.mrf.mxu1  ;;  %v1422_v50 = vsel %vm1294_vm9, %v5136_v41, %v3879_v18  ;;  %vm1301_vm1 = vcmp.gt.f32.partialorder %v5169_v32, 0.0 }
 0x1c7   : > { %4472 = vpow2.f32 %v1343_v37  ;;  %v1349_v43 = vmul.f32 1.442695, %v5174_v38  ;;  %v5179_v44 = vadd.f32 %v5131_v56, %v1192_v39  ;;  %v1421_v35 = vsel %vm1293_vm8, %v1143_v4, %v3878_v42 }
 0x1c8   : > { %v4461_v45 = vpop.eup %4460  ;;  %v4219_v40 = vpop.f32.mrf.mxu1  ;;  %v3881_v29 = vadd.f32 -1.0, %v4459_v28  ;;  %4263 = vmatprep.mubr.msk.f32.mxu0 %vm969_vm2, %v1421_v35  ;;  %vm1304_vm4 = vcmp.gt.f32.partialorder %v5174_v38, 0.0 }
 0x1c9   : > { %4474 = vpow2.f32 %v1349_v43  ;;  %v1347_v46 = vmul.f32 1.442695, %v5179_v44  ;;  %v5184_v49 = vadd.f32 %v4219_v40, %v5131_v56  ;;  %4264 = vmatmul.mubr.msk.f32.gmra.mxu0 %vm969_vm2, %v1422_v50  ;;  %v3880_v53 = vadd.f32 -1.0, %v4461_v45 }
 0x1ca   : > { %v4463_v51 = vpop.eup %4462  ;;  %v1202_v52 = vpop.f32.mrf.mxu1  ;;  %v1424_v61 = vsel %vm1296_vm10, %v5141_v8, %v3881_v29  ;;  %vm1303_vm5 = vcmp.gt.f32.partialorder %v5179_v44, 0.0 }
 0x1cb   : > { %4476 = vpow2.f32 %v1347_v46  ;;  %v1353_v55 = vmul.f32 1.442695, %v5184_v49  ;;  %v5193_v57 = vadd.f32 %v5131_v56, %v1202_v52  ;;  %v1423_v59 = vsel %vm1295_vm11, %v5145_v6, %v3880_v53 }
 0x1cc   : > { %v4465_v58 = vpop.eup %4464  ;;  %v4222_v48 = vpop.f32.mrf.mxu1  ;;  %4266 = vmatprep.mubr.msk.f32.mxu0 %vm969_vm2, %v1423_v59  ;;  %v3883_v41 = vadd.f32 -1.0, %v4463_v51  ;;  %vm1306_vm7 = vcmp.gt.f32.partialorder %v5184_v49, 0.0 }
 0x1cd   : > { %4478 = vpow2.f32 %v1353_v55  ;;  %v1351_v62 = vmul.f32 1.442695, %v5193_v57  ;;  %v5199_v63 = vadd.f32 %v4222_v48, %v5131_v56  ;;  %4267 = vmatmul.mubr.msk.f32.gmra.mxu0 %vm969_vm2, %v1424_v61  ;;  %v3882_v4 = vadd.f32 -1.0, %v4465_v58 }
 0x1ce   : > { %v4467_v0 = vpop.eup %4466  ;;  %v1212_v1 = vpop.f32.mrf.mxu1  ;;  %v1426_v3 = vsel %vm1298_vm13, %v5149_v14, %v3883_v41  ;;  %vm1305_vm6 = vcmp.gt.f32.partialorder %v5193_v57, 0.0 }
 0x1cf   : > { %4480 = vpow2.f32 %v1351_v62  ;;  %v1357_v5 = vmul.f32 1.442695, %v5199_v63  ;;  %v5206_v7 = vadd.f32 %v5131_v56, %v1212_v1  ;;  %v1425_v60 = vsel %vm1297_vm12, %v5153_v17, %v3882_v4 }
 0x1d0   : > { %v4225_v8 = vpop.f32.mrf.mxu1  ;;  %v3885_v54 = vadd.f32 -1.0, %v4467_v0  ;;  %v4469_v6 = vpop.eup %4468  ;;  %4269 = vmatprep.mubr.msk.f32.mxu0 %vm969_vm2, %v1425_v60  ;;  %vm1308_vm8 = vcmp.gt.f32.partialorder %v5199_v63, 0.0 }
 0x1d1   : > { %4482 = vpow2.f32 %v1357_v5  ;;  %v1355_v11 = vmul.f32 1.442695, %v5206_v7  ;;  %v5212_v12 = vadd.f32 %v4225_v8, %v5131_v56  ;;  %4270 = vmatmul.mubr.msk.f32.gmra.mxu0 %vm969_vm2, %v1426_v3  ;;  %v3884_v20 = vadd.f32 -1.0, %v4469_v6 }
 0x1d2   : > { %v4471_v15 = vpop.eup %4470  ;;  %v1222_v19 = vpop.f32.mrf.mxu1  ;;  %v1428_v14 = vsel %vm1300_vm14, %v5157_v21, %v3885_v54  ;;  %vm1307_vm9 = vcmp.gt.f32.partialorder %v5206_v7, 0.0 }
 0x1d3   : > { %4484 = vpow2.f32 %v1355_v11  ;;  %v1361_v17 = vmul.f32 1.442695, %v5212_v12  ;;  %v5221_v10 = vadd.f32 %v5131_v56, %v1222_v19  ;;  %v1427_v24 = vsel %vm1299_vm15, %v5161_v2, %v3884_v20 }
 0x1d4   : > { %v4473_v13 = vpop.eup %4472  ;;  %v4228_v22 = vpop.f32.mrf.mxu1  ;;  %4272 = vmatprep.mubr.msk.f32.mxu0 %vm969_vm2, %v1427_v24  ;;  %v3887_v30 = vadd.f32 -1.0, %v4471_v15  ;;  %vm1310_vm11 = vcmp.gt.f32.partialorder %v5212_v12, 0.0 }
 0x1d5   : > { %4486 = vpow2.f32 %v1361_v17  ;;  %v1359_v25 = vmul.f32 1.442695, %v5221_v10  ;;  %v5227_v26 = vadd.f32 %v4228_v22, %v5131_v56  ;;  %4273 = vmatmul.mubr.msk.f32.gmra.mxu0 %vm969_vm2, %v1428_v14  ;;  %v3886_v16 = vadd.f32 -1.0, %v4473_v13 }
 0x1d6   : > { %v4475_v31 = vpop.eup %4474  ;;  %v1232_v47 = vpop.f32.mrf.mxu1  ;;  %v1430_v18 = vsel %vm1302_vm3, %v5164_v27, %v3887_v30  ;;  %vm1309_vm10 = vcmp.gt.f32.partialorder %v5221_v10, 0.0 }
 0x1d7   : > { %4488 = vpow2.f32 %v1359_v25  ;;  %v1365_v2 = vmul.f32 1.442695, %v5227_v26  ;;  %v5234_v21 = vadd.f32 %v5131_v56, %v1232_v47  ;;  %v1429_v23 = vsel %vm1301_vm1, %v5169_v32, %v3886_v16 }
 0x1d8   : > { %v4477_v9 = vpop.eup %4476  ;;  %v4231_v33 = vpop.f32.mrf.mxu1  ;;  %v3889_v36 = vadd.f32 -1.0, %v4475_v31  ;;  %4275 = vmatprep.mubr.msk.f32.mxu0 %vm969_vm2, %v1429_v23  ;;  %vm1312_vm12 = vcmp.gt.f32.partialorder %v5227_v26, 0.0 }
 0x1d9   : > { %4490 = vpow2.f32 %v1365_v2  ;;  %v1363_v34 = vmul.f32 1.442695, %v5234_v21  ;;  %v5240_v37 = vadd.f32 %v4231_v33, %v5131_v56  ;;  %4276 = vmatmul.mubr.msk.f32.gmra.mxu0 %vm969_vm2, %v1430_v18  ;;  %v3888_v42 = vadd.f32 -1.0, %v4477_v9 }
 0x1da   : > { %v4479_v28 = vpop.eup %4478  ;;  %v1242_v39 = vpop.f32.mrf.mxu1  ;;  %v1432_v27 = vsel %vm1304_vm4, %v5174_v38, %v3889_v36  ;;  %vm1311_vm13 = vcmp.gt.f32.partialorder %v5234_v21, 0.0 }
 0x1db   : > { %4492 = vpow2.f32 %v1363_v34  ;;  %v1369_v32 = vmul.f32 1.442695, %v5240_v37  ;;  %v5249_v43 = vadd.f32 %v5131_v56, %v1242_v39  ;;  %v1431_v35 = vsel %vm1303_vm5, %v5179_v44, %v3888_v42 }
 0x1dc   : > { %v4481_v45 = vpop.eup %4480  ;;  %v4234_v40 = vpop.f32.mrf.mxu1  ;;  %4278 = vmatprep.mubr.msk.f32.mxu0 %vm969_vm2, %v1431_v35  ;;  %v3891_v50 = vadd.f32 -1.0, %v4479_v28  ;;  %vm1314_vm15 = vcmp.gt.f32.partialorder %v5240_v37, 0.0 }
 0x1dd   : > { %4494 = vpow2.f32 %v1369_v32  ;;  %v1367_v29 = vmul.f32 1.442695, %v5249_v43  ;;  %v5255_v46 = vadd.f32 %v4234_v40, %v5131_v56  ;;  %4279 = vmatmul.mubr.msk.f32.gmra.mxu0 %vm969_vm2, %v1432_v27  ;;  %v3890_v53 = vadd.f32 -1.0, %v4481_v45 }
 0x1de   : > { %v4483_v51 = vpop.eup %4482  ;;  %v1252_v52 = vpop.f32.mrf.mxu1  ;;  %v1434_v41 = vsel %vm1306_vm7, %v5184_v49, %v3891_v50  ;;  %vm1313_vm14 = vcmp.gt.f32.partialorder %v5249_v43, 0.0 }
 0x1df   : > { %4496 = vpow2.f32 %v1367_v29  ;;  %v1373_v44 = vmul.f32 1.442695, %v5255_v46  ;;  %v5262_v38 = vadd.f32 %v5131_v56, %v1252_v52  ;;  %v1433_v48 = vsel %vm1305_vm6, %v5193_v57, %v3890_v53 }
 0x1e0   : > { %v4485_v55 = vpop.eup %4484  ;;  %v4237_v58 = vpop.f32.mrf.mxu1  ;;  %v3893_v59 = vadd.f32 -1.0, %v4483_v51  ;;  %4281 = vmatprep.mubr.msk.f32.mxu0 %vm969_vm2, %v1433_v48  ;;  %vm1316_vm3 = vcmp.gt.f32.partialorder %v5255_v46, 0.0 }
 0x1e1   : > { %4498 = vpow2.f32 %v1373_v44  ;;  %v1371_v61 = vmul.f32 1.442695, %v5262_v38  ;;  %v5268_v62 = vadd.f32 %v4237_v58, %v5131_v56  ;;  %4282 = vmatmul.mubr.msk.f32.gmra.mxu0 %vm969_vm2, %v1434_v41  ;;  %v3892_v4 = vadd.f32 -1.0, %v4485_v55 }
 0x1e2   : > { %v4487_v0 = vpop.eup %4486  ;;  %v1262_v1 = vpop.f32.mrf.mxu1  ;;  %v1436_v49 = vsel %vm1308_vm8, %v5199_v63, %v3893_v59  ;;  %vm1315_vm1 = vcmp.gt.f32.partialorder %v5262_v38, 0.0 }
 0x1e3   : > { %4500 = vpow2.f32 %v1371_v61  ;;  %v1377_v57 = vmul.f32 1.442695, %v5268_v62  ;;  %v5277_v5 = vadd.f32 %v5131_v56, %v1262_v1  ;;  %v1435_v54 = vsel %vm1307_vm9, %v5206_v7, %v3892_v4  ;;  %v5340_v61 = vld [vmem:[%s6688_s6] ss:$0 sm:$0xff] }
 0x1e4   : > { %v4489_v8 = vpop.eup %4488  ;;  %v4240_v60 = vpop.f32.mrf.mxu1  ;;  %4284 = vmatprep.mubr.msk.f32.mxu0 %vm969_vm2, %v1435_v54  ;;  %v3895_v3 = vadd.f32 -1.0, %v4487_v0  ;;  %vm1318_vm5 = vcmp.gt.f32.partialorder %v5268_v62, 0.0 }
 0x1e5   : > { %4502 = vpow2.f32 %v1377_v57  ;;  %v1375_v6 = vmul.f32 1.442695, %v5277_v5  ;;  %v5283_v11 = vadd.f32 %v4240_v60, %v5131_v56  ;;  %4285 = vmatmul.mubr.msk.f32.gmra.mxu0 %vm969_vm2, %v1436_v49  ;;  %v3894_v20 = vadd.f32 -1.0, %v4489_v8 }
 0x1e6   : > { %v4491_v15 = vpop.eup %4490  ;;  %v1272_v19 = vpop.f32.mrf.mxu1  ;;  %v1438_v30 = vsel %vm1310_vm11, %v5212_v12, %v3895_v3  ;;  %vm1317_vm4 = vcmp.gt.f32.partialorder %v5277_v5, 0.0  ;;  %vm2449_vm11 = vcmask 1043456  }
 0x1e7   : > { %4504 = vpow2.f32 %v1375_v6  ;;  %v1381_v7 = vmul.f32 1.442695, %v5283_v11  ;;  %v5290_v63 = vadd.f32 %v5131_v56, %v1272_v19  ;;  %v1437_v22 = vsel %vm1309_vm10, %v5221_v10, %v3894_v20 }
 0x1e8   : > { %v4493_v17 = vpop.eup %4492  ;;  %v4243_v13 = vpop.f32.mrf.mxu1  ;;  %v3897_v24 = vadd.f32 -1.0, %v4491_v15  ;;  %4287 = vmatprep.mubr.msk.f32.mxu0 %vm969_vm2, %v1437_v22  ;;  %vm1320_vm7 = vcmp.gt.f32.partialorder %v5283_v11, 0.0  ;;  %vm2092_vm10 = vcmask 113664  }
 0x1e9   : > { %4506 = vpow2.f32 %v1381_v7  ;;  %v1379_v14 = vmul.f32 1.442695, %v5290_v63  ;;  %v5296_v25 = vadd.f32 %v4243_v13, %v5131_v56  ;;  %4288 = vmatmul.mubr.msk.f32.gmra.mxu0 %vm969_vm2, %v1438_v30  ;;  %v3896_v16 = vadd.f32 -1.0, %v4493_v17 }
 0x1ea   : > { %v4495_v31 = vpop.eup %4494  ;;  %v1282_v47 = vpop.f32.mrf.mxu1  ;;  %v1440_v23 = vsel %vm1312_vm12, %v5227_v26, %v3897_v24  ;;  %vm1319_vm6 = vcmp.gt.f32.partialorder %v5290_v63, 0.0  ;;  %vm2384_vm12 = vcmask 162816  }
 0x1eb   : > { %4508 = vpow2.f32 %v1379_v14  ;;  %v1385_v10 = vmul.f32 1.442695, %v5296_v25  ;;  %v1283_v2 = vadd.f32 %v5131_v56, %v1282_v47  ;;  %v1439_v33 = vsel %vm1311_vm13, %v5234_v21, %v3896_v16 }
 0x1ec   : > { %v4497_v9 = vpop.eup %4496  ;;  %4290 = vmatprep.mubr.msk.f32.mxu0 %vm969_vm2, %v1439_v33  ;;  %v3899_v34 = vadd.f32 -1.0, %v4495_v31  ;;  %vm1322_vm9 = vcmp.gt.f32.partialorder %v5296_v25, 0.0 }
 0x1ed   : > { %4510 = vpow2.f32 %v1385_v10  ;;  %v1383_v12 = vmul.f32 1.442695, %v1283_v2  ;;  %v3898_v36 = vadd.f32 -1.0, %v4497_v9  ;;  %4291 = vmatmul.mubr.msk.f32.gmra.mxu0 %vm969_vm2, %v1440_v23  ;;  %vm1321_vm8 = vcmp.gt.f32.partialorder %v1283_v2, 0.0 }
 0x1ee   : > { %v4499_v18 = vpop.eup %4498  ;;  %v1442_v26 = vsel %vm1314_vm15, %v5240_v37, %v3899_v34 }
 0x1ef   : > { %4512 = vpow2.f32 %v1383_v12  ;;  %v1441_v28 = vsel %vm1313_vm14, %v5249_v43, %v3898_v36  ;;  %v3901_v39 = vadd.f32 -1.0, %v4499_v18 }
 0x1f0   : > { %v4501_v56 = vpop.eup %4500  ;;  %4293 = vmatprep.mubr.msk.f32.mxu0 %vm969_vm2, %v1441_v28 }
 0x1f1   : > { %v3900_v21 = vadd.f32 -1.0, %v4501_v56  ;;  %4294 = vmatmul.mubr.msk.f32.gmra.mxu0 %vm969_vm2, %v1442_v26  ;;  %v1444_v43 = vsel %vm1316_vm3, %v5255_v46, %v3901_v39 }
 0x1f2   : > { %v4503_v42 = vpop.eup %4502 }
 0x1f3   : > { %v1443_v32 = vsel %vm1315_vm1, %v5262_v38, %v3900_v21  ;;  %v3903_v35 = vadd.f32 -1.0, %v4503_v42  ;;  %v2025_v21 = vlaneseq }
 0x1f4   : > { %v4505_v45 = vpop.eup %4504  ;;  %4296 = vmatprep.mubr.msk.f32.mxu0 %vm969_vm2, %v1443_v32 }
 0x1f5   : > { %v3902_v40 = vadd.f32 -1.0, %v4505_v45  ;;  %4297 = vmatmul.mubr.msk.f32.gmra.mxu0 %vm969_vm2, %v1444_v43  ;;  %v1446_v50 = vsel %vm1318_vm5, %v5268_v62, %v3903_v35 }
 0x1f6   : > { %v4507_v27 = vpop.eup %4506 }
 0x1f7   : > { %v1445_v37 = vsel %vm1317_vm4, %v5277_v5, %v3902_v40  ;;  %v3905_v52 = vadd.f32 -1.0, %v4507_v27 }
 0x1f8   : > { %v4509_v29 = vpop.eup %4508  ;;  %4299 = vmatprep.mubr.msk.f32.mxu0 %vm969_vm2, %v1445_v37 }
 0x1f9   : > { %v3904_v51 = vadd.f32 -1.0, %v4509_v29  ;;  %4300 = vmatmul.mubr.msk.f32.gmra.mxu0 %vm969_vm2, %v1446_v50  ;;  %v1448_v38 = vsel %vm1320_vm7, %v5283_v11, %v3905_v52  ;;  %v5389_v50 = vand.u32 127, %v2025_v21 }
 0x1fa   : > { %v4511_v53 = vpop.eup %4510 }
 0x1fb   : > { %v1447_v46 = vsel %vm1319_vm6, %v5290_v63, %v3904_v51  ;;  %v3907_v58 = vadd.f32 -1.0, %v4511_v53 }
 0x1fc   : > { %v4513_v44 = vpop.eup %4512  ;;  %4302 = vmatprep.mubr.msk.f32.mxu0 %vm969_vm2, %v1447_v46 }
 0x1fd   : > { %v3906_v55 = vadd.f32 -1.0, %v4513_v44  ;;  %4303 = vmatmul.mubr.msk.f32.gmra.mxu0 %vm969_vm2, %v1448_v38  ;;  %v1450_v59 = vsel %vm1322_vm9, %v5296_v25, %v3907_v58 }
 0x1ff   : > { %v1449_v48 = vsel %vm1321_vm8, %v1283_v2, %v3906_v55 }
 0x200   : > { %4305 = vmatprep.mubr.msk.f32.mxu0 %vm969_vm2, %v1449_v48 }
 0x201   : > { %4306 = vmatmul.mubr.msk.f32.gmra.mxu0 %vm969_vm2, %v1450_v59  ;;  %vm2027_vm2 = vcmp.eq.s32.totalorder %v5389_v50, 12  ;;  %v2285_v50 = vld [vmem:[%s6691_s9] sm:$0xff] }
 0x285   : > { %v4262_v62 = vpop.f32.mrf.mxu0 }
 0x286   : > { %v5343_v41 = vadd.f32 %v4262_v62, %v5340_v61 }
 0x287   : > { %v1628_v0 = vpop.f32.mrf.mxu0 }
 0x288   : > { %v1788_v1 = vsub.f32 0.0, %v5343_v41  ;;  %v5347_v4 = vadd.f32 %v5340_v61, %v1628_v0 }
 0x289   : > { %v4265_v8 = vpop.f32.mrf.mxu0 }
 0x28a   : > { %v1821_v57 = vmul.f32 1.442695, %v1788_v1  ;;  %v1787_v5 = vsub.f32 0.0, %v5347_v4  ;;  %v5351_v60 = vadd.f32 %v4265_v8, %v5340_v61 }
 0x28b   : > { %v1638_v49 = vpop.f32.mrf.mxu0 }
 0x28c   : > { %4514 = vpow2.f32 %v1821_v57  ;;  %v1819_v54 = vmul.f32 1.442695, %v1787_v5  ;;  %v1790_v6 = vsub.f32 0.0, %v5351_v60  ;;  %v5355_v11 = vadd.f32 %v5340_v61, %v1638_v49 }
 0x28d   : > { %v4268_v3 = vpop.f32.mrf.mxu0 }
 0x28e   : > { %4516 = vpow2.f32 %v1819_v54  ;;  %v1825_v15 = vmul.f32 1.442695, %v1790_v6  ;;  %v1789_v19 = vsub.f32 0.0, %v5355_v11  ;;  %v5359_v20 = vadd.f32 %v4268_v3, %v5340_v61 }
 0x28f   : > { %v1648_v7 = vpop.f32.mrf.mxu0  ;;  %v2029_v6 = vand.u32 2147483647, %v5343_v41  ;;  %v2031_v41 = vand.u32 2147483647, %v5351_v60 }
 0x290   : > { %4518 = vpow2.f32 %v1825_v15  ;;  %v1823_v63 = vmul.f32 1.442695, %v1789_v19  ;;  %v1792_v17 = vsub.f32 0.0, %v5359_v20  ;;  %v5363_v13 = vadd.f32 %v5340_v61, %v1648_v7 }
 0x291   : > { %v4271_v22 = vpop.f32.mrf.mxu0  ;;  %v2028_v7 = vand.u32 2147483647, %v5347_v4 }
 0x292   : > { %4520 = vpow2.f32 %v1823_v63  ;;  %v1829_v24 = vmul.f32 1.442695, %v1792_v17  ;;  %v5366_v14 = vadd.f32 %v4271_v22, %v5340_v61  ;;  %v1791_v25 = vsub.f32 0.0, %v5363_v13 }
 0x293   : > { %v1658_v30 = vpop.f32.mrf.mxu0 }
 0x294   : > { %4522 = vpow2.f32 %v1829_v24  ;;  %v1794_v31 = vsub.f32 0.0, %v5366_v14  ;;  %v5371_v47 = vadd.f32 %v5340_v61, %v1658_v30  ;;  %v1827_v16 = vmul.f32 1.442695, %v1791_v25  ;;  %v5413_v24 = vld [vmem:[%s6690_s8] ss:$0 sm:$0xff] }
 0x295   : > { %v4274_v10 = vpop.f32.mrf.mxu0 }
 0x296   : > { %v1833_v2 = vmul.f32 1.442695, %v1794_v31  ;;  %v1793_v9 = vsub.f32 0.0, %v5371_v47  ;;  %v5375_v33 = vadd.f32 %v4274_v10, %v5340_v61  ;;  %4524 = vpow2.f32 %v1827_v16 }
 0x297   : > { %v1668_v23 = vpop.f32.mrf.mxu0  ;;  %v2030_v16 = vand.u32 2147483647, %v5355_v11 }
 0x298   : > { %4526 = vpow2.f32 %v1833_v2  ;;  %v1831_v36 = vmul.f32 1.442695, %v1793_v9  ;;  %v1796_v34 = vsub.f32 0.0, %v5375_v33  ;;  %v5379_v28 = vadd.f32 %v5340_v61, %v1668_v23  ;;  %v5424_v23 = vld [vmem:[%s6689_s7] ss:$0 sm:$0xff] }
 0x299   : > { %v4515_v12 = vpop.eup %4514  ;;  %v4277_v56 = vpop.f32.mrf.mxu0 }
 0x29a   : > { %v1884_v18 = vadd.f32 1.0, %v4515_v12  ;;  %4528 = vpow2.f32 %v1831_v36  ;;  %v1837_v39 = vmul.f32 1.442695, %v1796_v34  ;;  %v5382_v42 = vadd.f32 %v4277_v56, %v5340_v61 }
 0x29b   : > { %v4517_v26 = vpop.eup %4516  ;;  %v1795_v45 = vsub.f32 0.0, %v5379_v28  ;;  %v1678_v43 = vpop.f32.mrf.mxu0 }
 0x29c   : > { %4530 = vrcp.f32 %v1884_v18  ;;  %v1883_v32 = vadd.f32 1.0, %v4517_v26  ;;  %v1798_v40 = vsub.f32 0.0, %v5382_v42  ;;  %v5387_v35 = vadd.f32 %v5340_v61, %v1678_v43 }
 0x29d   : > { %4532 = vpow2.f32 %v1837_v39  ;;  %v4519_v27 = vpop.eup %4518  ;;  %v1835_v37 = vmul.f32 1.442695, %v1795_v45  ;;  %v4280_v29 = vpop.f32.mrf.mxu0  ;;  %v2033_v26 = vand.u32 2147483647, %v5359_v20  ;;  %v2032_v45 = vand.u32 2147483647, %v5363_v13 }
 0x29e   : > { %4534 = vrcp.f32 %v1883_v32  ;;  %v1886_v51 = vadd.f32 1.0, %v4519_v27  ;;  %v1841_v52 = vmul.f32 1.442695, %v1798_v40  ;;  %v1797_v53 = vsub.f32 0.0, %v5387_v35 }
 0x29f   : > { %v4521_v46 = vpop.eup %4520  ;;  %4536 = vpow2.f32 %v1835_v37  ;;  %v5393_v44 = vadd.f32 %v4280_v29, %v5340_v61  ;;  %v1688_v38 = vpop.f32.mrf.mxu0 }
 0x2a0   : > { %4538 = vrcp.f32 %v1886_v51  ;;  %v1885_v55 = vadd.f32 1.0, %v4521_v46  ;;  %v1839_v58 = vmul.f32 1.442695, %v1797_v53  ;;  %v5396_v48 = vadd.f32 %v5340_v61, %v1688_v38 }
 0x2a1   : > { %v4523_v59 = vpop.eup %4522  ;;  %4540 = vpow2.f32 %v1841_v52  ;;  %v1800_v62 = vsub.f32 0.0, %v5393_v44  ;;  %v4283_v0 = vpop.f32.mrf.mxu0 }
 0x2a2   : > { %4542 = vrcp.f32 %v1885_v55  ;;  %v1888_v1 = vadd.f32 1.0, %v4523_v59  ;;  %v1799_v57 = vsub.f32 0.0, %v5396_v48  ;;  %v5402_v8 = vadd.f32 %v4283_v0, %v5340_v61 }
 0x2a3   : > { %4544 = vpow2.f32 %v1839_v58  ;;  %v1845_v5 = vmul.f32 1.442695, %v1800_v62  ;;  %v1698_v54 = vpop.f32.mrf.mxu0  ;;  %v4525_v49 = vpop.eup %4524 }
 0x2a4   : > { %4546 = vrcp.f32 %v1888_v1  ;;  %v1843_v3 = vmul.f32 1.442695, %v1799_v57  ;;  %v5406_v15 = vadd.f32 %v5340_v61, %v1698_v54  ;;  %v1887_v63 = vadd.f32 1.0, %v4525_v49 }
 0x2a5   : > { %v4527_v19 = vpop.eup %4526  ;;  %4548 = vpow2.f32 %v1845_v5  ;;  %v1802_v17 = vsub.f32 0.0, %v5402_v8  ;;  %v4286_v22 = vpop.f32.mrf.mxu0  ;;  %v2035_v5 = vand.u32 2147483647, %v5366_v14 }
 0x2a6   : > { %v1890_v25 = vadd.f32 1.0, %v4527_v19  ;;  %4550 = vpow2.f32 %v1843_v3  ;;  %v1801_v30 = vsub.f32 0.0, %v5406_v15  ;;  %v5419_v10 = vadd.f32 %v4286_v22, %v5340_v61 }
 0x2a7   : > { %v4529_v31 = vpop.eup %4528  ;;  %4552 = vrcp.f32 %v1887_v63  ;;  %v1849_v4 = vmul.f32 1.442695, %v1802_v17  ;;  %v1708_v2 = vpop.f32.mrf.mxu0 }
 0x2a8   : > { %4554 = vrcp.f32 %v1890_v25  ;;  %v1889_v12 = vadd.f32 1.0, %v4529_v31  ;;  %v1847_v36 = vmul.f32 1.442695, %v1801_v30  ;;  %v5427_v34 = vadd.f32 %v5340_v61, %v1708_v2 }
 0x2a9   : > { %v4531_v9 = vpop.eup %4530  ;;  %4556 = vpow2.f32 %v1849_v4  ;;  %v1804_v21 = vsub.f32 0.0, %v5419_v10  ;;  %v4289_v39 = vpop.f32.mrf.mxu0  ;;  %v2034_v30 = vand.u32 2147483647, %v5371_v47 }
 0x2aa   : > { %v4533_v18 = vpop.eup %4532  ;;  %v1956_v56 = vmul.f32 %v4531_v9, %v5413_v24  ;;  %4558 = vrcp.f32 %v1889_v12  ;;  %v1803_v40 = vsub.f32 0.0, %v5427_v34  ;;  %v5443_v46 = vadd.f32 %v4289_v39, %v5340_v61 }
 0x2ab   : > { %v4535_v32 = vpop.eup %4534  ;;  %v1892_v43 = vadd.f32 1.0, %v4533_v18  ;;  %4560 = vpow2.f32 %v1847_v36  ;;  %v1853_v29 = vmul.f32 1.442695, %v1804_v21  ;;  %v1718_v51 = vpop.f32.mrf.mxu0 }
 0x2ac   : > { %v1994_v27 = vadd.f32 %v5424_v23, %v1956_v56  ;;  %v1955_v37 = vmul.f32 %v4535_v32, %v5413_v24  ;;  %v4537_v52 = vpop.eup %4536  ;;  %v1851_v53 = vmul.f32 1.442695, %v1803_v40  ;;  %v5446_v38 = vadd.f32 %v5340_v61, %v1718_v51 }
 0x2ad   : > { %4562 = vrcp.f32 %v1892_v43  ;;  %v4539_v55 = vpop.eup %4538  ;;  %v1891_v62 = vadd.f32 1.0, %v4537_v52  ;;  %v4292_v0 = vpop.f32.mrf.mxu0  ;;  %v1806_v54 = vsub.f32 0.0, %v5443_v46  ;;  %v2037_v32 = vand.u32 2147483647, %v5375_v33 }
 0x2ae   : > { %v5450_v58 = vsel %vm2027_vm2, %v2029_v6, %v1994_v27  ;;  %v1993_v59 = vadd.f32 %v5424_v23, %v1955_v37  ;;  %4564 = vpow2.f32 %v1853_v29  ;;  %v4541_v1 = vpop.eup %4540  ;;  %v1958_v57 = vmul.f32 %v4539_v55, %v5413_v24 }
 0x2af   : > { %2094 = vst.msk [vmem:[%s5438_s27 + $0x8] sm:$0xff] %vm2092_vm10, %v5450_v58  ;;  %4566 = vpow2.f32 %v1851_v53  ;;  %2159 = vrot.lane.b32.xlu0 %v5450_v58, %s4714_s29  ;;  %v4543_v49 = vpop.eup %4542  ;;  %v1894_v3 = vadd.f32 1.0, %v4541_v1  ;;  %v1805_v19 = vsub.f32 0.0, %v5446_v38  ;;  %v1728_v63 = vpop.f32.mrf.mxu0  ;;  %v1857_v31 = vmul.f32 1.442695, %v1806_v54 }
 0x2b0   : > { %v5463_v6 = vsel %vm2027_vm2, %v2028_v7, %v1993_v59  ;;  %4568 = vrcp.f32 %v1891_v62  ;;  %v4545_v17 = vpop.eup %4544  ;;  %v1996_v22 = vadd.f32 %v5424_v23, %v1958_v57  ;;  %v1957_v25 = vmul.f32 %v4543_v49, %v5413_v24 }
 0x2b1   : > { %2093 = vst.msk [vmem:[%s5438_s27] sm:$0xff] %vm2092_vm10, %v5463_v6  ;;  %v4547_v4 = vpop.eup %4546  ;;  %4570 = vrcp.f32 %v1894_v3  ;;  %v1893_v7 = vadd.f32 1.0, %v4545_v17  ;;  %v1855_v2 = vmul.f32 1.442695, %v1805_v19  ;;  %v5473_v9 = vadd.f32 %v4292_v0, %v5340_v61  ;;  %v4295_v12 = vpop.f32.mrf.mxu0 }
 0x2b2   : > { %v4549_v36 = vpop.eup %4548  ;;  %v5479_v18 = vsel %vm2027_vm2, %v2031_v41, %v1996_v22  ;;  %v1995_v56 = vadd.f32 %v5424_v23, %v1957_v25  ;;  %v1960_v21 = vmul.f32 %v4547_v4, %v5413_v24  ;;  %4572 = vpow2.f32 %v1857_v31 }
 0x2b3   : > { %2157 = vrot.lane.b32.xlu0 %v5463_v6, %s4714_s29  ;;  %v4551_v39 = vpop.eup %4550  ;;  %2096 = vst.msk [vmem:[%s5438_s27 + $0x18] sm:$0xff] %vm2092_vm10, %v5479_v18  ;;  %4574 = vrcp.f32 %v1893_v7  ;;  %v1896_v60 = vadd.f32 1.0, %v4549_v36  ;;  %v1808_v41 = vsub.f32 0.0, %v5473_v9  ;;  %2163 = vrot.lane.b32.xlu1 %v5479_v18, %s4714_s29  ;;  %v1738_v43 = vpop.f32.mrf.mxu0  ;;  %v5504_v55 = vadd.f32 %v5340_v61, %v1728_v63 }
 0x2b4   : > { %v4553_v40 = vpop.eup %4552  ;;  %v5496_v27 = vsel %vm2027_vm2, %v2030_v16, %v1995_v56  ;;  %v1998_v37 = vadd.f32 %v5424_v23, %v1960_v21  ;;  %v1895_v29 = vadd.f32 1.0, %v4551_v39  ;;  %4576 = vpow2.f32 %v1855_v2 }
 0x2b5   : > { %v4555_v51 = vpop.eup %4554  ;;  %2095 = vst.msk [vmem:[%s5438_s27 + $0x10] sm:$0xff] %vm2092_vm10, %v5496_v27  ;;  %v1959_v52 = vmul.f32 %v4553_v40, %v5413_v24  ;;  %4578 = vrcp.f32 %v1896_v60  ;;  %v1861_v53 = vmul.f32 1.442695, %v1808_v41  ;;  %v4298_v11 = vpop.f32.mrf.mxu0  ;;  %v5514_v0 = vadd.f32 %v4295_v12, %v5340_v61 }
 0x2b6   : > { %v4557_v59 = vpop.eup %4556  ;;  %v5510_v16 = vsel %vm2027_vm2, %v2033_v26, %v1998_v37  ;;  %v1962_v62 = vmul.f32 %v4555_v51, %v5413_v24  ;;  %4580 = vrcp.f32 %v1895_v29  ;;  %v1807_v20 = vsub.f32 0.0, %v5504_v55 }
 0x2b7   : > { %v4559_v1 = vpop.eup %4558  ;;  %2098 = vst.msk [vmem:[%s5438_s27 + $0x28] sm:$0xff] %vm2092_vm10, %v5510_v16  ;;  %v1997_v57 = vadd.f32 %v5424_v23, %v1959_v52  ;;  %v1898_v54 = vadd.f32 1.0, %v4557_v59  ;;  %4582 = vpow2.f32 %v1861_v53  ;;  %v1748_v49 = vpop.f32.mrf.mxu0  ;;  %2161 = vrot.lane.b32.xlu1 %v5496_v27, %s4714_s29  ;;  %v2036_v63 = vand.u32 2147483647, %v5379_v28 }
 0x2b8   : > { %v4561_v26 = vpop.eup %4560  ;;  %v2000_v3 = vadd.f32 %v5424_v23, %v1962_v62  ;;  %v1961_v19 = vmul.f32 %v4559_v1, %v5413_v24  ;;  %v1810_v17 = vsub.f32 0.0, %v5514_v0  ;;  %v1859_v4 = vmul.f32 1.442695, %v1807_v20 }
 0x2b9   : > { %v5531_v25 = vsel %vm2027_vm2, %v2032_v45, %v1997_v57  ;;  %4584 = vrcp.f32 %v1898_v54  ;;  %v1897_v31 = vadd.f32 1.0, %v4561_v26  ;;  %v5533_v7 = vpop.f32.mrf.mxu0  ;;  %v2039_v12 = vand.u32 2147483647, %v5382_v42 }
 0x2ba   : > { %v4563_v22 = vpop.eup %4562  ;;  %2097 = vst.msk [vmem:[%s5438_s27 + $0x20] sm:$0xff] %vm2092_vm10, %v5531_v25  ;;  %v5542_v28 = vsel %vm2027_vm2, %v2035_v5, %v2000_v3  ;;  %v1999_v13 = vadd.f32 %v5424_v23, %v1961_v19  ;;  %2165 = vrot.lane.b32.xlu0 %v5531_v25, %s4714_s29  ;;  %v1865_v56 = vmul.f32 1.442695, %v1810_v17  ;;  %v5553_v5 = vadd.f32 %v5340_v61, %v1738_v43 }
 0x2bb   : > { %v4565_v2 = vpop.eup %4564  ;;  %v1964_v45 = vmul.f32 %v4563_v22, %v5413_v24  ;;  %2100 = vst.msk [vmem:[%s5438_s27 + $0x38] sm:$0xff] %vm2092_vm10, %v5542_v28  ;;  %4586 = vrcp.f32 %v1897_v31  ;;  %2167 = vrot.lane.b32.xlu1 %v5510_v16, %s4714_s29  ;;  %v1758_v41 = vpop.f32.mrf.mxu0  ;;  %v2038_v40 = vand.u32 2147483647, %v5387_v35  ;;  %v5577_v29 = vadd.f32 %v4298_v11, %v5340_v61 }
 0x2bc   : > { %v4567_v36 = vpop.eup %4566  ;;  %v1900_v14 = vadd.f32 1.0, %v4565_v2  ;;  %v5561_v42 = vsel %vm2027_vm2, %v2034_v30, %v1999_v13  ;;  %4588 = vpow2.f32 %v1859_v4  ;;  %v1809_v47 = vsub.f32 0.0, %v5553_v5 }
 0x2bd   : > { %v4569_v21 = vpop.eup %4568  ;;  %v2002_v39 = vadd.f32 %v5424_v23, %v1964_v45  ;;  %v1899_v60 = vadd.f32 1.0, %v4567_v36  ;;  %2099 = vst.msk [vmem:[%s5438_s27 + $0x30] sm:$0xff] %vm2092_vm10, %v5561_v42  ;;  %v5580_v51 = vadd.f32 %v5340_v61, %v1748_v49  ;;  %v2041_v11 = vand.u32 2147483647, %v5393_v44  ;;  %v4304_v57 = vpop.f32.mrf.mxu0 }
 0x2be   : > { %v1963_v43 = vmul.f32 %v4569_v21, %v5413_v24  ;;  %4590 = vrcp.f32 %v1900_v14  ;;  %v4571_v37 = vpop.eup %4570  ;;  %2169 = vrot.lane.b32.xlu0 %v5561_v42, %s4714_s29  ;;  %v1812_v62 = vsub.f32 0.0, %v5577_v29  ;;  %v2040_v2 = vand.u32 2147483647, %v5396_v48 }
 0x2bf   : > { %v5574_v30 = vsel %vm2027_vm2, %v2037_v32, %v2002_v39  ;;  %4592 = vrcp.f32 %v1899_v60  ;;  %v4573_v35 = vpop.eup %4572  ;;  %v1966_v52 = vmul.f32 %v4571_v37, %v5413_v24  ;;  %v1863_v32 = vmul.f32 1.442695, %v1809_v47  ;;  %2171 = vrot.lane.b32.xlu1 %v5542_v28, %s4714_s29  ;;  %v1768_v14 = vpop.f32.mrf.mxu0 }
 0x2c0   : > { %2102 = vst.msk [vmem:[%s5438_s27 + $0x48] sm:$0xff] %vm2092_vm10, %v5574_v30  ;;  %v2001_v33 = vadd.f32 %v5424_v23, %v1963_v43  ;;  %4594 = vpow2.f32 %v1865_v56  ;;  %v4575_v53 = vpop.eup %4574  ;;  %v1902_v59 = vadd.f32 1.0, %v4573_v35  ;;  %v1811_v1 = vsub.f32 0.0, %v5580_v51 }
 0x2c1   : > { %v4577_v54 = vpop.eup %4576  ;;  %v2004_v49 = vadd.f32 %v5424_v23, %v1966_v52  ;;  %v1965_v26 = vmul.f32 %v4575_v53, %v5413_v24  ;;  %4596 = vpow2.f32 %v1863_v32  ;;  %v1869_v19 = vmul.f32 1.442695, %v1812_v62  ;;  %v4307_v32 = vpop.f32.mrf.mxu0 }
 0x2c2   : > { %v5596_v20 = vsel %vm2027_vm2, %v2036_v63, %v2001_v33  ;;  %v4579_v3 = vpop.eup %4578  ;;  %4598 = vrcp.f32 %v1902_v59  ;;  %v1901_v44 = vadd.f32 1.0, %v4577_v54  ;;  %v1867_v17 = vmul.f32 1.442695, %v1811_v1 }
 0x2c3   : > { %2101 = vst.msk [vmem:[%s5438_s27 + $0x40] sm:$0xff] %vm2092_vm10, %v5596_v20  ;;  %2173 = vrot.lane.b32.xlu0 %v5596_v20, %s4714_s29  ;;  %v4581_v22 = vpop.eup %4580  ;;  %v5607_v63 = vsel %vm2027_vm2, %v2039_v12, %v2004_v49  ;;  %v2003_v31 = vadd.f32 %v5424_v23, %v1965_v26  ;;  %v1968_v4 = vmul.f32 %v4579_v3, %v5413_v24  ;;  %v2043_v60 = vand.u32 2147483647, %v5402_v8 }
 0x2c4   : > { %2175 = vrot.lane.b32.xlu1 %v5574_v30, %s4714_s29  ;;  %v4583_v13 = vpop.eup %4582  ;;  %2104 = vst.msk [vmem:[%s5438_s27 + $0x58] sm:$0xff] %vm2092_vm10, %v5607_v63  ;;  %v1967_v45 = vmul.f32 %v4581_v22, %v5413_v24  ;;  %4600 = vrcp.f32 %v1901_v44  ;;  %v5620_v12 = vadd.f32 %v5533_v7, %v5340_v61  ;;  %v5623_v36 = vadd.f32 %v5340_v61, %v1758_v41 }
 0x2c5   : > { %v5627_v48 = vsel %vm2027_vm2, %v2038_v40, %v2003_v31  ;;  %v2006_v56 = vadd.f32 %v5424_v23, %v1968_v4  ;;  %v1904_v21 = vadd.f32 1.0, %v4583_v13  ;;  %4602 = vpow2.f32 %v1869_v19  ;;  %v1778_v4 = vpop.f32.mrf.mxu0 }
 0x2c6   : > { %v4585_v39 = vpop.eup %4584  ;;  %2103 = vst.msk [vmem:[%s5438_s27 + $0x50] sm:$0xff] %vm2092_vm10, %v5627_v48  ;;  %v2005_v7 = vadd.f32 %v5424_v23, %v1967_v45  ;;  %4604 = vpow2.f32 %v1867_v17  ;;  %v1814_v41 = vsub.f32 0.0, %v5620_v12  ;;  %v1813_v47 = vsub.f32 0.0, %v5623_v36 }
 0x2c7   : > { %2177 = vrot.lane.b32.xlu0 %v5627_v48, %s4714_s29  ;;  %v5640_v43 = vsel %vm2027_vm2, %v2041_v11, %v2006_v56  ;;  %v1970_v40 = vmul.f32 %v4585_v39, %v5413_v24  ;;  %4606 = vrcp.f32 %v1904_v21  ;;  %v2042_v35 = vand.u32 2147483647, %v5406_v15 }
 0x2c8   : > { %2179 = vrot.lane.b32.xlu1 %v5607_v63, %s4714_s29  ;;  %v4587_v8 = vpop.eup %4586  ;;  %2106 = vst.msk [vmem:[%s5438_s27 + $0x68] sm:$0xff] %vm2092_vm10, %v5640_v43  ;;  %v5651_v37 = vsel %vm2027_vm2, %v2040_v2, %v2005_v7  ;;  %v1873_v33 = vmul.f32 1.442695, %v1814_v41  ;;  %v5655_v52 = vadd.f32 %v4304_v57, %v5340_v61  ;;  %v1871_v62 = vmul.f32 1.442695, %v1813_v47 }
 0x2c9   : > { %v4589_v53 = vpop.eup %4588  ;;  %2105 = vst.msk [vmem:[%s5438_s27 + $0x60] sm:$0xff] %vm2092_vm10, %v5651_v37  ;;  %v2008_v11 = vadd.f32 %v5424_v23, %v1970_v40  ;;  %v1969_v59 = vmul.f32 %v4587_v8, %v5413_v24  ;;  %v5663_v1 = vadd.f32 %v5340_v61, %v1768_v14  ;;  %v2045_v15 = vand.u32 2147483647, %v5419_v10 }
 0x2ca   : > { %v1903_v49 = vadd.f32 1.0, %v4589_v53  ;;  %4608 = vpow2.f32 %v1873_v33  ;;  %v1816_v57 = vsub.f32 0.0, %v5655_v52  ;;  %v2044_v45 = vand.u32 2147483647, %v5427_v34 }
 0x2cb   : > { %v4591_v54 = vpop.eup %4590  ;;  %2181 = vrot.lane.b32.xlu0 %v5651_v37, %s4714_s29  ;;  %v5671_v3 = vsel %vm2027_vm2, %v2043_v60, %v2008_v11  ;;  %v2007_v44 = vadd.f32 %v5424_v23, %v1969_v59  ;;  %4610 = vpow2.f32 %v1871_v62  ;;  %v1815_v31 = vsub.f32 0.0, %v5663_v1 }
 0x2cc   : > { %v4593_v26 = vpop.eup %4592  ;;  %v1972_v19 = vmul.f32 %v4591_v54, %v5413_v24  ;;  %2183 = vrot.lane.b32.xlu1 %v5640_v43, %s4714_s29  ;;  %2108 = vst.msk [vmem:[%s5438_s27 + $0x78] sm:$0xff] %vm2092_vm10, %v5671_v3  ;;  %4612 = vrcp.f32 %v1903_v49  ;;  %v1877_v22 = vmul.f32 1.442695, %v1816_v57  ;;  %v5693_v7 = vadd.f32 %v4307_v32, %v5340_v61 }
 0x2cd   : > { %v4595_v10 = vpop.eup %4594  ;;  %v1971_v17 = vmul.f32 %v4593_v26, %v5413_v24  ;;  %v5684_v2 = vsel %vm2027_vm2, %v2042_v35, %v2007_v44  ;;  %v1875_v39 = vmul.f32 1.442695, %v1815_v31  ;;  %v5702_v40 = vadd.f32 %v5340_v61, %v1778_v4 }
 0x2ce   : > { %v2010_v13 = vadd.f32 %v5424_v23, %v1972_v19  ;;  %v1906_v14 = vadd.f32 1.0, %v4595_v10  ;;  %v4597_v56 = vpop.eup %4596  ;;  %2107 = vst.msk [vmem:[%s5438_s27 + $0x70] sm:$0xff] %vm2092_vm10, %v5684_v2  ;;  %4614 = vpow2.f32 %v1877_v22  ;;  %v1818_v35 = vsub.f32 0.0, %v5693_v7 }
 0x2cf   : > { %v2009_v21 = vadd.f32 %v5424_v23, %v1971_v17  ;;  %2185 = vrot.lane.b32.xlu0 %v5684_v2, %s4714_s29  ;;  %v4599_v60 = vpop.eup %4598  ;;  %v1905_v41 = vadd.f32 1.0, %v4597_v56  ;;  %v1817_v61 = vsub.f32 0.0, %v5702_v40  ;;  %v2047_v11 = vand.u32 2147483647, %v5443_v46 }
 0x2d0   : > { %v5699_v34 = vsel %vm2027_vm2, %v2045_v15, %v2010_v13  ;;  %4616 = vrcp.f32 %v1906_v14  ;;  %2187 = vrot.lane.b32.xlu1 %v5671_v3, %s4714_s29  ;;  %v1974_v8 = vmul.f32 %v4599_v60, %v5413_v24  ;;  %v1881_v62 = vmul.f32 1.442695, %v1818_v35 }
 0x2d1   : > { %2110 = vst.msk [vmem:[%s5438_s27 + $0x88] sm:$0xff] %vm2092_vm10, %v5699_v34  ;;  %v5711_v47 = vsel %vm2027_vm2, %v2044_v45, %v2009_v21  ;;  %4618 = vpow2.f32 %v1875_v39  ;;  %v4601_v33 = vpop.eup %4600  ;;  %v2046_v15 = vand.u32 2147483647, %v5446_v38  ;;  %v1879_v57 = vmul.f32 1.442695, %v1817_v61 }
 0x2d2   : > { %2109 = vst.msk [vmem:[%s5438_s27 + $0x80] sm:$0xff] %vm2092_vm10, %v5711_v47  ;;  %4620 = vrcp.f32 %v1905_v41  ;;  %v4603_v32 = vpop.eup %4602  ;;  %v2012_v53 = vadd.f32 %v5424_v23, %v1974_v8  ;;  %v1973_v59 = vmul.f32 %v4601_v33, %v5413_v24  ;;  %v2049_v31 = vand.u32 2147483647, %v5473_v9 }
 0x2d3   : > { %2189 = vrot.lane.b32.xlu0 %v5711_v47, %s4714_s29  ;;  %v4605_v54 = vpop.eup %4604  ;;  %v1908_v49 = vadd.f32 1.0, %v4603_v32  ;;  %4622 = vpow2.f32 %v1881_v62  ;;  %v2048_v41 = vand.u32 2147483647, %v5504_v55 }
 0x2d4   : > { %2191 = vrot.lane.b32.xlu1 %v5699_v34, %s4714_s29  ;;  %v4607_v26 = vpop.eup %4606  ;;  %v5729_v44 = vsel %vm2027_vm2, %v2047_v11, %v2012_v53  ;;  %v2011_v46 = vadd.f32 %v5424_v23, %v1973_v59  ;;  %v1907_v19 = vadd.f32 1.0, %v4605_v54  ;;  %v2051_v59 = vand.u32 2147483647, %v5514_v0  ;;  %v2287_v0 = vld [vmem:[%s6691_s9 + $0x10] sm:$0xf] }
 0x2d5   : > { %2112 = vst.msk [vmem:[%s5438_s27 + $0x98] sm:$0xff] %vm2092_vm10, %v5729_v44  ;;  %v1976_v10 = vmul.f32 %v4607_v26, %v5413_v24  ;;  %4624 = vrcp.f32 %v1908_v49  ;;  %v2050_v49 = vand.u32 2147483647, %v5553_v5  ;;  %4308 = vmatprep.subr.msk.mxu0 %vm2449_vm11, %v2287_v0  ;;  %4362 = vmatprep.subr.msk.mxu1 %vm2449_vm11, %v2287_v0 }
 0x2d6   : > { %v5738_v38 = vsel %vm2027_vm2, %v2046_v15, %v2011_v46  ;;  %4626 = vrcp.f32 %v1907_v19  ;;  %4309 = vmatpush3.msk.msra.mxu0 %vm2449_vm11, %v2287_v0  ;;  %4365 = vmatpush3.msk.msra.mxu1 %vm2449_vm11, %v2287_v0  ;;  %v4715_v0 = vmov 12  }
 0x2d7   : > { %v4609_v17 = vpop.eup %4608  ;;  %2111 = vst.msk [vmem:[%s5438_s27 + $0x90] sm:$0xff] %vm2092_vm10, %v5738_v38  ;;  %v2014_v22 = vadd.f32 %v5424_v23, %v1976_v10  ;;  %4628 = vpow2.f32 %v1879_v57  ;;  %2193 = vrot.lane.b32.xlu0 %v5738_v38, %s4714_s29  ;;  %4383 = vset.pattern.permute.xlu1 %v4715_v0 }
 0x2d8   : > { %2195 = vrot.lane.b32.xlu1 %v5729_v44, %s4714_s29  ;;  %v4611_v4 = vpop.eup %4610  ;;  %v1910_v13 = vadd.f32 1.0, %v4609_v17  ;;  %4382 = vset.pattern.permute.xlu0 %v4715_v0 }
 0x2d9   : > { %v4613_v45 = vpop.eup %4612  ;;  %v5751_v14 = vsel %vm2027_vm2, %v2049_v31, %v2014_v22  ;;  %v1909_v56 = vadd.f32 1.0, %v4611_v4  ;;  %v2053_v31 = vand.u32 2147483647, %v5577_v29 }
 0x2da   : > { %2114 = vst.msk [vmem:[%s5438_s27 + $0xa8] sm:$0xff] %vm2092_vm10, %v5751_v14  ;;  %v1975_v9 = vmul.f32 %v4613_v45, %v5413_v24  ;;  %4630 = vrcp.f32 %v1910_v13  ;;  %v2052_v45 = vand.u32 2147483647, %v5580_v51 }
 0x2db   : > { %v4615_v21 = vpop.eup %4614  ;;  %4632 = vrcp.f32 %v1909_v56 }
 0x2dc   : > { %2199 = vrot.lane.b32.xlu1 %v5751_v14, %s4714_s29  ;;  %v2013_v60 = vadd.f32 %v5424_v23, %v1975_v9  ;;  %v1912_v8 = vadd.f32 1.0, %v4615_v21 }
 0x2dd   : > { %v4617_v39 = vpop.eup %4616 }
 0x2de   : > { %v4619_v35 = vpop.eup %4618  ;;  %v1978_v33 = vmul.f32 %v4617_v39, %v5413_v24  ;;  %v5764_v32 = vsel %vm2027_vm2, %v2048_v41, %v2013_v60  ;;  %4634 = vrcp.f32 %v1912_v8  ;;  %v2055_v41 = vand.u32 2147483647, %v5620_v12 }
 0x2df   : > { %v4621_v61 = vpop.eup %4620  ;;  %v1911_v53 = vadd.f32 1.0, %v4619_v35  ;;  %2113 = vst.msk [vmem:[%s5438_s27 + $0xa0] sm:$0xff] %vm2092_vm10, %v5764_v32  ;;  %2197 = vrot.lane.b32.xlu0 %v5764_v32, %s4714_s29 }
 0x2e0   : > { %v2016_v11 = vadd.f32 %v5424_v23, %v1978_v33  ;;  %v1977_v55 = vmul.f32 %v4621_v61, %v5413_v24  ;;  %v4623_v62 = vpop.eup %4622  ;;  %v2054_v33 = vand.u32 2147483647, %v5623_v36  ;;  %v2057_v36 = vand.u32 2147483647, %v5655_v52 }
 0x2e1   : > { %4636 = vrcp.f32 %v1911_v53  ;;  %v1914_v26 = vadd.f32 1.0, %v4623_v62 }
 0x2e2   : > { %v5776_v54 = vsel %vm2027_vm2, %v2051_v59, %v2016_v11  ;;  %v2015_v15 = vadd.f32 %v5424_v23, %v1977_v55  ;;  %v4625_v57 = vpop.eup %4624 }
 0x2e3   : > { %2116 = vst.msk [vmem:[%s5438_s27 + $0xb8] sm:$0xff] %vm2092_vm10, %v5776_v54  ;;  %2203 = vrot.lane.b32.xlu1 %v5776_v54, %s4714_s29  ;;  %v4627_v46 = vpop.eup %4626  ;;  %v1980_v5 = vmul.f32 %v4625_v57, %v5413_v24  ;;  %4638 = vrcp.f32 %v1914_v26 }
 0x2e4   : > { %v5791_v19 = vsel %vm2027_vm2, %v2050_v49, %v2015_v15  ;;  %v4629_v10 = vpop.eup %4628  ;;  %v1979_v17 = vmul.f32 %v4627_v46, %v5413_v24  ;;  %v2056_v49 = vand.u32 2147483647, %v5663_v1 }
 0x2e5   : > { %2115 = vst.msk [vmem:[%s5438_s27 + $0xb0] sm:$0xff] %vm2092_vm10, %v5791_v19  ;;  %2201 = vrot.lane.b32.xlu0 %v5791_v19, %s4714_s29  ;;  %v2018_v22 = vadd.f32 %v5424_v23, %v1980_v5  ;;  %v1913_v4 = vadd.f32 1.0, %v4629_v10  ;;  %v2059_v5 = vand.u32 2147483647, %v5693_v7 }
 0x2e6   : > { %v2017_v13 = vadd.f32 %v5424_v23, %v1979_v17 }
 0x2e7   : > { %v4631_v56 = vpop.eup %4630  ;;  %v5809_v9 = vsel %vm2027_vm2, %v2053_v31, %v2018_v22  ;;  %4640 = vrcp.f32 %v1913_v4  ;;  %v2058_v31 = vand.u32 2147483647, %v5702_v40 }
 0x2e8   : > { %v4633_v21 = vpop.eup %4632  ;;  %2118 = vst.msk [vmem:[%s5438_s27 + $0xc8] sm:$0xff] %vm2092_vm10, %v5809_v9  ;;  %v5816_v39 = vsel %vm2027_vm2, %v2052_v45, %v2017_v13  ;;  %v1982_v29 = vmul.f32 %v4631_v56, %v5413_v24  ;;  %2207 = vrot.lane.b32.xlu1 %v5809_v9, %s4714_s29 }
 0x2e9   : > { %2117 = vst.msk [vmem:[%s5438_s27 + $0xc0] sm:$0xff] %vm2092_vm10, %v5816_v39  ;;  %v1981_v51 = vmul.f32 %v4633_v21, %v5413_v24  ;;  %2205 = vrot.lane.b32.xlu0 %v5816_v39, %s4714_s29 }
 0x2ea   : > { %v2020_v60 = vadd.f32 %v5424_v23, %v1982_v29 }
 0x2eb   : > { %v4635_v8 = vpop.eup %4634  ;;  %v2019_v35 = vadd.f32 %v5424_v23, %v1981_v51 }
 0x2ec   : > { %v5833_v61 = vsel %vm2027_vm2, %v2055_v41, %v2020_v60  ;;  %v1984_v53 = vmul.f32 %v4635_v8, %v5413_v24 }
 0x2ed   : > { %2120 = vst.msk [vmem:[%s5438_s27 + $0xd8] sm:$0xff] %vm2092_vm10, %v5833_v61  ;;  %v5841_v59 = vsel %vm2027_vm2, %v2054_v33, %v2019_v35  ;;  %2211 = vrot.lane.b32.xlu1 %v5833_v61, %s4714_s29 }
 0x2ee   : > { %v4637_v11 = vpop.eup %4636  ;;  %2119 = vst.msk [vmem:[%s5438_s27 + $0xd0] sm:$0xff] %vm2092_vm10, %v5841_v59  ;;  %v2022_v12 = vadd.f32 %v5424_v23, %v1984_v53  ;;  %2209 = vrot.lane.b32.xlu0 %v5841_v59, %s4714_s29 }
 0x2ef   : > { %v1983_v55 = vmul.f32 %v4637_v11, %v5413_v24 }
 0x2f0   : > { %v5855_v62 = vsel %vm2027_vm2, %v2057_v36, %v2022_v12  ;;  %v4639_v57 = vpop.eup %4638 }
 0x2f1   : > { %v2021_v15 = vadd.f32 %v5424_v23, %v1983_v55  ;;  %2122 = vst.msk [vmem:[%s5438_s27 + $0xe8] sm:$0xff] %vm2092_vm10, %v5855_v62  ;;  %2215 = vrot.lane.b32.xlu1 %v5855_v62, %s4714_s29  ;;  %v1986_v26 = vmul.f32 %v4639_v57, %v5413_v24 }
 0x2f3   : > { %v5866_v52 = vsel %vm2027_vm2, %v2056_v49, %v2021_v15  ;;  %v2024_v46 = vadd.f32 %v5424_v23, %v1986_v26 }
 0x2f4   : > { %2121 = vst.msk [vmem:[%s5438_s27 + $0xe0] sm:$0xff] %vm2092_vm10, %v5866_v52  ;;  %2213 = vrot.lane.b32.xlu0 %v5866_v52, %s4714_s29  ;;  %v4641_v1 = vpop.eup %4640 }
 0x2f5   : > { %v1985_v10 = vmul.f32 %v4641_v1, %v5413_v24  ;;  %v5879_v17 = vsel %vm2027_vm2, %v2059_v5, %v2024_v46  ;;  %v2286_v24 = vld [vmem:[%s6691_s9 + $0x8] sm:$0xff] }
 0x2f6   : > { %2124 = vst.msk [vmem:[%s5438_s27 + $0xf8] sm:$0xff] %vm2092_vm10, %v5879_v17  ;;  %2219 = vrot.lane.b32.xlu1 %v5879_v17, %s4714_s29  ;;  %4310 = vmatprep.subr.mxu0 %v2286_v24 }
 0x2f7   : > { %v2023_v22 = vadd.f32 %v5424_v23, %v1985_v10  ;;  %4363 = vmatprep.subr.mxu1 %v2286_v24  ;;  %4311 = vmatpush3.msra.mxu0 %v2286_v24 }
 0x2f8   : > { %4366 = vmatpush3.msra.mxu1 %v2286_v24  ;;  %4312 = vmatprep.subr.mxu0 %v2285_v50 }
 0x2f9   : > { %v5890_v4 = vsel %vm2027_vm2, %v2058_v31, %v2023_v22  ;;  %4364 = vmatprep.subr.mxu1 %v2285_v50  ;;  %4313 = vmatpush3.msra.mxu0 %v2285_v50 }
 0x2fa   : > { %2123 = vst.msk [vmem:[%s5438_s27 + $0xf0] sm:$0xff] %vm2092_vm10, %v5890_v4  ;;  %2217 = vrot.lane.b32.xlu0 %v5890_v4, %s4714_s29  ;;  %4367 = vmatpush3.msra.mxu1 %v2285_v50 }
 0x321   : > { %v2160_v23 = vpop.permute.xlu0 %2159 }
 0x322   : > { %v2254_v7 = vmul.f32 %v2160_v23, %v5450_v58 }
 0x324   : > { %2322 = vrot.lane.b32.xlu1 %v2254_v7, %s4716_s18 }
 0x325   : > { %v2158_v40 = vpop.permute.xlu0 %2157  ;;  %v2164_v13 = vpop.permute.xlu1 %2163 }
 0x326   : > { %v2253_v45 = vmul.f32 %v2158_v40, %v5463_v6  ;;  %v2256_v56 = vmul.f32 %v2164_v13, %v5479_v18 }
 0x328   : > { %2320 = vrot.lane.b32.xlu0 %v2253_v45, %s4716_s18  ;;  %2326 = vrot.lane.b32.xlu1 %v2256_v56, %s4716_s18 }
 0x329   : > { %v2162_v21 = vpop.permute.xlu1 %2161 }
 0x32a   : > { %v2255_v29 = vmul.f32 %v2162_v21, %v5496_v27 }
 0x32c   : > { %v2166_v51 = vpop.permute.xlu0 %2165  ;;  %2324 = vrot.lane.b32.xlu0 %v2255_v29, %s4716_s18 }
 0x32d   : > { %v2168_v60 = vpop.permute.xlu1 %2167  ;;  %v2257_v41 = vmul.f32 %v2166_v51, %v5531_v25 }
 0x32e   : > { %v2258_v8 = vmul.f32 %v2168_v60, %v5510_v16 }
 0x330   : > { %v2170_v35 = vpop.permute.xlu0 %2169  ;;  %2330 = vrot.lane.b32.xlu1 %v2258_v8, %s4716_s18  ;;  %2328 = vrot.lane.b32.xlu0 %v2257_v41, %s4716_s18 }
 0x331   : > { %v2172_v33 = vpop.permute.xlu1 %2171  ;;  %v2259_v53 = vmul.f32 %v2170_v35, %v5561_v42 }
 0x332   : > { %v2260_v11 = vmul.f32 %v2172_v33, %v5542_v28 }
 0x334   : > { %2334 = vrot.lane.b32.xlu1 %v2260_v11, %s4716_s18  ;;  %2332 = vrot.lane.b32.xlu0 %v2259_v53, %s4716_s18 }
 0x335   : > { %v2174_v12 = vpop.permute.xlu0 %2173 }
 0x336   : > { %v2176_v36 = vpop.permute.xlu1 %2175  ;;  %v2261_v55 = vmul.f32 %v2174_v12, %v5596_v20 }
 0x337   : > { %v2262_v15 = vmul.f32 %v2176_v36, %v5574_v30 }
 0x338   : > { %2336 = vrot.lane.b32.xlu0 %v2261_v55, %s4716_s18 }
 0x339   : > { %v2178_v49 = vpop.permute.xlu0 %2177  ;;  %2338 = vrot.lane.b32.xlu1 %v2262_v15, %s4716_s18 }
 0x33a   : > { %v2180_v0 = vpop.permute.xlu1 %2179  ;;  %v2263_v57 = vmul.f32 %v2178_v49, %v5627_v48 }
 0x33b   : > { %v2264_v26 = vmul.f32 %v2180_v0, %v5607_v63 }
 0x33c   : > { %2340 = vrot.lane.b32.xlu0 %v2263_v57, %s4716_s18 }
 0x33d   : > { %v2182_v1 = vpop.permute.xlu0 %2181  ;;  %2342 = vrot.lane.b32.xlu1 %v2264_v26, %s4716_s18 }
 0x33e   : > { %v2184_v46 = vpop.permute.xlu1 %2183  ;;  %v2265_v5 = vmul.f32 %v2182_v1, %v5651_v37 }
 0x33f   : > { %v2266_v10 = vmul.f32 %v2184_v46, %v5640_v43 }
 0x340   : > { %2344 = vrot.lane.b32.xlu0 %v2265_v5, %s4716_s18 }
 0x341   : > { %v2186_v22 = vpop.permute.xlu0 %2185  ;;  %2346 = vrot.lane.b32.xlu1 %v2266_v10, %s4716_s18 }
 0x342   : > { %v2188_v31 = vpop.permute.xlu1 %2187  ;;  %v2267_v24 = vmul.f32 %v2186_v22, %v5684_v2 }
 0x343   : > { %v2268_v50 = vmul.f32 %v2188_v31, %v5671_v3 }
 0x344   : > { %2348 = vrot.lane.b32.xlu0 %v2267_v24, %s4716_s18 }
 0x345   : > { %v2190_v23 = vpop.permute.xlu0 %2189  ;;  %2350 = vrot.lane.b32.xlu1 %v2268_v50, %s4716_s18 }
 0x346   : > { %v2192_v7 = vpop.permute.xlu1 %2191  ;;  %v2269_v40 = vmul.f32 %v2190_v23, %v5711_v47 }
 0x347   : > { %v2270_v13 = vmul.f32 %v2192_v7, %v5699_v34 }
 0x348   : > { %2352 = vrot.lane.b32.xlu0 %v2269_v40, %s4716_s18 }
 0x349   : > { %2354 = vrot.lane.b32.xlu1 %v2270_v13, %s4716_s18  ;;  %v2194_v45 = vpop.permute.xlu0 %2193 }
 0x34a   : > { %v2196_v56 = vpop.permute.xlu1 %2195  ;;  %v2271_v21 = vmul.f32 %v2194_v45, %v5738_v38 }
 0x34b   : > { %v2272_v29 = vmul.f32 %v2196_v56, %v5729_v44 }
 0x34c   : > { %2356 = vrot.lane.b32.xlu0 %v2271_v21, %s4716_s18 }
 0x34d   : > { %2358 = vrot.lane.b32.xlu1 %v2272_v29, %s4716_s18 }
 0x34e   : > { %v2200_v51 = vpop.permute.xlu1 %2199 }
 0x34f   : > { %v2274_v60 = vmul.f32 %v2200_v51, %v5751_v14 }
 0x351   : > { %2362 = vrot.lane.b32.xlu1 %v2274_v60, %s4716_s18  ;;  %v2198_v41 = vpop.permute.xlu0 %2197 }
 0x352   : > { %v2273_v8 = vmul.f32 %v2198_v41, %v5764_v32  ;;  %v2941_v41 = vsub.f32 1.0, %v5463_v6 }
 0x354   : > { %2360 = vrot.lane.b32.xlu0 %v2273_v8, %s4716_s18 }
 0x355   : > { %v2204_v35 = vpop.permute.xlu1 %2203 }
 0x356   : > { %v2276_v33 = vmul.f32 %v2204_v35, %v5776_v54 }
 0x357   : > { %v2202_v53 = vpop.permute.xlu0 %2201 }
 0x358   : > { %v2275_v11 = vmul.f32 %v2202_v53, %v5791_v19  ;;  %2366 = vrot.lane.b32.xlu1 %v2276_v33, %s4716_s18  ;;  %v2942_v33 = vsub.f32 1.0, %v5450_v58  ;;  %v2943_v53 = vsub.f32 1.0, %v5496_v27 }
 0x35a   : > { %2364 = vrot.lane.b32.xlu0 %v2275_v11, %s4716_s18  ;;  %v2208_v12 = vpop.permute.xlu1 %2207 }
 0x35b   : > { %v2206_v36 = vpop.permute.xlu0 %2205  ;;  %v2278_v55 = vmul.f32 %v2208_v12, %v5809_v9 }
 0x35c   : > { %v2277_v15 = vmul.f32 %v2206_v36, %v5816_v39  ;;  %v2944_v36 = vsub.f32 1.0, %v5479_v18 }
 0x35d   : > { %2370 = vrot.lane.b32.xlu1 %v2278_v55, %s4716_s18  ;;  %v2945_v55 = vsub.f32 1.0, %v5531_v25 }
 0x35e   : > { %2368 = vrot.lane.b32.xlu0 %v2277_v15, %s4716_s18 }
 0x35f   : > { %v2212_v49 = vpop.permute.xlu1 %2211 }
 0x360   : > { %v2210_v0 = vpop.permute.xlu0 %2209  ;;  %v2280_v57 = vmul.f32 %v2212_v49, %v5833_v61 }
 0x361   : > { %v2279_v26 = vmul.f32 %v2210_v0, %v5841_v59  ;;  %v2946_v0 = vsub.f32 1.0, %v5510_v16 }
 0x362   : > { %2374 = vrot.lane.b32.xlu1 %v2280_v57, %s4716_s18  ;;  %v2947_v57 = vsub.f32 1.0, %v5561_v42 }
 0x363   : > { %2372 = vrot.lane.b32.xlu0 %v2279_v26, %s4716_s18  ;;  %v2216_v1 = vpop.permute.xlu1 %2215 }
 0x364   : > { %v2282_v46 = vmul.f32 %v2216_v1, %v5855_v62 }
 0x366   : > { %v2214_v5 = vpop.permute.xlu0 %2213  ;;  %2378 = vrot.lane.b32.xlu1 %v2282_v46, %s4716_s18  ;;  %v2948_v46 = vsub.f32 1.0, %v5542_v28 }
 0x367   : > { %v2281_v10 = vmul.f32 %v2214_v5, %v5866_v52  ;;  %v2949_v5 = vsub.f32 1.0, %v5596_v20 }
 0x368   : > { %v2220_v22 = vpop.permute.xlu1 %2219 }
 0x369   : > { %2376 = vrot.lane.b32.xlu0 %v2281_v10, %s4716_s18  ;;  %v2284_v31 = vmul.f32 %v2220_v22, %v5879_v17 }
 0x36b   : > { %2382 = vrot.lane.b32.xlu1 %v2284_v31, %s4716_s18  ;;  %v2950_v31 = vsub.f32 1.0, %v5574_v30 }
 0x36c   : > { %v2218_v24 = vpop.permute.xlu0 %2217 }
 0x36d   : > { %v2283_v50 = vmul.f32 %v2218_v24, %v5890_v4  ;;  %v2951_v24 = vsub.f32 1.0, %v5627_v48 }
 0x36f   : > { %2380 = vrot.lane.b32.xlu0 %v2283_v50, %s4716_s18  ;;  %2786 = vperm.xlu1 %4383, %v5450_v58  }
 0x373   : > { %2782 = vperm.xlu0 %4382, %v5463_v6   ;;  %2790 = vperm.xlu1 %4383, %v5496_v27  }
 0x377   : > { %2794 = vperm.xlu0 %4382, %v5479_v18   ;;  %2798 = vperm.xlu1 %4383, %v5531_v25  }
 0x37b   : > { %2802 = vperm.xlu0 %4382, %v5510_v16   ;;  %2806 = vperm.xlu1 %4383, %v5561_v42  }
 0x37f   : > { %2810 = vperm.xlu0 %4382, %v5542_v28   ;;  %2814 = vperm.xlu1 %4383, %v5596_v20  }
 0x383   : > { %2818 = vperm.xlu0 %4382, %v5574_v30   ;;  %2822 = vperm.xlu1 %4383, %v5627_v48  }
 0x387   : > { %2826 = vperm.xlu0 %4382, %v5607_v63   ;;  %2830 = vperm.xlu1 %4383, %v5651_v37  }
 0x38b   : > { %2834 = vperm.xlu0 %4382, %v5640_v43   ;;  %2838 = vperm.xlu1 %4383, %v5684_v2  }
 0x38f   : > { %2842 = vperm.xlu0 %4382, %v5671_v3   ;;  %2846 = vperm.xlu1 %4383, %v5711_v47  }
 0x393   : > { %2850 = vperm.xlu0 %4382, %v5699_v34   ;;  %2854 = vperm.xlu1 %4383, %v5738_v38  }
 0x396   : > { %v2323_v23 = vpop.permute.xlu1 %2322 }
 0x397   : > { %2858 = vperm.xlu0 %4382, %v5729_v44   ;;  %2862 = vperm.xlu1 %4383, %v5764_v32  }
 0x39a   : > { %v2321_v7 = vpop.permute.xlu0 %2320  ;;  %v2327_v40 = vpop.permute.xlu1 %2326 }
 0x39b   : > { %4314 = vmatprep.mubr.msk.f32.mxu0 %vm2384_vm12, %v2321_v7  ;;  %2866 = vperm.xlu0 %4382, %v5751_v14   ;;  %v2953_v7 = vsub.f32 1.0, %v5651_v37 }
 0x39c   : > { %4315 = vmatmul.mubr.msk.f32.vlgmr.msra.gmra.mxu0 %vm2384_vm12, %v2323_v23  ;;  %2870 = vperm.xlu1 %4383, %v5791_v19   ;;  %v2952_v23 = vsub.f32 1.0, %v5607_v63 }
 0x39e   : > { %v2325_v13 = vpop.permute.xlu0 %2324 }
 0x39f   : > { %2874 = vperm.xlu0 %4382, %v5776_v54   ;;  %4317 = vmatprep.mubr.msk.f32.mxu1 %vm2384_vm12, %v2325_v13  ;;  %v2954_v13 = vsub.f32 1.0, %v5640_v43 }
 0x3a0   : > { %2878 = vperm.xlu1 %4383, %v5816_v39   ;;  %4318 = vmatmul.mubr.msk.f32.vlgmr.msra.gmra.mxu1 %vm2384_vm12, %v2327_v40 }
 0x3a2   : > { %v2331_v45 = vpop.permute.xlu1 %2330  ;;  %v2329_v56 = vpop.permute.xlu0 %2328 }
 0x3a3   : > { %2882 = vperm.xlu0 %4382, %v5809_v9   ;;  %4320 = vmatprep.mubr.msk.f32.mxu1 %vm2384_vm12, %v2329_v56  ;;  %v2955_v56 = vsub.f32 1.0, %v5684_v2 }
 0x3a4   : > { %2886 = vperm.xlu1 %4383, %v5841_v59   ;;  %4321 = vmatmul.mubr.msk.f32.gmra.mxu1 %vm2384_vm12, %v2331_v45 }
 0x3a6   : > { %v2335_v21 = vpop.permute.xlu1 %2334  ;;  %v2333_v29 = vpop.permute.xlu0 %2332 }
 0x3a7   : > { %2890 = vperm.xlu0 %4382, %v5833_v61   ;;  %4323 = vmatprep.mubr.msk.f32.mxu1 %vm2384_vm12, %v2333_v29  ;;  %v2956_v29 = vsub.f32 1.0, %v5671_v3 }
 0x3a8   : > { %2894 = vperm.xlu1 %4383, %v5866_v52   ;;  %4324 = vmatmul.mubr.msk.f32.gmra.mxu1 %vm2384_vm12, %v2335_v21 }
 0x3aa   : > { %v2337_v60 = vpop.permute.xlu0 %2336 }
 0x3ab   : > { %v2339_v51 = vpop.permute.xlu1 %2338  ;;  %2898 = vperm.xlu0 %4382, %v5855_v62   ;;  %4326 = vmatprep.mubr.msk.f32.mxu1 %vm2384_vm12, %v2337_v60 }
 0x3ac   : > { %2902 = vperm.xlu1 %4383, %v5890_v4   ;;  %4327 = vmatmul.mubr.msk.f32.gmra.mxu1 %vm2384_vm12, %v2339_v51  ;;  %v2957_v51 = vsub.f32 1.0, %v5711_v47 }
 0x3ae   : > { %v2341_v35 = vpop.permute.xlu0 %2340 }
 0x3af   : > { %v2343_v8 = vpop.permute.xlu1 %2342  ;;  %2906 = vperm.xlu0 %4382, %v5879_v17   ;;  %4329 = vmatprep.mubr.msk.f32.mxu1 %vm2384_vm12, %v2341_v35  ;;  %v2959_v35 = vsub.f32 1.0, %v5738_v38 }
 0x3b0   : > { %2975 = vperm.xlu1 %4383, %v2941_v41   ;;  %4330 = vmatmul.mubr.msk.f32.gmra.mxu1 %vm2384_vm12, %v2343_v8  ;;  %v2958_v8 = vsub.f32 1.0, %v5699_v34 }
 0x3b2   : > { %v2345_v12 = vpop.permute.xlu0 %2344 }
 0x3b3   : > { %v2347_v11 = vpop.permute.xlu1 %2346  ;;  %2980 = vperm.xlu0 %4382, %v2942_v33   ;;  %4332 = vmatprep.mubr.msk.f32.mxu1 %vm2384_vm12, %v2345_v12  ;;  %v2961_v12 = vsub.f32 1.0, %v5764_v32 }
 0x3b4   : > { %2985 = vperm.xlu1 %4383, %v2943_v53   ;;  %4333 = vmatmul.mubr.msk.f32.gmra.mxu1 %vm2384_vm12, %v2347_v11  ;;  %v2960_v53 = vsub.f32 1.0, %v5729_v44 }
 0x3b6   : > { %v2349_v49 = vpop.permute.xlu0 %2348 }
 0x3b7   : > { %v2351_v15 = vpop.permute.xlu1 %2350  ;;  %2990 = vperm.xlu0 %4382, %v2944_v36   ;;  %4335 = vmatprep.mubr.msk.f32.mxu1 %vm2384_vm12, %v2349_v49  ;;  %v2962_v36 = vsub.f32 1.0, %v5751_v14  ;;  %v2963_v49 = vsub.f32 1.0, %v5791_v19 }
 0x3b8   : > { %2995 = vperm.xlu1 %4383, %v2945_v55   ;;  %4336 = vmatmul.mubr.msk.f32.gmra.mxu1 %vm2384_vm12, %v2351_v15 }
 0x3ba   : > { %v2353_v1 = vpop.permute.xlu0 %2352 }
 0x3bb   : > { %v2355_v26 = vpop.permute.xlu1 %2354  ;;  %3000 = vperm.xlu0 %4382, %v2946_v0   ;;  %4338 = vmatprep.mubr.msk.f32.mxu1 %vm2384_vm12, %v2353_v1  ;;  %v2964_v0 = vsub.f32 1.0, %v5776_v54 }
 0x3bc   : > { %3005 = vperm.xlu1 %4383, %v2947_v57   ;;  %4339 = vmatmul.mubr.msk.f32.gmra.mxu1 %vm2384_vm12, %v2355_v26  ;;  %v2965_v57 = vsub.f32 1.0, %v5816_v39 }
 0x3be   : > { %v2357_v22 = vpop.permute.xlu0 %2356 }
 0x3bf   : > { %v2359_v10 = vpop.permute.xlu1 %2358  ;;  %3010 = vperm.xlu0 %4382, %v2948_v46   ;;  %4341 = vmatprep.mubr.msk.f32.mxu1 %vm2384_vm12, %v2357_v22  ;;  %v2966_v46 = vsub.f32 1.0, %v5809_v9  ;;  %v2969_v22 = vsub.f32 1.0, %v5866_v52 }
 0x3c0   : > { %3015 = vperm.xlu1 %4383, %v2949_v5   ;;  %4342 = vmatmul.mubr.msk.f32.gmra.mxu1 %vm2384_vm12, %v2359_v10  ;;  %v2967_v5 = vsub.f32 1.0, %v5841_v59  ;;  %v2968_v10 = vsub.f32 1.0, %v5833_v61 }
 0x3c3   : > { %3020 = vperm.xlu0 %4382, %v2950_v31   ;;  %v2363_v50 = vpop.permute.xlu1 %2362  ;;  %v2970_v31 = vsub.f32 1.0, %v5855_v62 }
 0x3c4   : > { %3025 = vperm.xlu1 %4383, %v2951_v24   ;;  %v2971_v24 = vsub.f32 1.0, %v5890_v4 }
 0x3c6   : > { %v2361_v40 = vpop.permute.xlu0 %2360 }
 0x3c7   : > { %3030 = vperm.xlu0 %4382, %v2952_v23   ;;  %4344 = vmatprep.mubr.msk.f32.mxu1 %vm2384_vm12, %v2361_v40  ;;  %v2972_v23 = vsub.f32 1.0, %v5879_v17 }
 0x3c8   : > { %3035 = vperm.xlu1 %4383, %v2953_v7   ;;  %4345 = vmatmul.mubr.msk.f32.gmra.mxu1 %vm2384_vm12, %v2363_v50 }
 0x3ca   : > { %v2367_v45 = vpop.permute.xlu1 %2366 }
 0x3cb   : > { %3040 = vperm.xlu0 %4382, %v2954_v13   ;;  %v4717_v13 = vmov 13  }
 0x3cc   : > { %v2365_v21 = vpop.permute.xlu0 %2364  ;;  %3045 = vperm.xlu1 %4383, %v2955_v56  }
 0x3cd   : > { %4347 = vmatprep.mubr.msk.f32.mxu1 %vm2384_vm12, %v2365_v21 }
 0x3ce   : > { %4348 = vmatmul.mubr.msk.f32.gmra.mxu1 %vm2384_vm12, %v2367_v45 }
 0x3cf   : > { %3050 = vperm.xlu0 %4382, %v2956_v29   ;;  %v2371_v60 = vpop.permute.xlu1 %2370 }
 0x3d0   : > { %3055 = vperm.xlu1 %4383, %v2957_v51   ;;  %v2369_v41 = vpop.permute.xlu0 %2368 }
 0x3d1   : > { %4350 = vmatprep.mubr.msk.f32.mxu1 %vm2384_vm12, %v2369_v41 }
 0x3d2   : > { %4351 = vmatmul.mubr.msk.f32.gmra.mxu1 %vm2384_vm12, %v2371_v60 }
 0x3d3   : > { %3060 = vperm.xlu0 %4382, %v2958_v8  }
 0x3d4   : > { %3065 = vperm.xlu1 %4383, %v2959_v35   ;;  %v2375_v33 = vpop.permute.xlu1 %2374 }
 0x3d5   : > { %v2373_v11 = vpop.permute.xlu0 %2372 }
 0x3d6   : > { %4353 = vmatprep.mubr.msk.f32.mxu1 %vm2384_vm12, %v2373_v11 }
 0x3d7   : > { %3070 = vperm.xlu0 %4382, %v2960_v53   ;;  %4354 = vmatmul.mubr.msk.f32.gmra.mxu1 %vm2384_vm12, %v2375_v33 }
 0x3d8   : > { %3075 = vperm.xlu1 %4383, %v2961_v12   ;;  %v2379_v55 = vpop.permute.xlu1 %2378 }
 0x3db   : > { %v2377_v15 = vpop.permute.xlu0 %2376  ;;  %3080 = vperm.xlu0 %4382, %v2962_v36  }
 0x3dc   : > { %4356 = vmatprep.mubr.msk.f32.mxu1 %vm2384_vm12, %v2377_v15  ;;  %3085 = vperm.xlu1 %4383, %v2963_v49   ;;  %v6196_v15 = vld [vmem:[%s6692_s10] ss:$0 sm:$0xff] }
 0x3dd   : > { %4357 = vmatmul.mubr.msk.f32.gmra.mxu1 %vm2384_vm12, %v2379_v55  ;;  %v2383_v26 = vpop.permute.xlu1 %2382 }
 0x3df   : > { %3090 = vperm.xlu0 %4382, %v2964_v0  }
 0x3e0   : > { %3095 = vperm.xlu1 %4383, %v2965_v57  }
 0x3e1   : > { %v2381_v1 = vpop.permute.xlu0 %2380 }
 0x3e2   : > { %4359 = vmatprep.mubr.msk.f32.mxu1 %vm2384_vm12, %v2381_v1 }
 0x3e3   : > { %3100 = vperm.xlu0 %4382, %v2966_v46   ;;  %4360 = vmatmul.mubr.msk.f32.gmra.mxu1 %vm2384_vm12, %v2383_v26 }
 0x3e4   : > { %3105 = vperm.xlu1 %4383, %v2967_v5  }
 0x3e7   : > { %3110 = vperm.xlu0 %4382, %v2968_v10  }
 0x3e8   : > { %3115 = vperm.xlu1 %4383, %v2969_v22  }
 0x3ea   : > { %v6062_v50 = vpop.permute.xlu1 %2786 }
 0x3eb   : > { %3120 = vperm.xlu0 %4382, %v2970_v31  }
 0x3ec   : > { %3125 = vperm.xlu1 %4383, %v2971_v24  }
 0x3ee   : > { %v6065_v7 = vpop.permute.xlu0 %2782  ;;  %v6067_v40 = vpop.permute.xlu1 %2790 }
 0x3ef   : > { %3130 = vperm.xlu0 %4382, %v2972_v23  }
 0x3f0   : > { %4384 = vset.pattern.permute.xlu1 %v4717_v13 }
 0x3f1   : > { %3326 = vperm.xlu1 %4384, %v5463_v6  }
 0x3f2   : > { %v6070_v45 = vpop.permute.xlu0 %2794  ;;  %v6072_v56 = vpop.permute.xlu1 %2798 }
 0x3f3   : > { %4385 = vset.pattern.permute.xlu0 %v4717_v13 }
 0x3f4   : > { %3330 = vperm.xlu0 %4385, %v5450_v58  }
 0x3f5   : > { %3334 = vperm.xlu1 %4384, %v5496_v27  }
 0x3f6   : > { %v6076_v21 = vpop.permute.xlu0 %2802  ;;  %v6078_v29 = vpop.permute.xlu1 %2806 }
 0x3f8   : > { %3342 = vperm.xlu0 %4385, %v5531_v25  }
 0x3f9   : > { %3338 = vperm.xlu1 %4384, %v5479_v18  }
 0x3fa   : > { %v6082_v51 = vpop.permute.xlu0 %2810  ;;  %v6084_v6 = vpop.permute.xlu1 %2814 }
 0x3fc   : > { %3350 = vperm.xlu0 %4385, %v5561_v42  }
 0x3fd   : > { %3346 = vperm.xlu1 %4384, %v5510_v16  }
 0x3fe   : > { %v6088_v60 = vpop.permute.xlu0 %2818  ;;  %v6090_v58 = vpop.permute.xlu1 %2822 }
 0x400   : > { %3358 = vperm.xlu0 %4385, %v5596_v20  }
 0x401   : > { %3354 = vperm.xlu1 %4384, %v5542_v28  }
 0x402   : > { %v6094_v27 = vpop.permute.xlu0 %2826  ;;  %v6096_v25 = vpop.permute.xlu1 %2830 }
 0x404   : > { %3366 = vperm.xlu0 %4385, %v5627_v48  }
 0x405   : > { %3362 = vperm.xlu1 %4384, %v5574_v30  }
 0x406   : > { %v6100_v18 = vpop.permute.xlu0 %2834  ;;  %v6102_v42 = vpop.permute.xlu1 %2838 }
 0x407   : > { %6711 = vst [vmem:[#allocation2_spill] sm:$0xff] %v6102_v42 }
 0x408   : > { %3374 = vperm.xlu0 %4385, %v5651_v37  }
 0x409   : > { %3370 = vperm.xlu1 %4384, %v5607_v63  }
 0x40a   : > { %v6106_v16 = vpop.permute.xlu0 %2842  ;;  %v6108_v20 = vpop.permute.xlu1 %2846 }
 0x40b   : > { %6712 = vst [vmem:[#allocation3_spill] sm:$0xff] %v6108_v20 }
 0x40c   : > { %3382 = vperm.xlu0 %4385, %v5684_v2  }
 0x40d   : > { %3378 = vperm.xlu1 %4384, %v5640_v43  }
 0x40e   : > { %v6112_v28 = vpop.permute.xlu0 %2850  ;;  %v6114_v48 = vpop.permute.xlu1 %2854 }
 0x40f   : > { %6713 = vst [vmem:[#allocation4_spill] sm:$0xff] %v6112_v28  ;;  %6714 = vst [vmem:[#allocation5_spill] sm:$0xff] %v6114_v48 }
 0x410   : > { %3390 = vperm.xlu0 %4385, %v5711_v47  }
 0x411   : > { %3386 = vperm.xlu1 %4384, %v5671_v3  }
 0x412   : > { %v6118_v30 = vpop.permute.xlu0 %2858  ;;  %v6120_v37 = vpop.permute.xlu1 %2862 }
 0x413   : > { %6715 = vst [vmem:[#allocation6_spill] sm:$0xff] %v6118_v30  ;;  %6716 = vst [vmem:[#allocation7_spill] sm:$0xff] %v6120_v37 }
 0x414   : > { %3398 = vperm.xlu0 %4385, %v5738_v38  }
 0x415   : > { %3394 = vperm.xlu1 %4384, %v5699_v34  }
 0x416   : > { %v6124_v63 = vpop.permute.xlu0 %2866 }
 0x417   : > { %6717 = vst [vmem:[#allocation8_spill] sm:$0xff] %v6124_v63  ;;  %v6126_v2 = vpop.permute.xlu1 %2870 }
 0x418   : > { %6718 = vst [vmem:[#allocation9_spill] sm:$0xff] %v6126_v2  ;;  %3406 = vperm.xlu0 %4385, %v5764_v32  }
 0x419   : > { %3402 = vperm.xlu1 %4384, %v5729_v44  }
 0x41a   : > { %v6130_v43 = vpop.permute.xlu0 %2874 }
 0x41b   : > { %6719 = vst [vmem:[#allocation10_spill] sm:$0xff] %v6130_v43  ;;  %v6132_v47 = vpop.permute.xlu1 %2878 }
 0x41c   : > { %6720 = vst [vmem:[#allocation11_spill] sm:$0xff] %v6132_v47  ;;  %3414 = vperm.xlu0 %4385, %v5791_v19  }
 0x41d   : > { %3410 = vperm.xlu1 %4384, %v5751_v14  }
 0x41e   : > { %v6136_v3 = vpop.permute.xlu0 %2882 }
 0x41f   : > { %6721 = vst [vmem:[#allocation12_spill] sm:$0xff] %v6136_v3  ;;  %v6138_v38 = vpop.permute.xlu1 %2886 }
 0x420   : > { %6722 = vst [vmem:[#allocation13_spill] sm:$0xff] %v6138_v38  ;;  %3422 = vperm.xlu0 %4385, %v5816_v39  }
 0x421   : > { %3418 = vperm.xlu1 %4384, %v5776_v54  }
 0x422   : > { %v6142_v34 = vpop.permute.xlu0 %2890 }
 0x423   : > { %6723 = vst [vmem:[#allocation14_spill] sm:$0xff] %v6142_v34  ;;  %v6144_v32 = vpop.permute.xlu1 %2894 }
 0x424   : > { %6724 = vst [vmem:[#allocation15_spill] sm:$0xff] %v6144_v32  ;;  %3430 = vperm.xlu0 %4385, %v5841_v59  }
 0x425   : > { %3426 = vperm.xlu1 %4384, %v5809_v9  }
 0x426   : > { %v6148_v44 = vpop.permute.xlu0 %2898 }
 0x427   : > { %6725 = vst [vmem:[#allocation16_spill] sm:$0xff] %v6148_v44  ;;  %v6150_v19 = vpop.permute.xlu1 %2902 }
 0x428   : > { %6726 = vst [vmem:[#allocation17_spill] sm:$0xff] %v6150_v19  ;;  %3438 = vperm.xlu0 %4385, %v5866_v52  }
 0x429   : > { %3434 = vperm.xlu1 %4384, %v5833_v61  }
 0x42a   : > { %v6154_v14 = vpop.permute.xlu0 %2906 }
 0x42b   : > { %6727 = vst [vmem:[#allocation18_spill] sm:$0xff] %v6154_v14  ;;  %v6156_v39 = vpop.permute.xlu1 %2975 }
 0x42c   : > { %3446 = vperm.xlu0 %4385, %v5890_v4  }
 0x42d   : > { %3442 = vperm.xlu1 %4384, %v5855_v62  }
 0x42e   : > { %v2981_v54 = vpop.permute.xlu0 %2980 }
 0x42f   : > { %v6160_v59 = vpop.permute.xlu1 %2985 }
 0x431   : > { %3450 = vperm.xlu1 %4384, %v5879_v17  }
 0x432   : > { %v6163_v9 = vpop.permute.xlu0 %2990 }
 0x433   : > { %v6165_v41 = vpop.permute.xlu1 %2995 }
 0x436   : > { %v6167_v52 = vpop.permute.xlu0 %3000 }
 0x437   : > { %v6169_v61 = vpop.permute.xlu1 %3005 }
 0x43a   : > { %v6173_v35 = vpop.permute.xlu0 %3010 }
 0x43b   : > { %v6171_v8 = vpop.permute.xlu1 %3015 }
 0x43e   : > { %v6177_v62 = vpop.permute.xlu0 %3020 }
 0x43f   : > { %v6175_v4 = vpop.permute.xlu1 %3025 }
 0x442   : > { %v6181_v53 = vpop.permute.xlu0 %3030 }
 0x443   : > { %v6179_v33 = vpop.permute.xlu1 %3035 }
 0x446   : > { %v6185_v11 = vpop.permute.xlu0 %3040 }
 0x447   : > { %v6183_v17 = vpop.permute.xlu1 %3045 }
 0x44a   : > { %v6189_v36 = vpop.permute.xlu0 %3050 }
 0x44b   : > { %v6187_v12 = vpop.permute.xlu1 %3055 }
 0x44e   : > { %v6198_v49 = vpop.permute.xlu0 %3060 }
 0x44f   : > { %v6191_v55 = vpop.permute.xlu1 %3065 }
 0x452   : > { %v6204_v10 = vpop.permute.xlu0 %3070 }
 0x453   : > { %v6200_v57 = vpop.permute.xlu1 %3075 }
 0x457   : > { %v6207_v23 = vpop.permute.xlu1 %3085 }
 0x45c   : > { %v4316_v0 = vpop.f32.mrf.mxu0 }
 0x45d   : > { %v2686_v26 = vmul.f32 %v4316_v0, %v6196_v15 }
 0x45e   : > { %v2519_v1 = vpop.f32.mrf.mxu0 }
 0x45f   : > { %v2719_v46 = vmul.f32 1.442695, %v2686_v26  ;;  %v2685_v5 = vmul.f32 %v6196_v15, %v2519_v1  ;;  %v6211_v1 = vpop.permute.xlu0 %3080 }
 0x460   : > { %v4319_v31 = vpop.f32.mrf.mxu1 }
 0x461   : > { %4642 = vpow2.f32 %v2719_v46  ;;  %v2717_v22 = vmul.f32 1.442695, %v2685_v5  ;;  %v2688_v24 = vmul.f32 %v4319_v31, %v6196_v15  ;;  %v6214_v31 = vpop.permute.xlu1 %3095 }
 0x462   : > { %v2529_v13 = vpop.f32.mrf.mxu1 }
 0x463   : > { %4644 = vpow2.f32 %v2717_v22  ;;  %v2723_v19 = vmul.f32 1.442695, %v2688_v24  ;;  %v2687_v14 = vmul.f32 %v6196_v15, %v2529_v13 }
 0x464   : > { %v4322_v32 = vpop.f32.mrf.mxu1 }
 0x465   : > { %4646 = vpow2.f32 %v2723_v19  ;;  %v2721_v0 = vmul.f32 1.442695, %v2687_v14  ;;  %v2690_v26 = vmul.f32 %v4322_v32, %v6196_v15  ;;  %v6218_v32 = vpop.permute.xlu0 %3090 }
 0x466   : > { %v2539_v44 = vpop.f32.mrf.mxu1 }
 0x467   : > { %4648 = vpow2.f32 %v2721_v0  ;;  %v2727_v46 = vmul.f32 1.442695, %v2690_v26  ;;  %v2689_v5 = vmul.f32 %v6196_v15, %v2539_v44  ;;  %v6223_v26 = vpop.permute.xlu1 %3105 }
 0x468   : > { %v4325_v38 = vpop.f32.mrf.mxu1 }
 0x469   : > { %4650 = vpow2.f32 %v2727_v46  ;;  %v2725_v22 = vmul.f32 1.442695, %v2689_v5  ;;  %v2692_v24 = vmul.f32 %v4325_v38, %v6196_v15 }
 0x46a   : > { %v2549_v13 = vpop.f32.mrf.mxu1 }
 0x46b   : > { %4652 = vpow2.f32 %v2725_v22  ;;  %v2731_v19 = vmul.f32 1.442695, %v2692_v24  ;;  %v2691_v14 = vmul.f32 %v6196_v15, %v2549_v13 }
 0x46c   : > { %v4328_v34 = vpop.f32.mrf.mxu1 }
 0x46d   : > { %4654 = vpow2.f32 %v2731_v19  ;;  %v2729_v0 = vmul.f32 1.442695, %v2691_v14  ;;  %v2694_v44 = vmul.f32 %v4328_v34, %v6196_v15 }
 0x46e   : > { %v6220_v47 = vpop.eup %4642  ;;  %v2559_v46 = vpop.f32.mrf.mxu1 }
 0x46f   : > { %v3134_v5 = vmul.f32 %v6220_v47, %v2981_v54  ;;  %4656 = vpow2.f32 %v2729_v0  ;;  %v2735_v22 = vmul.f32 1.442695, %v2694_v44  ;;  %v2693_v24 = vmul.f32 %v6196_v15, %v2559_v46  ;;  %v6235_v54 = vpop.permute.xlu0 %3100 }
 0x470   : > { %v6226_v38 = vpop.eup %4644  ;;  %v4331_v13 = vpop.f32.mrf.mxu1 }
 0x471   : > { %3199 = vrot.lane.b32.xlu0 %v3134_v5, %s4718_s22  ;;  %v3133_v19 = vmul.f32 %v6226_v38, %v6156_v39  ;;  %4658 = vpow2.f32 %v2735_v22  ;;  %v2733_v34 = vmul.f32 1.442695, %v2693_v24  ;;  %v2696_v14 = vmul.f32 %v4331_v13, %v6196_v15  ;;  %v6243_v39 = vpop.permute.xlu1 %3115 }
 0x472   : > { %v6233_v3 = vpop.eup %4646  ;;  %v2569_v2 = vpop.f32.mrf.mxu1 }
 0x473   : > { %3197 = vrot.lane.b32.xlu1 %v3133_v19, %s4718_s22  ;;  %4660 = vpow2.f32 %v2733_v34  ;;  %v2739_v0 = vmul.f32 1.442695, %v2696_v14  ;;  %v2695_v44 = vmul.f32 %v6196_v15, %v2569_v2  ;;  %v3136_v46 = vmul.f32 %v6233_v3, %v6163_v9 }
 0x474   : > { %v6241_v5 = vpop.eup %4648  ;;  %v4334_v22 = vpop.f32.mrf.mxu1 }
 0x475   : > { %4662 = vpow2.f32 %v2739_v0  ;;  %v2737_v24 = vmul.f32 1.442695, %v2695_v44  ;;  %v2698_v13 = vmul.f32 %v4334_v22, %v6196_v15  ;;  %3203 = vrot.lane.b32.xlu0 %v3136_v46, %s4718_s22  ;;  %v3135_v19 = vmul.f32 %v6241_v5, %v6160_v59  ;;  %v6257_v22 = vpop.permute.xlu0 %3110 }
 0x476   : > { %v6249_v34 = vpop.eup %4650  ;;  %v2579_v2 = vpop.f32.mrf.mxu1 }
 0x477   : > { %4664 = vpow2.f32 %v2737_v24  ;;  %v2743_v14 = vmul.f32 1.442695, %v2698_v13  ;;  %v2697_v9 = vmul.f32 %v6196_v15, %v2579_v2  ;;  %3201 = vrot.lane.b32.xlu1 %v3135_v19, %s4718_s22  ;;  %v3138_v0 = vmul.f32 %v6249_v34, %v6167_v52  ;;  %v6265_v19 = vpop.permute.xlu1 %3125 }
 0x478   : > { %v6255_v44 = vpop.eup %4652  ;;  %v4337_v46 = vpop.f32.mrf.mxu1 }
 0x479   : > { %4666 = vpow2.f32 %v2743_v14  ;;  %v2741_v43 = vmul.f32 1.442695, %v2697_v9  ;;  %v2700_v59 = vmul.f32 %v4337_v46, %v6196_v15  ;;  %3207 = vrot.lane.b32.xlu0 %v3138_v0, %s4718_s22  ;;  %v3137_v24 = vmul.f32 %v6255_v44, %v6165_v41 }
 0x47a   : > { %v6263_v13 = vpop.eup %4654  ;;  %v2589_v2 = vpop.f32.mrf.mxu1 }
 0x47b   : > { %4668 = vpow2.f32 %v2741_v43  ;;  %v2747_v52 = vmul.f32 1.442695, %v2700_v59  ;;  %v2699_v37 = vmul.f32 %v6196_v15, %v2589_v2  ;;  %3205 = vrot.lane.b32.xlu1 %v3137_v24, %s4718_s22  ;;  %v3140_v14 = vmul.f32 %v6263_v13, %v6173_v35  ;;  %v6279_v2 = vpop.permute.xlu0 %3120 }
 0x47c   : > { %v6271_v9 = vpop.eup %4656  ;;  %v4340_v0 = vpop.f32.mrf.mxu1 }
 0x47d   : > { %4670 = vpow2.f32 %v2747_v52  ;;  %v2745_v46 = vmul.f32 1.442695, %v2699_v37  ;;  %v2702_v41 = vmul.f32 %v4340_v0, %v6196_v15  ;;  %3211 = vrot.lane.b32.xlu0 %v3140_v14, %s4718_s22  ;;  %v3139_v43 = vmul.f32 %v6271_v9, %v6169_v61  ;;  %v6287_v14 = vpop.permute.xlu1 %3326 }
 0x47e   : > { %v6277_v59 = vpop.eup %4658  ;;  %v2599_v24 = vpop.f32.mrf.mxu1 }
 0x47f   : > { %4672 = vpow2.f32 %v2745_v46  ;;  %v2751_v63 = vmul.f32 1.442695, %v2702_v41  ;;  %v2701_v35 = vmul.f32 %v6196_v15, %v2599_v24  ;;  %3209 = vrot.lane.b32.xlu1 %v3139_v43, %s4718_s22  ;;  %v3142_v37 = vmul.f32 %v6277_v59, %v6177_v62 }
 0x480   : > { %v6285_v52 = vpop.eup %4660  ;;  %v4343_v0 = vpop.f32.mrf.mxu1 }
 0x481   : > { %4674 = vpow2.f32 %v2751_v63  ;;  %v2749_v61 = vmul.f32 1.442695, %v2701_v35  ;;  %v2704_v48 = vmul.f32 %v4343_v0, %v6196_v15  ;;  %3215 = vrot.lane.b32.xlu0 %v3142_v37, %s4718_s22  ;;  %v3141_v46 = vmul.f32 %v6285_v52, %v6171_v8  ;;  %v6301_v0 = vpop.permute.xlu0 %3130 }
 0x482   : > { %v6293_v41 = vpop.eup %4662  ;;  %v2609_v43 = vpop.f32.mrf.mxu1 }
 0x483   : > { %4676 = vpow2.f32 %v2749_v61  ;;  %v2755_v24 = vmul.f32 1.442695, %v2704_v48  ;;  %v2703_v62 = vmul.f32 %v6196_v15, %v2609_v43  ;;  %3213 = vrot.lane.b32.xlu1 %v3141_v46, %s4718_s22  ;;  %v3144_v63 = vmul.f32 %v6293_v41, %v6181_v53  ;;  %v6308_v48 = vpop.permute.xlu1 %3334 }
 0x484   : > { %v6299_v35 = vpop.eup %4664 }
 0x485   : > { %4678 = vpow2.f32 %v2755_v24  ;;  %v2753_v37 = vmul.f32 1.442695, %v2703_v62  ;;  %3219 = vrot.lane.b32.xlu0 %v3144_v63, %s4718_s22  ;;  %v3143_v8 = vmul.f32 %v6299_v35, %v6175_v4  ;;  %v6321_v63 = vpop.permute.xlu0 %3330 }
 0x486   : > { %v6306_v61 = vpop.eup %4666 }
 0x487   : > { %4680 = vpow2.f32 %v2753_v37  ;;  %3217 = vrot.lane.b32.xlu1 %v3143_v8, %s4718_s22  ;;  %v3146_v53 = vmul.f32 %v6306_v61, %v6185_v11 }
 0x488   : > { %v6313_v46 = vpop.eup %4668  ;;  %v4346_v43 = vpop.f32.mrf.mxu1 }
 0x489   : > { %v2706_v24 = vmul.f32 %v4346_v43, %v6196_v15  ;;  %3223 = vrot.lane.b32.xlu0 %v3146_v53, %s4718_s22  ;;  %v3145_v4 = vmul.f32 %v6313_v46, %v6179_v33  ;;  %v6329_v43 = vpop.permute.xlu1 %3338 }
 0x48a   : > { %v6319_v62 = vpop.eup %4670  ;;  %v2619_v37 = vpop.f32.mrf.mxu1 }
 0x48b   : > { %v2759_v30 = vmul.f32 1.442695, %v2706_v24  ;;  %v2705_v8 = vmul.f32 %v6196_v15, %v2619_v37  ;;  %3221 = vrot.lane.b32.xlu1 %v3145_v4, %s4718_s22  ;;  %v3148_v11 = vmul.f32 %v6319_v62, %v6189_v36 }
 0x48c   : > { %v6327_v20 = vpop.eup %4672 }
 0x48d   : > { %6728 = vst [vmem:[#allocation19_spill] sm:$0xff] %v6327_v20  ;;  %4682 = vpow2.f32 %v2759_v30  ;;  %v2757_v53 = vmul.f32 1.442695, %v2705_v8  ;;  %3227 = vrot.lane.b32.xlu0 %v3148_v11, %s4718_s22  ;;  %v3147_v28 = vmul.f32 %v6327_v20, %v6183_v17  ;;  %v6342_v30 = vpop.permute.xlu0 %3342 }
 0x48e   : > { %v4349_v33 = vpop.f32.mrf.mxu1  ;;  %v6334_v24 = vpop.eup %4674 }
 0x48f   : > { %6729 = vst [vmem:[#allocation20_spill] sm:$0xff] %v6334_v24  ;;  %v2708_v37 = vmul.f32 %v4349_v33, %v6196_v15  ;;  %4684 = vpow2.f32 %v2757_v53  ;;  %3225 = vrot.lane.b32.xlu1 %v3147_v28, %s4718_s22  ;;  %v3150_v36 = vmul.f32 %v6334_v24, %v6198_v49  ;;  %v6350_v53 = vpop.permute.xlu1 %3346 }
 0x490   : > { %v2629_v4 = vpop.f32.mrf.mxu1  ;;  %v6340_v42 = vpop.eup %4676 }
 0x491   : > { %6730 = vst [vmem:[#allocation21_spill] sm:$0xff] %v6340_v42  ;;  %v2763_v8 = vmul.f32 1.442695, %v2708_v37  ;;  %v2707_v11 = vmul.f32 %v6196_v15, %v2629_v4  ;;  %3231 = vrot.lane.b32.xlu0 %v3150_v36, %s4718_s22  ;;  %v3149_v17 = vmul.f32 %v6340_v42, %v6187_v12 }
 0x492   : > { %v6348_v33 = vpop.eup %4678  ;;  %v4352_v20 = vpop.f32.mrf.mxu1 }
 0x493   : > { %6731 = vst [vmem:[#allocation22_spill] sm:$0xff] %v6348_v33  ;;  %4686 = vpow2.f32 %v2763_v8  ;;  %v2761_v28 = vmul.f32 1.442695, %v2707_v11  ;;  %v2710_v49 = vmul.f32 %v4352_v20, %v6196_v15  ;;  %3229 = vrot.lane.b32.xlu1 %v3149_v17, %s4718_s22  ;;  %v3152_v37 = vmul.f32 %v6348_v33, %v6204_v10  ;;  %v6362_v11 = vpop.permute.xlu0 %3350  ;;  %v6365_v10 = vpop.permute.xlu1 %3354 }
 0x494   : > { %v6356_v4 = vpop.eup %4680  ;;  %v2639_v36 = vpop.f32.mrf.mxu1 }
 0x495   : > { %6732 = vst [vmem:[#allocation23_spill] sm:$0xff] %v6356_v4  ;;  %4688 = vpow2.f32 %v2761_v28  ;;  %v2767_v24 = vmul.f32 1.442695, %v2710_v49  ;;  %v2709_v12 = vmul.f32 %v6196_v15, %v2639_v36  ;;  %3235 = vrot.lane.b32.xlu0 %v3152_v37, %s4718_s22  ;;  %v3151_v8 = vmul.f32 %v6356_v4, %v6191_v55 }
 0x497   : > { %4690 = vpow2.f32 %v2767_v24  ;;  %v2765_v20 = vmul.f32 1.442695, %v2709_v12  ;;  %v4355_v17 = vpop.f32.mrf.mxu1  ;;  %3233 = vrot.lane.b32.xlu1 %v3151_v8, %s4718_s22  ;;  %v6375_v24 = vpop.permute.xlu0 %3358 }
 0x498   : > { %v2712_v28 = vmul.f32 %v4355_v17, %v6196_v15  ;;  %v6381_v17 = vpop.permute.xlu1 %3362 }
 0x499   : > { %4692 = vpow2.f32 %v2765_v20  ;;  %v2649_v49 = vpop.f32.mrf.mxu1 }
 0x49a   : > { %v6368_v33 = vpop.eup %4682  ;;  %v2771_v36 = vmul.f32 1.442695, %v2712_v28  ;;  %v2711_v37 = vmul.f32 %v6196_v15, %v2649_v49 }
 0x49b   : > { %6733 = vst [vmem:[#allocation24_spill] sm:$0xff] %v6368_v33  ;;  %v3154_v55 = vmul.f32 %v6368_v33, %v6211_v1 }
 0x49c   : > { %v6373_v4 = vpop.eup %4684  ;;  %4694 = vpow2.f32 %v2771_v36  ;;  %v2769_v12 = vmul.f32 1.442695, %v2711_v37 }
 0x49d   : > { %v4358_v8 = vpop.f32.mrf.mxu1  ;;  %3239 = vrot.lane.b32.xlu0 %v3154_v55, %s4718_s22  ;;  %v3153_v20 = vmul.f32 %v6373_v4, %v6200_v57 }
 0x49e   : > { %v2714_v42 = vmul.f32 %v4358_v8, %v6196_v15  ;;  %4696 = vpow2.f32 %v2769_v12  ;;  %v6391_v8 = vpop.permute.xlu0 %3366 }
 0x49f   : > { %v2659_v28 = vpop.f32.mrf.mxu1  ;;  %3237 = vrot.lane.b32.xlu1 %v3153_v20, %s4718_s22 }
 0x4a0   : > { %v6383_v49 = vpop.eup %4686  ;;  %v2775_v1 = vmul.f32 1.442695, %v2714_v42  ;;  %v2713_v33 = vmul.f32 %v6196_v15, %v2659_v28  ;;  %v6398_v28 = vpop.permute.xlu1 %3370 }
 0x4a1   : > { %6734 = vst [vmem:[#allocation25_spill] sm:$0xff] %v6383_v49  ;;  %v3156_v36 = vmul.f32 %v6383_v49, %v6218_v32 }
 0x4a2   : > { %v6389_v37 = vpop.eup %4688  ;;  %4698 = vpow2.f32 %v2775_v1  ;;  %v2773_v55 = vmul.f32 1.442695, %v2713_v33 }
 0x4a3   : > { %6735 = vst [vmem:[#allocation26_spill] sm:$0xff] %v6389_v37  ;;  %3243 = vrot.lane.b32.xlu0 %v3156_v36, %s4718_s22  ;;  %v3155_v57 = vmul.f32 %v6389_v37, %v6207_v23  ;;  %v4361_v42 = vpop.f32.mrf.mxu1 }
 0x4a4   : > { %4700 = vpow2.f32 %v2773_v55  ;;  %v6396_v12 = vpop.eup %4690  ;;  %v2716_v20 = vmul.f32 %v4361_v42, %v6196_v15  ;;  %v6410_v55 = vpop.permute.xlu0 %3374 }
 0x4a5   : > { %6736 = vst [vmem:[#allocation27_spill] sm:$0xff] %v6396_v12  ;;  %3241 = vrot.lane.b32.xlu1 %v3155_v57, %s4718_s22  ;;  %v2669_v32 = vpop.f32.mrf.mxu1  ;;  %v3158_v33 = vmul.f32 %v6396_v12, %v6235_v54  ;;  %v6415_v57 = vpop.permute.xlu1 %3378 }
 0x4a6   : > { %v6404_v1 = vpop.eup %4692  ;;  %v2779_v36 = vmul.f32 1.442695, %v2716_v20  ;;  %v2715_v49 = vmul.f32 %v6196_v15, %v2669_v32 }
 0x4a7   : > { %6737 = vst [vmem:[#allocation28_spill] sm:$0xff] %v6404_v1  ;;  %3247 = vrot.lane.b32.xlu0 %v3158_v33, %s4718_s22  ;;  %v3157_v23 = vmul.f32 %v6404_v1, %v6214_v31 }
 0x4a8   : > { %4702 = vpow2.f32 %v2779_v36  ;;  %v2777_v42 = vmul.f32 1.442695, %v2715_v49  ;;  %v6426_v49 = vpop.permute.xlu0 %3382 }
 0x4a9   : > { %v6412_v37 = vpop.eup %4694  ;;  %3245 = vrot.lane.b32.xlu1 %v3157_v23, %s4718_s22  ;;  %v6433_v36 = vpop.permute.xlu1 %3386 }
 0x4aa   : > { %6738 = vst [vmem:[#allocation29_spill] sm:$0xff] %v6412_v37  ;;  %4704 = vpow2.f32 %v2777_v42  ;;  %v3160_v54 = vmul.f32 %v6412_v37, %v6257_v22 }
 0x4ab   : > { %v6419_v15 = vpop.eup %4696 }
 0x4ac   : > { %6739 = vst [vmem:[#allocation30_spill] sm:$0xff] %v6419_v15  ;;  %3251 = vrot.lane.b32.xlu0 %v3160_v54, %s4718_s22  ;;  %v3159_v31 = vmul.f32 %v6419_v15, %v6223_v26  ;;  %v6439_v26 = vpop.permute.xlu0 %3390 }
 0x4ad   : > { %v6443_v42 = vpop.permute.xlu1 %3394 }
 0x4ae   : > { %3249 = vrot.lane.b32.xlu1 %v3159_v31, %s4718_s22 }
 0x4af   : > { %v6424_v20 = vpop.eup %4698 }
 0x4b0   : > { %6740 = vst [vmem:[#allocation31_spill] sm:$0xff] %v6424_v20  ;;  %v3162_v32 = vmul.f32 %v6424_v20, %v6279_v2 }
 0x4b1   : > { %v6431_v33 = vpop.eup %4700 }
 0x4b2   : > { %6741 = vst [vmem:[#allocation32_spill] sm:$0xff] %v6431_v33  ;;  %3255 = vrot.lane.b32.xlu0 %v3162_v32, %s4718_s22  ;;  %v3161_v22 = vmul.f32 %v6431_v33, %v6243_v39  ;;  %v6452_v32 = vpop.permute.xlu0 %3398  ;;  %v6455_v39 = vpop.permute.xlu1 %3402 }
 0x4b4   : > { %3253 = vrot.lane.b32.xlu1 %v3161_v22, %s4718_s22 }
 0x4b5   : > { %v6441_v23 = vpop.eup %4702 }
 0x4b6   : > { %6742 = vst [vmem:[#allocation33_spill] sm:$0xff] %v6441_v23  ;;  %v3164_v2 = vmul.f32 %v6441_v23, %v6301_v0  ;;  %v6457_v22 = vpop.permute.xlu0 %3406  ;;  %v6459_v33 = vpop.permute.xlu1 %3410 }
 0x4b7   : > { %v6447_v54 = vpop.eup %4704  ;;  %6744 = vst [vmem:[#allocation35_spill] sm:$0xff] %v6457_v22 }
 0x4b8   : > { %6743 = vst [vmem:[#allocation34_spill] sm:$0xff] %v6447_v54  ;;  %3259 = vrot.lane.b32.xlu0 %v3164_v2, %s4718_s22  ;;  %v3163_v31 = vmul.f32 %v6447_v54, %v6265_v19 }
 0x4ba   : > { %3257 = vrot.lane.b32.xlu1 %v3163_v31, %s4718_s22  ;;  %v6461_v20 = vpop.permute.xlu0 %3414  ;;  %v6463_v0 = vpop.permute.xlu1 %3418 }
 0x4bb   : > { %6745 = vst [vmem:[#allocation36_spill] sm:$0xff] %v6461_v20  ;;  %6746 = vst [vmem:[#allocation37_spill] sm:$0xff] %v6463_v0  ;;  %v2910_v20 = vmul.f32 %v6220_v47, %v6062_v50  ;;  %v2911_v50 = vmul.f32 %v6241_v5, %v6067_v40  ;;  %v2913_v40 = vmul.f32 %v6255_v44, %v6072_v56 }
 0x4bc   : > { %v2915_v56 = vmul.f32 %v6271_v9, %v6078_v29  ;;  %v2917_v29 = vmul.f32 %v6285_v52, %v6084_v6  ;;  %v2919_v6 = vmul.f32 %v6299_v35, %v6090_v58  ;;  %v2921_v58 = vmul.f32 %v6313_v46, %v6096_v25 }
 0x4be   : > { %v6465_v23 = vpop.permute.xlu0 %3422  ;;  %v6467_v2 = vpop.permute.xlu1 %3426 }
 0x4bf   : > { %6747 = vst [vmem:[#allocation38_spill] sm:$0xff] %v6465_v23  ;;  %6748 = vst [vmem:[#allocation39_spill] sm:$0xff] %v6467_v2  ;;  %v2909_v23 = vmul.f32 %v6226_v38, %v6065_v7 }
 0x4c2   : > { %v6469_v15 = vpop.permute.xlu0 %3430  ;;  %v6471_v19 = vpop.permute.xlu1 %3434 }
 0x4c3   : > { %6749 = vst [vmem:[#allocation40_spill] sm:$0xff] %v6469_v15  ;;  %6750 = vst [vmem:[#allocation41_spill] sm:$0xff] %v6471_v19 }
 0x4c6   : > { %v6473_v54 = vpop.permute.xlu0 %3438  ;;  %v6475_v31 = vpop.permute.xlu1 %3442 }
 0x4c7   : > { %6751 = vst [vmem:[#allocation42_spill] sm:$0xff] %v6473_v54  ;;  %6752 = vst [vmem:[#allocation43_spill] sm:$0xff] %v6475_v31  ;;  %v2912_v54 = vmul.f32 %v6233_v3, %v6070_v45 }
 0x4ca   : > { %v6477_v37 = vpop.permute.xlu0 %3446  ;;  %v6479_v1 = vpop.permute.xlu1 %3450 }
 0x4cb   : > { %6753 = vst [vmem:[#allocation44_spill] sm:$0xff] %v6477_v37  ;;  %6754 = vst [vmem:[#allocation45_spill] sm:$0xff] %v6479_v1 }
 0x4e3   : > { %v3200_v12 = vpop.permute.xlu0 %3199 }
 0x4e4   : > { %v3294_v0 = vadd.f32 %v3200_v12, %v2910_v20 }
 0x4e5   : > { %v3198_v2 = vpop.permute.xlu1 %3197 }
 0x4e6   : > { %v3454_v15 = vmul.f32 %v6321_v63, %v3294_v0  ;;  %v3293_v19 = vadd.f32 %v3198_v2, %v2909_v23  ;;  %v2914_v63 = vmul.f32 %v6249_v34, %v6076_v21  ;;  %v2916_v21 = vmul.f32 %v6263_v13, %v6082_v51 }
 0x4e7   : > { %v3204_v22 = vpop.permute.xlu0 %3203  ;;  %v2918_v51 = vmul.f32 %v6277_v59, %v6088_v60  ;;  %v2920_v60 = vmul.f32 %v6293_v41, %v6094_v27  ;;  %v2922_v27 = vmul.f32 %v6306_v61, %v6100_v18  ;;  %v2924_v18 = vmul.f32 %v6319_v62, %v6106_v16 }
 0x4e8   : > { %v3486_v31 = vmin.f32 %v3454_v15, 1.0  ;;  %v3453_v37 = vmul.f32 %v6287_v14, %v3293_v19  ;;  %v3296_v1 = vadd.f32 %v3204_v22, %v2912_v54 }
 0x4e9   : > { %v3202_v12 = vpop.permute.xlu1 %3201 }
 0x4ea   : > { %v3485_v47 = vmin.f32 %v3453_v37, 1.0  ;;  %3551 = vrot.lane.b32.xlu1 %v3486_v31, %s4719_s23  ;;  %v3456_v7 = vmul.f32 %v6329_v43, %v3296_v1  ;;  %v3295_v38 = vadd.f32 %v3202_v12, %v2911_v50 }
 0x4eb   : > { %v3208_v45 = vpop.permute.xlu0 %3207 }
 0x4ec   : > { %3549 = vrot.lane.b32.xlu0 %v3485_v47, %s4719_s23  ;;  %v3488_v3 = vmin.f32 %v3456_v7, 1.0  ;;  %v3455_v14 = vmul.f32 %v6308_v48, %v3295_v38  ;;  %v3298_v15 = vadd.f32 %v3208_v45, %v2914_v63 }
 0x4ed   : > { %v3206_v5 = vpop.permute.xlu1 %3205 }
 0x4ee   : > { %v3487_v37 = vmin.f32 %v3455_v14, 1.0  ;;  %v3458_v20 = vmul.f32 %v6350_v53, %v3298_v15  ;;  %v3297_v23 = vadd.f32 %v3206_v5, %v2913_v40  ;;  %3555 = vrot.lane.b32.xlu1 %v3488_v3, %s4719_s23  ;;  %v6755_v40 = vld [vmem:[#allocation2_spill] sm:$0xff]  ;;  %v6756_v5 = vld [vmem:[#allocation19_spill] sm:$0xff] }
 0x4ef   : > { %v3212_v34 = vpop.permute.xlu0 %3211  ;;  %v2923_v25 = vmul.f32 %v6756_v5, %v6755_v40  ;;  %v6775_v5 = vld [vmem:[#allocation27_spill] sm:$0xff] }
 0x4f0   : > { %v3490_v43 = vmin.f32 %v3458_v20, 1.0  ;;  %v3457_v1 = vmul.f32 %v6342_v30, %v3297_v23  ;;  %v3300_v54 = vadd.f32 %v3212_v34, %v2916_v21  ;;  %3553 = vrot.lane.b32.xlu0 %v3487_v37, %s4719_s23  ;;  %v6757_v23 = vld [vmem:[#allocation4_spill] sm:$0xff] }
 0x4f1   : > { %v3210_v44 = vpop.permute.xlu1 %3209  ;;  %v6758_v21 = vld [vmem:[#allocation20_spill] sm:$0xff] }
 0x4f2   : > { %v3489_v48 = vmin.f32 %v3457_v1, 1.0  ;;  %v3460_v53 = vmul.f32 %v6365_v10, %v3300_v54  ;;  %v3299_v22 = vadd.f32 %v3210_v44, %v2915_v56  ;;  %3559 = vrot.lane.b32.xlu1 %v3490_v43, %s4719_s23  ;;  %v2926_v16 = vmul.f32 %v6758_v21, %v6757_v23  ;;  %v6759_v1 = vld [vmem:[#allocation3_spill] sm:$0xff]  ;;  %v6760_v54 = vld [vmem:[#allocation21_spill] sm:$0xff] }
 0x4f3   : > { %v3216_v13 = vpop.permute.xlu0 %3215  ;;  %v2925_v56 = vmul.f32 %v6760_v54, %v6759_v1  ;;  %v6777_v21 = vld [vmem:[#allocation11_spill] sm:$0xff] }
 0x4f4   : > { %v3492_v0 = vmin.f32 %v3460_v53, 1.0  ;;  %v3459_v30 = vmul.f32 %v6362_v11, %v3299_v22  ;;  %v3302_v2 = vadd.f32 %v3216_v13, %v2918_v51  ;;  %3557 = vrot.lane.b32.xlu0 %v3489_v48, %s4719_s23  ;;  %v6761_v22 = vld [vmem:[#allocation6_spill] sm:$0xff] }
 0x4f5   : > { %v3214_v9 = vpop.permute.xlu1 %3213  ;;  %v6762_v51 = vld [vmem:[#allocation22_spill] sm:$0xff] }
 0x4f6   : > { %v3491_v19 = vmin.f32 %v3459_v30, 1.0  ;;  %v3462_v10 = vmul.f32 %v6381_v17, %v3302_v2  ;;  %v3301_v31 = vadd.f32 %v3214_v9, %v2917_v29  ;;  %3563 = vrot.lane.b32.xlu1 %v3492_v0, %s4719_s23  ;;  %v2928_v13 = vmul.f32 %v6762_v51, %v6761_v22  ;;  %v6763_v29 = vld [vmem:[#allocation5_spill] sm:$0xff]  ;;  %v6764_v9 = vld [vmem:[#allocation23_spill] sm:$0xff] }
 0x4f7   : > { %v3220_v59 = vpop.permute.xlu0 %3219 }
 0x4f8   : > { %v3494_v50 = vmin.f32 %v3462_v10, 1.0  ;;  %v3461_v11 = vmul.f32 %v6375_v24, %v3301_v31  ;;  %v3304_v47 = vadd.f32 %v3220_v59, %v2920_v60  ;;  %3561 = vrot.lane.b32.xlu0 %v3491_v19, %s4719_s23  ;;  %v2927_v19 = vmul.f32 %v6764_v9, %v6763_v29  ;;  %v6785_v9 = vld [vmem:[#allocation41_spill] sm:$0xff] }
 0x4f9   : > { %v3218_v52 = vpop.permute.xlu1 %3217 }
 0x4fa   : > { %v3493_v12 = vmin.f32 %v3461_v11, 1.0  ;;  %v3464_v17 = vmul.f32 %v6398_v28, %v3304_v47  ;;  %v3303_v7 = vadd.f32 %v3218_v52, %v2919_v6  ;;  %3567 = vrot.lane.b32.xlu1 %v3494_v50, %s4719_s23  ;;  %v6766_v47 = vld [vmem:[#allocation24_spill] sm:$0xff] }
 0x4fb   : > { %v3224_v41 = vpop.permute.xlu0 %3223 }
 0x4fc   : > { %v3496_v38 = vmin.f32 %v3464_v17, 1.0  ;;  %v3463_v24 = vmul.f32 %v6391_v8, %v3303_v7  ;;  %v3306_v63 = vadd.f32 %v3224_v41, %v2922_v27  ;;  %3565 = vrot.lane.b32.xlu0 %v3493_v12, %s4719_s23  ;;  %v6767_v17 = vld [vmem:[#allocation7_spill] sm:$0xff] }
 0x4fd   : > { %v3222_v35 = vpop.permute.xlu1 %3221  ;;  %v2929_v7 = vmul.f32 %v6373_v4, %v6767_v17  ;;  %v6773_v4 = vld [vmem:[#allocation37_spill] sm:$0xff] }
 0x4fe   : > { %v3495_v45 = vmin.f32 %v3463_v24, 1.0  ;;  %v3466_v28 = vmul.f32 %v6415_v57, %v3306_v63  ;;  %v3305_v3 = vadd.f32 %v3222_v35, %v2921_v58  ;;  %3571 = vrot.lane.b32.xlu1 %v3496_v38, %s4719_s23  ;;  %v6769_v38 = vld [vmem:[#allocation25_spill] sm:$0xff]  ;;  %v6770_v58 = vld [vmem:[#allocation35_spill] sm:$0xff] }
 0x4ff   : > { %v3228_v61 = vpop.permute.xlu0 %3227 }
 0x500   : > { %v3498_v14 = vmin.f32 %v3466_v28, 1.0  ;;  %v3465_v8 = vmul.f32 %v6410_v55, %v3305_v3  ;;  %v3308_v15 = vadd.f32 %v3228_v61, %v2924_v18  ;;  %3569 = vrot.lane.b32.xlu0 %v3495_v45, %s4719_s23  ;;  %v6771_v3 = vld [vmem:[#allocation9_spill] sm:$0xff]  ;;  %v6772_v18 = vld [vmem:[#allocation26_spill] sm:$0xff] }
 0x501   : > { %v3226_v46 = vpop.permute.xlu1 %3225  ;;  %v2931_v61 = vmul.f32 %v6772_v18, %v6771_v3  ;;  %v6795_v18 = vld [vmem:[#allocation17_spill] sm:$0xff] }
 0x502   : > { %v3497_v37 = vmin.f32 %v3465_v8, 1.0  ;;  %v3468_v57 = vmul.f32 %v6433_v36, %v3308_v15  ;;  %v3307_v20 = vadd.f32 %v3226_v46, %v2923_v25  ;;  %3575 = vrot.lane.b32.xlu1 %v3498_v14, %s4719_s23 }
 0x503   : > { %v3232_v62 = vpop.permute.xlu0 %3231 }
 0x504   : > { %v3500_v34 = vmin.f32 %v3468_v57, 1.0  ;;  %v3467_v55 = vmul.f32 %v6426_v49, %v3307_v20  ;;  %v3310_v43 = vadd.f32 %v3232_v62, %v2926_v16  ;;  %3573 = vrot.lane.b32.xlu0 %v3497_v37, %s4719_s23  ;;  %v6776_v37 = vld [vmem:[#allocation36_spill] sm:$0xff] }
 0x505   : > { %v3230_v44 = vpop.permute.xlu1 %3229  ;;  %v6778_v16 = vld [vmem:[#allocation28_spill] sm:$0xff] }
 0x506   : > { %v3499_v48 = vmin.f32 %v3467_v55, 1.0  ;;  %v3470_v36 = vmul.f32 %v6443_v42, %v3310_v43  ;;  %v3309_v53 = vadd.f32 %v3230_v44, %v2925_v56  ;;  %3579 = vrot.lane.b32.xlu1 %v3500_v34, %s4719_s23  ;;  %v2933_v62 = vmul.f32 %v6778_v16, %v6777_v21  ;;  %v6779_v43 = vld [vmem:[#allocation39_spill] sm:$0xff]  ;;  %v6780_v56 = vld [vmem:[#allocation14_spill] sm:$0xff]  ;;  %v6781_v44 = vld [vmem:[#allocation29_spill] sm:$0xff] }
 0x507   : > { %v3236_v0 = vpop.permute.xlu0 %3235 }
 0x508   : > { %v3502_v30 = vmin.f32 %v3470_v36, 1.0  ;;  %v3469_v49 = vmul.f32 %v6439_v26, %v3309_v53  ;;  %v3312_v2 = vadd.f32 %v3236_v0, %v2928_v13  ;;  %3577 = vrot.lane.b32.xlu0 %v3499_v48, %s4719_s23  ;;  %v6765_v26 = vld [vmem:[#allocation8_spill] sm:$0xff]  ;;  %v2936_v48 = vmul.f32 %v6781_v44, %v6780_v56  ;;  %v6782_v53 = vld [vmem:[#allocation38_spill] sm:$0xff]  ;;  %v6783_v0 = vld [vmem:[#allocation13_spill] sm:$0xff] }
 0x509   : > { %v3234_v10 = vpop.permute.xlu1 %3233  ;;  %v2930_v6 = vmul.f32 %v6766_v47, %v6765_v26 }
 0x50a   : > { %v3501_v31 = vmin.f32 %v3469_v49, 1.0  ;;  %v3472_v42 = vmul.f32 %v6455_v39, %v3312_v2  ;;  %v3311_v60 = vadd.f32 %v3234_v10, %v2927_v19  ;;  %3583 = vrot.lane.b32.xlu1 %v3502_v30, %s4719_s23  ;;  %v6784_v30 = vld [vmem:[#allocation30_spill] sm:$0xff] }
 0x50b   : > { %v2935_v49 = vmul.f32 %v6784_v30, %v6783_v0 }
 0x50c   : > { %v3504_v59 = vmin.f32 %v3472_v42, 1.0  ;;  %v3471_v50 = vmul.f32 %v6452_v32, %v3311_v60  ;;  %3581 = vrot.lane.b32.xlu0 %v3501_v31, %s4719_s23  ;;  %v6768_v32 = vld [vmem:[#allocation10_spill] sm:$0xff]  ;;  %v6786_v31 = vld [vmem:[#allocation16_spill] sm:$0xff]  ;;  %v6787_v42 = vld [vmem:[#allocation31_spill] sm:$0xff] }
 0x50d   : > { %v2932_v24 = vmul.f32 %v6769_v38, %v6768_v32  ;;  %v2938_v60 = vmul.f32 %v6787_v42, %v6786_v31  ;;  %v6792_v38 = vld [vmem:[#allocation42_spill] sm:$0xff] }
 0x50e   : > { %v3503_v11 = vmin.f32 %v3471_v50, 1.0  ;;  %3587 = vrot.lane.b32.xlu1 %v3504_v59, %s4719_s23  ;;  %v6788_v50 = vld [vmem:[#allocation40_spill] sm:$0xff] }
 0x50f   : > { %v3240_v52 = vpop.permute.xlu0 %3239 }
 0x510   : > { %v3314_v12 = vadd.f32 %v3240_v52, %v2930_v6  ;;  %3585 = vrot.lane.b32.xlu0 %v3503_v11, %s4719_s23  ;;  %v6789_v6 = vld [vmem:[#allocation15_spill] sm:$0xff]  ;;  %v6790_v52 = vld [vmem:[#allocation32_spill] sm:$0xff] }
 0x511   : > { %v3238_v39 = vpop.permute.xlu1 %3237 }
 0x512   : > { %v3474_v27 = vmul.f32 %v6459_v33, %v3314_v12  ;;  %v3313_v41 = vadd.f32 %v3238_v39, %v2929_v7  ;;  %v6774_v33 = vld [vmem:[#allocation12_spill] sm:$0xff]  ;;  %v2937_v12 = vmul.f32 %v6790_v52, %v6789_v6  ;;  %v6791_v39 = vld [vmem:[#allocation43_spill] sm:$0xff] }
 0x513   : > { %v2934_v25 = vmul.f32 %v6775_v5, %v6774_v33  ;;  %v6798_v5 = vld [vmem:[#allocation44_spill] sm:$0xff] }
 0x514   : > { %v3506_v63 = vmin.f32 %v3474_v27, 1.0  ;;  %v3473_v35 = vmul.f32 %v6770_v58, %v3313_v41  ;;  %v6794_v58 = vld [vmem:[#allocation33_spill] sm:$0xff] }
 0x515   : > { %v3244_v45 = vpop.permute.xlu0 %3243 }
 0x516   : > { %v3316_v28 = vadd.f32 %v3244_v45, %v2932_v24  ;;  %v3505_v14 = vmin.f32 %v3473_v35, 1.0  ;;  %3591 = vrot.lane.b32.xlu1 %v3506_v63, %s4719_s23  ;;  %v6793_v63 = vld [vmem:[#allocation18_spill] sm:$0xff] }
 0x517   : > { %v3242_v8 = vpop.permute.xlu1 %3241  ;;  %v2940_v35 = vmul.f32 %v6794_v58, %v6793_v63 }
 0x518   : > { %v3476_v15 = vmul.f32 %v6773_v4, %v3316_v28  ;;  %v3315_v40 = vadd.f32 %v3242_v8, %v2931_v61  ;;  %3589 = vrot.lane.b32.xlu0 %v3505_v14, %s4719_s23  ;;  %v6796_v61 = vld [vmem:[#allocation34_spill] sm:$0xff]  ;;  %v6797_v4 = vld [vmem:[#allocation45_spill] sm:$0xff] }
 0x519   : > { %v3248_v20 = vpop.permute.xlu0 %3247  ;;  %v2939_v14 = vmul.f32 %v6796_v61, %v6795_v18 }
 0x51a   : > { %v3508_v46 = vmin.f32 %v3476_v15, 1.0  ;;  %v3475_v57 = vmul.f32 %v6776_v37, %v3315_v40  ;;  %v3318_v23 = vadd.f32 %v3248_v20, %v2934_v25 }
 0x51b   : > { %v3246_v55 = vpop.permute.xlu1 %3245 }
 0x51c   : > { %v3507_v34 = vmin.f32 %v3475_v57, 1.0  ;;  %3595 = vrot.lane.b32.xlu1 %v3508_v46, %s4719_s23  ;;  %v3478_v1 = vmul.f32 %v6779_v43, %v3318_v23  ;;  %v3317_v54 = vadd.f32 %v3246_v55, %v2933_v62 }
 0x51e   : > { %3593 = vrot.lane.b32.xlu0 %v3507_v34, %s4719_s23  ;;  %v3510_v36 = vmin.f32 %v3478_v1, 1.0  ;;  %v3477_v22 = vmul.f32 %v6782_v53, %v3317_v54  ;;  %v3252_v51 = vpop.permute.xlu0 %3251 }
 0x51f   : > { %v3320_v13 = vadd.f32 %v3252_v51, %v2936_v48 }
 0x520   : > { %v3509_v2 = vmin.f32 %v3477_v22, 1.0  ;;  %v3250_v29 = vpop.permute.xlu1 %3249  ;;  %3599 = vrot.lane.b32.xlu1 %v3510_v36, %s4719_s23 }
 0x521   : > { %v3480_v19 = vmul.f32 %v6785_v9, %v3320_v13  ;;  %v3319_v10 = vadd.f32 %v3250_v29, %v2935_v49 }
 0x522   : > { %3597 = vrot.lane.b32.xlu0 %v3509_v2, %s4719_s23 }
 0x523   : > { %v3512_v59 = vmin.f32 %v3480_v19, 1.0  ;;  %v3479_v11 = vmul.f32 %v6788_v50, %v3319_v10 }
 0x524   : > { %v3256_v26 = vpop.permute.xlu0 %3255 }
 0x525   : > { %v3322_v47 = vadd.f32 %v3256_v26, %v2938_v60  ;;  %v3511_v17 = vmin.f32 %v3479_v11, 1.0  ;;  %3603 = vrot.lane.b32.xlu1 %v3512_v59, %s4719_s23 }
 0x526   : > { %v3254_v7 = vpop.permute.xlu1 %3253 }
 0x527   : > { %v3482_v27 = vmul.f32 %v6791_v39, %v3322_v47  ;;  %v3321_v41 = vadd.f32 %v3254_v7, %v2937_v12  ;;  %3601 = vrot.lane.b32.xlu0 %v3511_v17, %s4719_s23 }
 0x529   : > { %v3514_v32 = vmin.f32 %v3482_v27, 1.0  ;;  %v3481_v24 = vmul.f32 %v6792_v38, %v3321_v41 }
 0x52a   : > { %v3260_v28 = vpop.permute.xlu0 %3259 }
 0x52b   : > { %v3513_v45 = vmin.f32 %v3481_v24, 1.0  ;;  %3607 = vrot.lane.b32.xlu1 %v3514_v32, %s4719_s23  ;;  %v3324_v3 = vadd.f32 %v3260_v28, %v2940_v35 }
 0x52c   : > { %v3258_v8 = vpop.permute.xlu1 %3257 }
 0x52d   : > { %3605 = vrot.lane.b32.xlu0 %v3513_v45, %s4719_s23  ;;  %v3484_v15 = vmul.f32 %v6797_v4, %v3324_v3  ;;  %v3323_v40 = vadd.f32 %v3258_v8, %v2939_v14 }
 0x52f   : > { %v3516_v33 = vmin.f32 %v3484_v15, 1.0  ;;  %v3483_v25 = vmul.f32 %v6798_v5, %v3323_v40 }
 0x531   : > { %v3515_v46 = vmin.f32 %v3483_v25, 1.0  ;;  %3611 = vrot.lane.b32.xlu1 %v3516_v33, %s4719_s23 }
 0x533   : > { %3609 = vrot.lane.b32.xlu0 %v3515_v46, %s4719_s23 }
 0x55c   : > { %v3552_v37 = vpop.permute.xlu1 %3551 }
 0x55d   : > { %3646 = vst.msk [vmem:[%s6613_s26 + $0x8] sm:$0xff] %vm472_vm0, %v3552_v37 }
 0x55e   : > { %v3550_v57 = vpop.permute.xlu0 %3549 }
 0x55f   : > { %3645 = vst.msk [vmem:[%s6613_s26] sm:$0xff] %vm472_vm0, %v3550_v57 }
 0x560   : > { %v3556_v20 = vpop.permute.xlu1 %3555 }
 0x561   : > { %3648 = vst.msk [vmem:[%s6613_s26 + $0x18] sm:$0xff] %vm472_vm0, %v3556_v20 }
 0x562   : > { %v3554_v23 = vpop.permute.xlu0 %3553 }
 0x563   : > { %3647 = vst.msk [vmem:[%s6613_s26 + $0x10] sm:$0xff] %vm472_vm0, %v3554_v23 }
 0x564   : > { %v3560_v21 = vpop.permute.xlu1 %3559 }
 0x565   : > { %3650 = vst.msk [vmem:[%s6613_s26 + $0x28] sm:$0xff] %vm472_vm0, %v3560_v21 }
 0x566   : > { %v3558_v16 = vpop.permute.xlu0 %3557 }
 0x567   : > { %3649 = vst.msk [vmem:[%s6613_s26 + $0x20] sm:$0xff] %vm472_vm0, %v3558_v16 }
 0x568   : > { %v3564_v62 = vpop.permute.xlu1 %3563 }
 0x569   : > { %3652 = vst.msk [vmem:[%s6613_s26 + $0x38] sm:$0xff] %vm472_vm0, %v3564_v62 }
 0x56a   : > { %v3562_v34 = vpop.permute.xlu0 %3561 }
 0x56b   : > { %3651 = vst.msk [vmem:[%s6613_s26 + $0x30] sm:$0xff] %vm472_vm0, %v3562_v34 }
 0x56c   : > { %v3568_v55 = vpop.permute.xlu1 %3567 }
 0x56d   : > { %3654 = vst.msk [vmem:[%s6613_s26 + $0x48] sm:$0xff] %vm472_vm0, %v3568_v55 }
 0x56e   : > { %v3566_v43 = vpop.permute.xlu0 %3565 }
 0x56f   : > { %3653 = vst.msk [vmem:[%s6613_s26 + $0x40] sm:$0xff] %vm472_vm0, %v3566_v43 }
 0x570   : > { %v3572_v1 = vpop.permute.xlu1 %3571 }
 0x571   : > { %3656 = vst.msk [vmem:[%s6613_s26 + $0x58] sm:$0xff] %vm472_vm0, %v3572_v1 }
 0x572   : > { %v3570_v54 = vpop.permute.xlu0 %3569 }
 0x573   : > { %3655 = vst.msk [vmem:[%s6613_s26 + $0x50] sm:$0xff] %vm472_vm0, %v3570_v54 }
 0x574   : > { %v3576_v56 = vpop.permute.xlu1 %3575 }
 0x575   : > { %3658 = vst.msk [vmem:[%s6613_s26 + $0x68] sm:$0xff] %vm472_vm0, %v3576_v56 }
 0x576   : > { %v3574_v44 = vpop.permute.xlu0 %3573 }
 0x577   : > { %3657 = vst.msk [vmem:[%s6613_s26 + $0x60] sm:$0xff] %vm472_vm0, %v3574_v44 }
 0x578   : > { %v3580_v48 = vpop.permute.xlu1 %3579 }
 0x579   : > { %3660 = vst.msk [vmem:[%s6613_s26 + $0x78] sm:$0xff] %vm472_vm0, %v3580_v48 }
 0x57a   : > { %v3578_v36 = vpop.permute.xlu0 %3577 }
 0x57b   : > { %3659 = vst.msk [vmem:[%s6613_s26 + $0x70] sm:$0xff] %vm472_vm0, %v3578_v36 }
 0x57c   : > { %v3584_v53 = vpop.permute.xlu1 %3583 }
 0x57d   : > { %3662 = vst.msk [vmem:[%s6613_s26 + $0x88] sm:$0xff] %vm472_vm0, %v3584_v53 }
 0x57e   : > { %v3582_v22 = vpop.permute.xlu0 %3581 }
 0x57f   : > { %3661 = vst.msk [vmem:[%s6613_s26 + $0x80] sm:$0xff] %vm472_vm0, %v3582_v22 }
 0x580   : > { %v3588_v51 = vpop.permute.xlu1 %3587 }
 0x581   : > { %3664 = vst.msk [vmem:[%s6613_s26 + $0x98] sm:$0xff] %vm472_vm0, %v3588_v51 }
 0x582   : > { %v3586_v13 = vpop.permute.xlu0 %3585 }
 0x583   : > { %3663 = vst.msk [vmem:[%s6613_s26 + $0x90] sm:$0xff] %vm472_vm0, %v3586_v13 }
 0x588   : > { %v3592_v0 = vpop.permute.xlu1 %3591 }
 0x589   : > { %3666 = vst.msk [vmem:[%s6613_s26 + $0xa8] sm:$0xff] %vm472_vm0, %v3592_v0 }
 0x58a   : > { %v3590_v30 = vpop.permute.xlu0 %3589 }
 0x58b   : > { %3665 = vst.msk [vmem:[%s6613_s26 + $0xa0] sm:$0xff] %vm472_vm0, %v3590_v30 }
 0x58e   : > { %v3596_v49 = vpop.permute.xlu1 %3595 }
 0x58f   : > { %3668 = vst.msk [vmem:[%s6613_s26 + $0xb8] sm:$0xff] %vm472_vm0, %v3596_v49 }
 0x590   : > { %v3594_v2 = vpop.permute.xlu0 %3593 }
 0x591   : > { %3667 = vst.msk [vmem:[%s6613_s26 + $0xb0] sm:$0xff] %vm472_vm0, %v3594_v2 }
 0x592   : > { %v3600_v29 = vpop.permute.xlu1 %3599 }
 0x593   : > { %3670 = vst.msk [vmem:[%s6613_s26 + $0xc8] sm:$0xff] %vm472_vm0, %v3600_v29 }
 0x594   : > { %v3598_v9 = vpop.permute.xlu0 %3597 }
 0x595   : > { %3669 = vst.msk [vmem:[%s6613_s26 + $0xc0] sm:$0xff] %vm472_vm0, %v3598_v9 }
 0x597   : > { %v3604_v19 = vpop.permute.xlu1 %3603 }
 0x598   : > { %3672 = vst.msk [vmem:[%s6613_s26 + $0xd8] sm:$0xff] %vm472_vm0, %v3604_v19 }
 0x599   : > { %v3602_v10 = vpop.permute.xlu0 %3601 }
 0x59a   : > { %3671 = vst.msk [vmem:[%s6613_s26 + $0xd0] sm:$0xff] %vm472_vm0, %v3602_v10 }
 0x59d   : > { %v3608_v31 = vpop.permute.xlu1 %3607 }
 0x59e   : > { %3674 = vst.msk [vmem:[%s6613_s26 + $0xe8] sm:$0xff] %vm472_vm0, %v3608_v31 }
 0x59f   : > { %v3606_v42 = vpop.permute.xlu0 %3605 }
 0x5a0   : > { %3673 = vst.msk [vmem:[%s6613_s26 + $0xe0] sm:$0xff] %vm472_vm0, %v3606_v42 }
 0x5a3   : > { %v3612_v60 = vpop.permute.xlu1 %3611 }
 0x5a4   : > { %3676 = vst.msk [vmem:[%s6613_s26 + $0xf8] sm:$0xff] %vm472_vm0, %v3612_v60 }
 0x5a5   : > { %v3610_v59 = vpop.permute.xlu0 %3609 }
 0x5a6   : > { %3675 = vst.msk [vmem:[%s6613_s26 + $0xf0] sm:$0xff] %vm472_vm0, %v3610_v59 }
 0x5a7 PF: > { %s23_s21 = sadd.s32 1, %s4712_s21  }
 0x5a8   : > { %p20_p4 = scmp.ge.s32.totalorder %s23_s21, 4  }
 0x5aa   :  { %22 = sbr.rel (!%p20_p4) target bundleno = 1 (0x1), region = 106 }

</bundles_post_ra>
